<compile_context>
chip_gen: v7x
topology: tpu7x:2x2x1
jax: 0.10.0
libtpu: 0.0.40
codegen_flags: <defaults>
</compile_context>

<pallas_src>
import jax
import jax.numpy as jnp
from jax.experimental import pallas as pl
from jax.experimental.pallas import tpu as pltpu

MXU_DTYPE = jnp.bfloat16  # MXU input dtype; accumulation stays f32.


def _round_up(x, m):
    return (x + m - 1) // m * m


# ----------------------------------------------------------------------------
# In-kernel helpers
# ----------------------------------------------------------------------------
def _pool2x2_rows(y, ho, wo):
    """y: (ho*wo, C) f32, rows in (h, w) raster order -> (ho//2, wo//2, C)."""
    c = y.shape[-1]
    t = y.reshape(ho // 2, 2, wo, c)                 # (h_out, h_par, w, C)
    a = jnp.maximum(t[:, 0], t[:, 1])                # pool over H
    u = a.reshape(ho // 2, wo // 2, 2, c)            # (h_out, w_out, w_par, C)
    return jnp.maximum(u[:, :, 0, :], u[:, :, 1, :])  # pool over W


# ----------------------------------------------------------------------------
# conv1 (Cin=1): im2col patches -> fused matmul + bias + ReLU + 2x2 maxpool
# ----------------------------------------------------------------------------
def _make_conv1_kernel(ho, wo, kdim):
    def kernel(p_ref, w_ref, b_ref, o_ref):
        # p_ref: (1, ho, wo, kdim) f32 patches; w_ref: (kdim, Cout) bf16
        p = p_ref[0].reshape(ho * wo, kdim).astype(MXU_DTYPE)
        acc = jnp.dot(p, w_ref[...], preferred_element_type=jnp.float32)
        acc = jnp.maximum(acc + b_ref[...], 0.0)     # f32 epilogue
        o_ref[0] = _pool2x2_rows(acc, ho, wo).astype(o_ref.dtype)

    return kernel


def conv1_relu_pool(x_nhwc, wmat, bias):
    """x: (B,28,28,1) f32; wmat: (32,128) bf16 (K padded 25->32); bias: (128,)."""
    B, H, W, _ = x_nhwc.shape
    kh = kw = 5
    ho, wo = H - kh + 1, W - kw + 1
    cols = [x_nhwc[:, i:i + ho, j:j + wo, :] for i in range(kh) for j in range(kw)]
    patches = jnp.concatenate(cols, axis=-1)                       # (B,ho,wo,25)
    kdim, cout = wmat.shape
    patches = jnp.pad(patches, ((0, 0), (0, 0), (0, 0), (0, kdim - kh * kw)))

    return pl.pallas_call(
        _make_conv1_kernel(ho, wo, kdim),
        out_shape=jax.ShapeDtypeStruct((B, ho // 2, wo // 2, cout), jnp.float32),
        grid=(B,),
        in_specs=[
            pl.BlockSpec((1, ho, wo, kdim), lambda b: (b, 0, 0, 0)),
            pl.BlockSpec((kdim, cout), lambda b: (0, 0)),       # resident
            pl.BlockSpec((1, cout), lambda b: (0, 0)),          # resident
        ],
        out_specs=pl.BlockSpec((1, ho // 2, wo // 2, cout), lambda b: (b, 0, 0, 0)),
        compiler_params=pltpu.CompilerParams(dimension_semantics=("parallel",)),
    )(patches, wmat, bias.reshape(1, cout))


# ----------------------------------------------------------------------------
# conv2 (Cin=128): fused in-kernel window accumulation + bias + ReLU + pool
# (no materialized im2col; weights resident in VMEM)
# ----------------------------------------------------------------------------
def _make_conv2_kernel(hi, wi, kh, kw, cin, cout):
    ho, wo = hi - kh + 1, wi - kw + 1

    def kernel(x_ref, w_ref, b_ref, o_ref):
        x = x_ref[0]                                            # (hi, wi, cin) f32
        acc = jnp.zeros((ho * wo, cout), jnp.float32)
        for ki in range(kh):                                    # 25 shifted slabs
            for kj in range(kw):
                slab = x[ki:ki + ho, kj:kj + wo, :].reshape(ho * wo, cin)
                acc = acc + jnp.dot(slab.astype(MXU_DTYPE),
                                    w_ref[ki * kw + kj],
                                    preferred_element_type=jnp.float32)
        acc = jnp.maximum(acc + b_ref[...], 0.0)                # f32 epilogue
        o_ref[0] = _pool2x2_rows(acc, ho, wo).astype(o_ref.dtype)

    return kernel


def conv2_relu_pool(x_nhwc, w, bias):
    """x: (B,12,12,128) f32; w: (25,128,256) bf16; bias: (256,)."""
    B, hi, wi, cin = x_nhwc.shape
    kk, _, cout = w.shape
    kh = kw = 5
    ho, wo = hi - kh + 1, wi - kw + 1

    return pl.pallas_call(
        _make_conv2_kernel(hi, wi, kh, kw, cin, cout),
        out_shape=jax.ShapeDtypeStruct((B, ho // 2, wo // 2, cout), jnp.float32),
        grid=(B,),
        in_specs=[
            pl.BlockSpec((1, hi, wi, cin), lambda b: (b, 0, 0, 0)),
            pl.BlockSpec((kk, cin, cout), lambda b: (0, 0, 0)),   # resident
            pl.BlockSpec((1, cout), lambda b: (0, 0)),            # resident
        ],
        out_specs=pl.BlockSpec((1, ho // 2, wo // 2, cout), lambda b: (b, 0, 0, 0)),
        compiler_params=pltpu.CompilerParams(dimension_semantics=("parallel",)),
    )(x_nhwc, w, bias.reshape(1, cout))


# ----------------------------------------------------------------------------
# Fused linear stack: (4096->256) ReLU (256->128) ReLU (128->10[pad 128])
# Tiled (M, K) grid with f32 VMEM accumulator; w2/w3/biases resident.
# ----------------------------------------------------------------------------
def _linear_stack_kernel(x_ref, w1_ref, b1_ref, w2_ref, b2_ref, w3_ref, b3_ref,
                         o_ref, acc_ref):
    k = pl.program_id(1)

    @pl.when(k == 0)
    def _():
        acc_ref[...] = jnp.zeros_like(acc_ref)

    acc_ref[...] += jnp.dot(x_ref[...].astype(MXU_DTYPE), w1_ref[...],
                            preferred_element_type=jnp.float32)

    @pl.when(k == pl.num_programs(1) - 1)
    def _():
        h1 = jnp.maximum(acc_ref[...] + b1_ref[...], 0.0)
        h2 = jnp.dot(h1.astype(MXU_DTYPE), w2_ref[...],
                     preferred_element_type=jnp.float32)
        h2 = jnp.maximum(h2 + b2_ref[...], 0.0)
        h3 = jnp.dot(h2.astype(MXU_DTYPE), w3_ref[...],
                     preferred_element_type=jnp.float32)
        o_ref[...] = (h3 + b3_ref[...]).astype(o_ref.dtype)


def linear_stack(x, w1, b1, w2, b2, w3p, b3p, n_out):
    """x: (B, K1) f32.  Returns (B, n_out) f32."""
    B, K1 = x.shape
    N1 = w1.shape[1]
    N2 = w2.shape[1]
    Np = w3p.shape[1]

    tk = 512
    assert K1 % tk == 0
    tm = 128 if B >= 128 else max(8, _round_up(B, 8))
    Mp = _round_up(B, tm)
    xp = jnp.pad(x, ((0, Mp - B), (0, 0)))

    out = pl.pallas_call(
        _linear_stack_kernel,
        out_shape=jax.ShapeDtypeStruct((Mp, Np), jnp.float32),
        grid=(Mp // tm, K1 // tk),
        in_specs=[
            pl.BlockSpec((tm, tk), lambda m, k: (m, k)),
            pl.BlockSpec((tk, N1), lambda m, k: (k, 0)),
            pl.BlockSpec((1, N1), lambda m, k: (0, 0)),     # resident
            pl.BlockSpec((N1, N2), lambda m, k: (0, 0)),    # resident
            pl.BlockSpec((1, N2), lambda m, k: (0, 0)),     # resident
            pl.BlockSpec((N2, Np), lambda m, k: (0, 0)),    # resident
            pl.BlockSpec((1, Np), lambda m, k: (0, 0)),     # resident
        ],
        out_specs=pl.BlockSpec((tm, Np), lambda m, k: (m, 0)),
        scratch_shapes=[pltpu.VMEM((tm, N1), jnp.float32)],
        compiler_params=pltpu.CompilerParams(
            dimension_semantics=("parallel", "arbitrary")),
    )(xp, w1, b1.reshape(1, N1), w2, b2.reshape(1, N2), w3p, b3p.reshape(1, Np))
    return out[:B, :n_out]


# ----------------------------------------------------------------------------
# Forward pass (semantics identical to MNISTModel.forward)
# ----------------------------------------------------------------------------
def mnist_forward(x_nchw, params):
    x = jnp.transpose(x_nchw, (0, 2, 3, 1))                        # NCHW -> NHWC
    x = conv1_relu_pool(x, params["w1_mat"], params["b_conv1"])    # (B,12,12,128)
    x = conv2_relu_pool(x, params["w2_mat"], params["b_conv2"])    # (B, 4, 4,256)
    B = x.shape[0]
    # NHWC flatten; w_l1 rows were pre-permuted to this order (no runtime transpose).
    x = x.reshape(B, 4 * 4 * 256)
    return linear_stack(x, params["w_l1"], params["b_l1"],
                        params["w_l2"], params["b_l2"],
                        params["w_l3p"], params["b_l3p"], n_out=10)


# ----------------------------------------------------------------------------
# One-time parameter preprocessing (hoisted out of the jitted forward)
# ----------------------------------------------------------------------------
def preprocess_params(raw):
    kh = kw = 5
    # conv1: (O=128, Cin=1, 5, 5) -> (25, 128) rows ordered (kh, kw, cin); pad K 25->32.
    w1 = jnp.transpose(raw["w_conv1"], (2, 3, 1, 0)).reshape(kh * kw, 128)
    w1 = jnp.pad(w1, ((0, 32 - kh * kw), (0, 0))).astype(MXU_DTYPE)
    # conv2: (O=256, Cin=128, 5, 5) -> (25, 128, 256) indexed [kh*5+kw, cin, cout].
    w2 = jnp.transpose(raw["w_conv2"], (2, 3, 1, 0)).reshape(kh * kw, 128, 256)
    w2 = w2.astype(MXU_DTYPE)
    # l1: rows are in torch NCHW flatten order (c, h, w); permute to NHWC (h, w, c).
    wl1 = raw["w_l1"].reshape(256, 4, 4, 256)
    wl1 = jnp.transpose(wl1, (1, 2, 0, 3)).reshape(4096, 256).astype(MXU_DTYPE)
    wl2 = raw["w_l2"].astype(MXU_DTYPE)
    # l3: pad output N 10 -> 128 for lane-dense stores (sliced back in the wrapper).
    wl3 = jnp.pad(raw["w_l3"], ((0, 0), (0, 128 - 10))).astype(MXU_DTYPE)
    bl3 = jnp.pad(raw["b_l3"], (0, 128 - 10))
    return {
        "w1_mat": w1, "b_conv1": raw["b_conv1"],
        "w2_mat": w2, "b_conv2": raw["b_conv2"],
        "w_l1": wl1, "b_l1": raw["b_l1"],
        "w_l2": wl2, "b_l2": raw["b_l2"],
        "w_l3p": wl3, "b_l3p": bl3,
    }


# ----------------------------------------------------------------------------
# Deterministic synthetic parameters (MNISTModel shapes)
# ----------------------------------------------------------------------------
def init_params(key):
    ks = jax.random.split(key, 8)
    p = {
        "w_conv1": 0.10 * jax.random.normal(ks[0], (128, 1, 5, 5), jnp.float32),
        "b_conv1": 0.01 * jax.random.normal(ks[1], (128,), jnp.float32),
        "w_conv2": 0.02 * jax.random.normal(ks[2], (256, 128, 5, 5), jnp.float32),
        "b_conv2": 0.01 * jax.random.normal(ks[3], (256,), jnp.float32),
        "w_l1": 0.02 * jax.random.normal(ks[4], (4096, 256), jnp.float32),
        "b_l1": jnp.zeros((256,), jnp.float32),
        "w_l2": 0.05 * jax.random.normal(ks[5], (256, 128), jnp.float32),
        "b_l2": jnp.zeros((128,), jnp.float32),
        "w_l3": 0.05 * jax.random.normal(ks[6], (128, 10), jnp.float32),
        "b_l3": jnp.zeros((10,), jnp.float32),
    }
    return p, ks[7]


if __name__ == "__main__":
    key = jax.random.PRNGKey(0)
    raw_params, xkey = init_params(key)
    params = preprocess_params(raw_params)   # offline weight layout / dtype prep
    # MNIST-shaped input: the 4096-unit linear layer pins spatial size to 28x28.
    x = jax.random.normal(xkey, (2, 1, 28, 28), jnp.float32)

    fwd = jax.jit(mnist_forward)
    logits = jax.block_until_ready(fwd(x, params))
    assert logits.shape == (2, 10) and logits.dtype == jnp.float32
    print("KERNEL_OK")
</pallas_src>

<mosaic_0001>
module attributes {stable_mosaic.version = 11 : i64} {
  func.func @kernel(%arg0: i32, %arg1: memref<1x24x24x32xf32, #tpu.memory_space<vmem>>, %arg2: memref<32x128xbf16, #tpu.memory_space<vmem>>, %arg3: memref<1x128xf32, #tpu.memory_space<vmem>>, %arg4: memref<1x12x12x128xf32, #tpu.memory_space<vmem>>) attributes {dimension_semantics = [#tpu.dimension_semantics<parallel>], iteration_bounds = array<i64: 2>, scalar_prefetch = 0 : i64, scratch_operands = 0 : i64, tpu.core_type = #tpu.core_type<tc>, window_params = [{transform_indices = @transform_0, window_bounds = array<i64: 1, 24, 24, 32>}, {pipeline_mode = #tpu.pipeline_mode<synchronous>, transform_indices = @transform_1, window_bounds = array<i64: 32, 128>}, {pipeline_mode = #tpu.pipeline_mode<synchronous>, transform_indices = @transform_2, window_bounds = array<i64: 1, 128>}, {transform_indices = @transform_3, window_bounds = array<i64: 1, 12, 12, 128>}]} {
    %c0 = arith.constant 0 : index
    %c0_0 = arith.constant 0 : index
    %c0_1 = arith.constant 0 : index
    %c0_2 = arith.constant 0 : index
    %0 = vector.load %arg1[%c0, %c0_0, %c0_1, %c0_2] : memref<1x24x24x32xf32, #tpu.memory_space<vmem>>, vector<1x24x24x32xf32>
    %1 = vector.shape_cast %0 : vector<1x24x24x32xf32> to vector<24x24x32xf32>
    %2 = vector.shape_cast %1 : vector<24x24x32xf32> to vector<576x32xf32>
    %3 = arith.truncf %2 : vector<576x32xf32> to vector<576x32xbf16>
    %c0_3 = arith.constant 0 : index
    %c0_4 = arith.constant 0 : index
    %4 = vector.load %arg2[%c0_3, %c0_4] : memref<32x128xbf16, #tpu.memory_space<vmem>>, vector<32x128xbf16>
    %cst = arith.constant dense<0.000000e+00> : vector<576x128xf32>
    %5 = tpu.matmul %3, %4, %cst {dimension_numbers = #tpu.dot_dimension_numbers<[1], [0], [0], [1], [0, 0, 1, 1], [], []>} : vector<576x32xbf16>, vector<32x128xbf16>, vector<576x128xf32> -> vector<576x128xf32>
    %c0_5 = arith.constant 0 : index
    %c0_6 = arith.constant 0 : index
    %6 = vector.load %arg3[%c0_5, %c0_6] : memref<1x128xf32, #tpu.memory_space<vmem>>, vector<1x128xf32>
    %7 = vector.broadcast %6 : vector<1x128xf32> to vector<576x128xf32>
    %8 = arith.addf %5, %7 : vector<576x128xf32>
    %cst_7 = arith.constant 0.000000e+00 : f32
    %9 = vector.broadcast %cst_7 : f32 to vector<576x128xf32>
    %10 = arith.maximumf %8, %9 : vector<576x128xf32>
    %11 = vector.shape_cast %10 : vector<576x128xf32> to vector<12x2x24x128xf32>
    %12 = vector.extract_strided_slice %11 {offsets = [0, 0, 0, 0], sizes = [12, 1, 24, 128], strides = [1, 1, 1, 1]} : vector<12x2x24x128xf32> to vector<12x1x24x128xf32>
    %13 = vector.shape_cast %12 : vector<12x1x24x128xf32> to vector<12x24x128xf32>
    %14 = vector.extract_strided_slice %11 {offsets = [0, 1, 0, 0], sizes = [12, 1, 24, 128], strides = [1, 1, 1, 1]} : vector<12x2x24x128xf32> to vector<12x1x24x128xf32>
    %15 = vector.shape_cast %14 : vector<12x1x24x128xf32> to vector<12x24x128xf32>
    %16 = arith.maximumf %13, %15 : vector<12x24x128xf32>
    %17 = vector.shape_cast %16 : vector<12x24x128xf32> to vector<12x12x2x128xf32>
    %18 = vector.extract_strided_slice %17 {offsets = [0, 0, 0, 0], sizes = [12, 12, 1, 128], strides = [1, 1, 1, 1]} : vector<12x12x2x128xf32> to vector<12x12x1x128xf32>
    %19 = vector.shape_cast %18 : vector<12x12x1x128xf32> to vector<12x12x128xf32>
    %20 = vector.extract_strided_slice %17 {offsets = [0, 0, 1, 0], sizes = [12, 12, 1, 128], strides = [1, 1, 1, 1]} : vector<12x12x2x128xf32> to vector<12x12x1x128xf32>
    %21 = vector.shape_cast %20 : vector<12x12x1x128xf32> to vector<12x12x128xf32>
    %22 = arith.maximumf %19, %21 : vector<12x12x128xf32>
    %c0_8 = arith.constant 0 : index
    %c0_9 = arith.constant 0 : index
    %c0_10 = arith.constant 0 : index
    %c0_11 = arith.constant 0 : index
    %23 = vector.load %arg4[%c0_8, %c0_9, %c0_10, %c0_11] : memref<1x12x12x128xf32, #tpu.memory_space<vmem>>, vector<1x12x12x128xf32>
    %24 = vector.shape_cast %23 : vector<1x12x12x128xf32> to vector<12x12x128xf32>
    %25 = vector.shape_cast %22 : vector<12x12x128xf32> to vector<1x12x12x128xf32>
    tpu.vector_store %arg4[%c0_8, %c0_9, %c0_10, %c0_11], %25 {strides = array<i32>} : memref<1x12x12x128xf32, #tpu.memory_space<vmem>>, vector<1x12x12x128xf32>,
    return
  }
  func.func @transform_0(%arg0: i32) -> (i32, i32, i32, i32) {
    %c0_i32 = arith.constant 0 : i32
    %c0_i32_0 = arith.constant 0 : i32
    %c0_i32_1 = arith.constant 0 : i32
    %c0_i32_2 = arith.constant 0 : i32
    return %arg0, %c0_i32, %c0_i32_0, %c0_i32_1 : i32, i32, i32, i32
  }
  func.func @transform_1(%arg0: i32) -> (i32, i32) {
    %c0_i32 = arith.constant 0 : i32
    %c0_i32_0 = arith.constant 0 : i32
    %c0_i32_1 = arith.constant 0 : i32
    return %c0_i32, %c0_i32_0 : i32, i32
  }
  func.func @transform_2(%arg0: i32) -> (i32, i32) {
    %c0_i32 = arith.constant 0 : i32
    %c0_i32_0 = arith.constant 0 : i32
    %c0_i32_1 = arith.constant 0 : i32
    return %c0_i32, %c0_i32_0 : i32, i32
  }
  func.func @transform_3(%arg0: i32) -> (i32, i32, i32, i32) {
    %c0_i32 = arith.constant 0 : i32
    %c0_i32_0 = arith.constant 0 : i32
    %c0_i32_1 = arith.constant 0 : i32
    %c0_i32_2 = arith.constant 0 : i32
    return %arg0, %c0_i32, %c0_i32_0, %c0_i32_1 : i32, i32, i32, i32
  }
}

module attributes {stable_mosaic.version = 11 : i64} {
  func.func @kernel(%arg0: i32, %arg1: memref<1x12x12x128xf32, #tpu.memory_space<vmem>>, %arg2: memref<25x128x256xbf16, #tpu.memory_space<vmem>>, %arg3: memref<1x256xf32, #tpu.memory_space<vmem>>, %arg4: memref<1x4x4x256xf32, #tpu.memory_space<vmem>>) attributes {dimension_semantics = [#tpu.dimension_semantics<parallel>], iteration_bounds = array<i64: 2>, scalar_prefetch = 0 : i64, scratch_operands = 0 : i64, tpu.core_type = #tpu.core_type<tc>, window_params = [{transform_indices = @transform_0, window_bounds = array<i64: 1, 12, 12, 128>}, {pipeline_mode = #tpu.pipeline_mode<synchronous>, transform_indices = @transform_1, window_bounds = array<i64: 25, 128, 256>}, {pipeline_mode = #tpu.pipeline_mode<synchronous>, transform_indices = @transform_2, window_bounds = array<i64: 1, 256>}, {transform_indices = @transform_3, window_bounds = array<i64: 1, 4, 4, 256>}]} {
    %c0 = arith.constant 0 : index
    %c0_0 = arith.constant 0 : index
    %c0_1 = arith.constant 0 : index
    %c0_2 = arith.constant 0 : index
    %0 = vector.load %arg1[%c0, %c0_0, %c0_1, %c0_2] : memref<1x12x12x128xf32, #tpu.memory_space<vmem>>, vector<1x12x12x128xf32>
    %1 = vector.shape_cast %0 : vector<1x12x12x128xf32> to vector<12x12x128xf32>
    %cst = arith.constant 0.000000e+00 : f32
    %2 = vector.broadcast %cst : f32 to vector<64x256xf32>
    %3 = vector.extract_strided_slice %1 {offsets = [0, 0, 0], sizes = [8, 8, 128], strides = [1, 1, 1]} : vector<12x12x128xf32> to vector<8x8x128xf32>
    %4 = vector.shape_cast %3 : vector<8x8x128xf32> to vector<64x128xf32>
    %5 = arith.truncf %4 : vector<64x128xf32> to vector<64x128xbf16>
    %c0_3 = arith.constant 0 : index
    %c0_4 = arith.constant 0 : index
    %c0_5 = arith.constant 0 : index
    %6 = vector.load %arg2[%c0_3, %c0_4, %c0_5] : memref<25x128x256xbf16, #tpu.memory_space<vmem>>, vector<1x128x256xbf16>
    %7 = vector.shape_cast %6 : vector<1x128x256xbf16> to vector<128x256xbf16>
    %cst_6 = arith.constant dense<0.000000e+00> : vector<64x256xf32>
    %8 = tpu.matmul %5, %7, %cst_6 {dimension_numbers = #tpu.dot_dimension_numbers<[1], [0], [0], [1], [0, 0, 1, 1], [], []>} : vector<64x128xbf16>, vector<128x256xbf16>, vector<64x256xf32> -> vector<64x256xf32>
    %9 = arith.addf %2, %8 : vector<64x256xf32>
    %10 = vector.extract_strided_slice %1 {offsets = [0, 1, 0], sizes = [8, 8, 128], strides = [1, 1, 1]} : vector<12x12x128xf32> to vector<8x8x128xf32>
    %11 = vector.shape_cast %10 : vector<8x8x128xf32> to vector<64x128xf32>
    %12 = arith.truncf %11 : vector<64x128xf32> to vector<64x128xbf16>
    %c1 = arith.constant 1 : index
    %c0_7 = arith.constant 0 : index
    %c0_8 = arith.constant 0 : index
    %13 = vector.load %arg2[%c1, %c0_7, %c0_8] : memref<25x128x256xbf16, #tpu.memory_space<vmem>>, vector<1x128x256xbf16>
    %14 = vector.shape_cast %13 : vector<1x128x256xbf16> to vector<128x256xbf16>
    %cst_9 = arith.constant dense<0.000000e+00> : vector<64x256xf32>
    %15 = tpu.matmul %12, %14, %cst_9 {dimension_numbers = #tpu.dot_dimension_numbers<[1], [0], [0], [1], [0, 0, 1, 1], [], []>} : vector<64x128xbf16>, vector<128x256xbf16>, vector<64x256xf32> -> vector<64x256xf32>
    %16 = arith.addf %9, %15 : vector<64x256xf32>
    %17 = vector.extract_strided_slice %1 {offsets = [0, 2, 0], sizes = [8, 8, 128], strides = [1, 1, 1]} : vector<12x12x128xf32> to vector<8x8x128xf32>
    %18 = vector.shape_cast %17 : vector<8x8x128xf32> to vector<64x128xf32>
    %19 = arith.truncf %18 : vector<64x128xf32> to vector<64x128xbf16>
    %c2 = arith.constant 2 : index
    %c0_10 = arith.constant 0 : index
    %c0_11 = arith.constant 0 : index
    %20 = vector.load %arg2[%c2, %c0_10, %c0_11] : memref<25x128x256xbf16, #tpu.memory_space<vmem>>, vector<1x128x256xbf16>
    %21 = vector.shape_cast %20 : vector<1x128x256xbf16> to vector<128x256xbf16>
    %cst_12 = arith.constant dense<0.000000e+00> : vector<64x256xf32>
    %22 = tpu.matmul %19, %21, %cst_12 {dimension_numbers = #tpu.dot_dimension_numbers<[1], [0], [0], [1], [0, 0, 1, 1], [], []>} : vector<64x128xbf16>, vector<128x256xbf16>, vector<64x256xf32> -> vector<64x256xf32>
    %23 = arith.addf %16, %22 : vector<64x256xf32>
    %24 = vector.extract_strided_slice %1 {offsets = [0, 3, 0], sizes = [8, 8, 128], strides = [1, 1, 1]} : vector<12x12x128xf32> to vector<8x8x128xf32>
    %25 = vector.shape_cast %24 : vector<8x8x128xf32> to vector<64x128xf32>
    %26 = arith.truncf %25 : vector<64x128xf32> to vector<64x128xbf16>
    %c3 = arith.constant 3 : index
    %c0_13 = arith.constant 0 : index
    %c0_14 = arith.constant 0 : index
    %27 = vector.load %arg2[%c3, %c0_13, %c0_14] : memref<25x128x256xbf16, #tpu.memory_space<vmem>>, vector<1x128x256xbf16>
    %28 = vector.shape_cast %27 : vector<1x128x256xbf16> to vector<128x256xbf16>
    %cst_15 = arith.constant dense<0.000000e+00> : vector<64x256xf32>
    %29 = tpu.matmul %26, %28, %cst_15 {dimension_numbers = #tpu.dot_dimension_numbers<[1], [0], [0], [1], [0, 0, 1, 1], [], []>} : vector<64x128xbf16>, vector<128x256xbf16>, vector<64x256xf32> -> vector<64x256xf32>
    %30 = arith.addf %23, %29 : vector<64x256xf32>
    %31 = vector.extract_strided_slice %1 {offsets = [0, 4, 0], sizes = [8, 8, 128], strides = [1, 1, 1]} : vector<12x12x128xf32> to vector<8x8x128xf32>
    %32 = vector.shape_cast %31 : vector<8x8x128xf32> to vector<64x128xf32>
    %33 = arith.truncf %32 : vector<64x128xf32> to vector<64x128xbf16>
    %c4 = arith.constant 4 : index
    %c0_16 = arith.constant 0 : index
    %c0_17 = arith.constant 0 : index
    %34 = vector.load %arg2[%c4, %c0_16, %c0_17] : memref<25x128x256xbf16, #tpu.memory_space<vmem>>, vector<1x128x256xbf16>
    %35 = vector.shape_cast %34 : vector<1x128x256xbf16> to vector<128x256xbf16>
    %cst_18 = arith.constant dense<0.000000e+00> : vector<64x256xf32>
    %36 = tpu.matmul %33, %35, %cst_18 {dimension_numbers = #tpu.dot_dimension_numbers<[1], [0], [0], [1], [0, 0, 1, 1], [], []>} : vector<64x128xbf16>, vector<128x256xbf16>, vector<64x256xf32> -> vector<64x256xf32>
    %37 = arith.addf %30, %36 : vector<64x256xf32>
    %38 = vector.extract_strided_slice %1 {offsets = [1, 0, 0], sizes = [8, 8, 128], strides = [1, 1, 1]} : vector<12x12x128xf32> to vector<8x8x128xf32>
    %39 = vector.shape_cast %38 : vector<8x8x128xf32> to vector<64x128xf32>
    %40 = arith.truncf %39 : vector<64x128xf32> to vector<64x128xbf16>
    %c5 = arith.constant 5 : index
    %c0_19 = arith.constant 0 : index
    %c0_20 = arith.constant 0 : index
    %41 = vector.load %arg2[%c5, %c0_19, %c0_20] : memref<25x128x256xbf16, #tpu.memory_space<vmem>>, vector<1x128x256xbf16>
    %42 = vector.shape_cast %41 : vector<1x128x256xbf16> to vector<128x256xbf16>
    %cst_21 = arith.constant dense<0.000000e+00> : vector<64x256xf32>
    %43 = tpu.matmul %40, %42, %cst_21 {dimension_numbers = #tpu.dot_dimension_numbers<[1], [0], [0], [1], [0, 0, 1, 1], [], []>} : vector<64x128xbf16>, vector<128x256xbf16>, vector<64x256xf32> -> vector<64x256xf32>
    %44 = arith.addf %37, %43 : vector<64x256xf32>
    %45 = vector.extract_strided_slice %1 {offsets = [1, 1, 0], sizes = [8, 8, 128], strides = [1, 1, 1]} : vector<12x12x128xf32> to vector<8x8x128xf32>
    %46 = vector.shape_cast %45 : vector<8x8x128xf32> to vector<64x128xf32>
    %47 = arith.truncf %46 : vector<64x128xf32> to vector<64x128xbf16>
    %c6 = arith.constant 6 : index
    %c0_22 = arith.constant 0 : index
    %c0_23 = arith.constant 0 : index
    %48 = vector.load %arg2[%c6, %c0_22, %c0_23] : memref<25x128x256xbf16, #tpu.memory_space<vmem>>, vector<1x128x256xbf16>
    %49 = vector.shape_cast %48 : vector<1x128x256xbf16> to vector<128x256xbf16>
    %cst_24 = arith.constant dense<0.000000e+00> : vector<64x256xf32>
    %50 = tpu.matmul %47, %49, %cst_24 {dimension_numbers = #tpu.dot_dimension_numbers<[1], [0], [0], [1], [0, 0, 1, 1], [], []>} : vector<64x128xbf16>, vector<128x256xbf16>, vector<64x256xf32> -> vector<64x256xf32>
    %51 = arith.addf %44, %50 : vector<64x256xf32>
    %52 = vector.extract_strided_slice %1 {offsets = [1, 2, 0], sizes = [8, 8, 128], strides = [1, 1, 1]} : vector<12x12x128xf32> to vector<8x8x128xf32>
    %53 = vector.shape_cast %52 : vector<8x8x128xf32> to vector<64x128xf32>
    %54 = arith.truncf %53 : vector<64x128xf32> to vector<64x128xbf16>
    %c7 = arith.constant 7 : index
    %c0_25 = arith.constant 0 : index
    %c0_26 = arith.constant 0 : index
    %55 = vector.load %arg2[%c7, %c0_25, %c0_26] : memref<25x128x256xbf16, #tpu.memory_space<vmem>>, vector<1x128x256xbf16>
    %56 = vector.shape_cast %55 : vector<1x128x256xbf16> to vector<128x256xbf16>
    %cst_27 = arith.constant dense<0.000000e+00> : vector<64x256xf32>
    %57 = tpu.matmul %54, %56, %cst_27 {dimension_numbers = #tpu.dot_dimension_numbers<[1], [0], [0], [1], [0, 0, 1, 1], [], []>} : vector<64x128xbf16>, vector<128x256xbf16>, vector<64x256xf32> -> vector<64x256xf32>
    %58 = arith.addf %51, %57 : vector<64x256xf32>
    %59 = vector.extract_strided_slice %1 {offsets = [1, 3, 0], sizes = [8, 8, 128], strides = [1, 1, 1]} : vector<12x12x128xf32> to vector<8x8x128xf32>
    %60 = vector.shape_cast %59 : vector<8x8x128xf32> to vector<64x128xf32>
    %61 = arith.truncf %60 : vector<64x128xf32> to vector<64x128xbf16>
    %c8 = arith.constant 8 : index
    %c0_28 = arith.constant 0 : index
    %c0_29 = arith.constant 0 : index
    %62 = vector.load %arg2[%c8, %c0_28, %c0_29] : memref<25x128x256xbf16, #tpu.memory_space<vmem>>, vector<1x128x256xbf16>
    %63 = vector.shape_cast %62 : vector<1x128x256xbf16> to vector<128x256xbf16>
    %cst_30 = arith.constant dense<0.000000e+00> : vector<64x256xf32>
    %64 = tpu.matmul %61, %63, %cst_30 {dimension_numbers = #tpu.dot_dimension_numbers<[1], [0], [0], [1], [0, 0, 1, 1], [], []>} : vector<64x128xbf16>, vector<128x256xbf16>, vector<64x256xf32> -> vector<64x256xf32>
    %65 = arith.addf %58, %64 : vector<64x256xf32>
    %66 = vector.extract_strided_slice %1 {offsets = [1, 4, 0], sizes = [8, 8, 128], strides = [1, 1, 1]} : vector<12x12x128xf32> to vector<8x8x128xf32>
    %67 = vector.shape_cast %66 : vector<8x8x128xf32> to vector<64x128xf32>
    %68 = arith.truncf %67 : vector<64x128xf32> to vector<64x128xbf16>
    %c9 = arith.constant 9 : index
    %c0_31 = arith.constant 0 : index
    %c0_32 = arith.constant 0 : index
    %69 = vector.load %arg2[%c9, %c0_31, %c0_32] : memref<25x128x256xbf16, #tpu.memory_space<vmem>>, vector<1x128x256xbf16>
    %70 = vector.shape_cast %69 : vector<1x128x256xbf16> to vector<128x256xbf16>
    %cst_33 = arith.constant dense<0.000000e+00> : vector<64x256xf32>
    %71 = tpu.matmul %68, %70, %cst_33 {dimension_numbers = #tpu.dot_dimension_numbers<[1], [0], [0], [1], [0, 0, 1, 1], [], []>} : vector<64x128xbf16>, vector<128x256xbf16>, vector<64x256xf32> -> vector<64x256xf32>
    %72 = arith.addf %65, %71 : vector<64x256xf32>
    %73 = vector.extract_strided_slice %1 {offsets = [2, 0, 0], sizes = [8, 8, 128], strides = [1, 1, 1]} : vector<12x12x128xf32> to vector<8x8x128xf32>
    %74 = vector.shape_cast %73 : vector<8x8x128xf32> to vector<64x128xf32>
    %75 = arith.truncf %74 : vector<64x128xf32> to vector<64x128xbf16>
    %c10 = arith.constant 10 : index
    %c0_34 = arith.constant 0 : index
    %c0_35 = arith.constant 0 : index
    %76 = vector.load %arg2[%c10, %c0_34, %c0_35] : memref<25x128x256xbf16, #tpu.memory_space<vmem>>, vector<1x128x256xbf16>
    %77 = vector.shape_cast %76 : vector<1x128x256xbf16> to vector<128x256xbf16>
    %cst_36 = arith.constant dense<0.000000e+00> : vector<64x256xf32>
    %78 = tpu.matmul %75, %77, %cst_36 {dimension_numbers = #tpu.dot_dimension_numbers<[1], [0], [0], [1], [0, 0, 1, 1], [], []>} : vector<64x128xbf16>, vector<128x256xbf16>, vector<64x256xf32> -> vector<64x256xf32>
    %79 = arith.addf %72, %78 : vector<64x256xf32>
    %80 = vector.extract_strided_slice %1 {offsets = [2, 1, 0], sizes = [8, 8, 128], strides = [1, 1, 1]} : vector<12x12x128xf32> to vector<8x8x128xf32>
    %81 = vector.shape_cast %80 : vector<8x8x128xf32> to vector<64x128xf32>
    %82 = arith.truncf %81 : vector<64x128xf32> to vector<64x128xbf16>
    %c11 = arith.constant 11 : index
    %c0_37 = arith.constant 0 : index
    %c0_38 = arith.constant 0 : index
    %83 = vector.load %arg2[%c11, %c0_37, %c0_38] : memref<25x128x256xbf16, #tpu.memory_space<vmem>>, vector<1x128x256xbf16>
    %84 = vector.shape_cast %83 : vector<1x128x256xbf16> to vector<128x256xbf16>
    %cst_39 = arith.constant dense<0.000000e+00> : vector<64x256xf32>
    %85 = tpu.matmul %82, %84, %cst_39 {dimension_numbers = #tpu.dot_dimension_numbers<[1], [0], [0], [1], [0, 0, 1, 1], [], []>} : vector<64x128xbf16>, vector<128x256xbf16>, vector<64x256xf32> -> vector<64x256xf32>
    %86 = arith.addf %79, %85 : vector<64x256xf32>
    %87 = vector.extract_strided_slice %1 {offsets = [2, 2, 0], sizes = [8, 8, 128], strides = [1, 1, 1]} : vector<12x12x128xf32> to vector<8x8x128xf32>
    %88 = vector.shape_cast %87 : vector<8x8x128xf32> to vector<64x128xf32>
    %89 = arith.truncf %88 : vector<64x128xf32> to vector<64x128xbf16>
    %c12 = arith.constant 12 : index
    %c0_40 = arith.constant 0 : index
    %c0_41 = arith.constant 0 : index
    %90 = vector.load %arg2[%c12, %c0_40, %c0_41] : memref<25x128x256xbf16, #tpu.memory_space<vmem>>, vector<1x128x256xbf16>
    %91 = vector.shape_cast %90 : vector<1x128x256xbf16> to vector<128x256xbf16>
    %cst_42 = arith.constant dense<0.000000e+00> : vector<64x256xf32>
    %92 = tpu.matmul %89, %91, %cst_42 {dimension_numbers = #tpu.dot_dimension_numbers<[1], [0], [0], [1], [0, 0, 1, 1], [], []>} : vector<64x128xbf16>, vector<128x256xbf16>, vector<64x256xf32> -> vector<64x256xf32>
    %93 = arith.addf %86, %92 : vector<64x256xf32>
    %94 = vector.extract_strided_slice %1 {offsets = [2, 3, 0], sizes = [8, 8, 128], strides = [1, 1, 1]} : vector<12x12x128xf32> to vector<8x8x128xf32>
    %95 = vector.shape_cast %94 : vector<8x8x128xf32> to vector<64x128xf32>
    %96 = arith.truncf %95 : vector<64x128xf32> to vector<64x128xbf16>
    %c13 = arith.constant 13 : index
    %c0_43 = arith.constant 0 : index
    %c0_44 = arith.constant 0 : index
    %97 = vector.load %arg2[%c13, %c0_43, %c0_44] : memref<25x128x256xbf16, #tpu.memory_space<vmem>>, vector<1x128x256xbf16>
    %98 = vector.shape_cast %97 : vector<1x128x256xbf16> to vector<128x256xbf16>
    %cst_45 = arith.constant dense<0.000000e+00> : vector<64x256xf32>
    %99 = tpu.matmul %96, %98, %cst_45 {dimension_numbers = #tpu.dot_dimension_numbers<[1], [0], [0], [1], [0, 0, 1, 1], [], []>} : vector<64x128xbf16>, vector<128x256xbf16>, vector<64x256xf32> -> vector<64x256xf32>
    %100 = arith.addf %93, %99 : vector<64x256xf32>
    %101 = vector.extract_strided_slice %1 {offsets = [2, 4, 0], sizes = [8, 8, 128], strides = [1, 1, 1]} : vector<12x12x128xf32> to vector<8x8x128xf32>
    %102 = vector.shape_cast %101 : vector<8x8x128xf32> to vector<64x128xf32>
    %103 = arith.truncf %102 : vector<64x128xf32> to vector<64x128xbf16>
    %c14 = arith.constant 14 : index
    %c0_46 = arith.constant 0 : index
    %c0_47 = arith.constant 0 : index
    %104 = vector.load %arg2[%c14, %c0_46, %c0_47] : memref<25x128x256xbf16, #tpu.memory_space<vmem>>, vector<1x128x256xbf16>
    %105 = vector.shape_cast %104 : vector<1x128x256xbf16> to vector<128x256xbf16>
    %cst_48 = arith.constant dense<0.000000e+00> : vector<64x256xf32>
    %106 = tpu.matmul %103, %105, %cst_48 {dimension_numbers = #tpu.dot_dimension_numbers<[1], [0], [0], [1], [0, 0, 1, 1], [], []>} : vector<64x128xbf16>, vector<128x256xbf16>, vector<64x256xf32> -> vector<64x256xf32>
    %107 = arith.addf %100, %106 : vector<64x256xf32>
    %108 = vector.extract_strided_slice %1 {offsets = [3, 0, 0], sizes = [8, 8, 128], strides = [1, 1, 1]} : vector<12x12x128xf32> to vector<8x8x128xf32>
    %109 = vector.shape_cast %108 : vector<8x8x128xf32> to vector<64x128xf32>
    %110 = arith.truncf %109 : vector<64x128xf32> to vector<64x128xbf16>
    %c15 = arith.constant 15 : index
    %c0_49 = arith.constant 0 : index
    %c0_50 = arith.constant 0 : index
    %111 = vector.load %arg2[%c15, %c0_49, %c0_50] : memref<25x128x256xbf16, #tpu.memory_space<vmem>>, vector<1x128x256xbf16>
    %112 = vector.shape_cast %111 : vector<1x128x256xbf16> to vector<128x256xbf16>
    %cst_51 = arith.constant dense<0.000000e+00> : vector<64x256xf32>
    %113 = tpu.matmul %110, %112, %cst_51 {dimension_numbers = #tpu.dot_dimension_numbers<[1], [0], [0], [1], [0, 0, 1, 1], [], []>} : vector<64x128xbf16>, vector<128x256xbf16>, vector<64x256xf32> -> vector<64x256xf32>
    %114 = arith.addf %107, %113 : vector<64x256xf32>
    %115 = vector.extract_strided_slice %1 {offsets = [3, 1, 0], sizes = [8, 8, 128], strides = [1, 1, 1]} : vector<12x12x128xf32> to vector<8x8x128xf32>
    %116 = vector.shape_cast %115 : vector<8x8x128xf32> to vector<64x128xf32>
    %117 = arith.truncf %116 : vector<64x128xf32> to vector<64x128xbf16>
    %c16 = arith.constant 16 : index
    %c0_52 = arith.constant 0 : index
    %c0_53 = arith.constant 0 : index
    %118 = vector.load %arg2[%c16, %c0_52, %c0_53] : memref<25x128x256xbf16, #tpu.memory_space<vmem>>, vector<1x128x256xbf16>
    %119 = vector.shape_cast %118 : vector<1x128x256xbf16> to vector<128x256xbf16>
    %cst_54 = arith.constant dense<0.000000e+00> : vector<64x256xf32>
    %120 = tpu.matmul %117, %119, %cst_54 {dimension_numbers = #tpu.dot_dimension_numbers<[1], [0], [0], [1], [0, 0, 1, 1], [], []>} : vector<64x128xbf16>, vector<128x256xbf16>, vector<64x256xf32> -> vector<64x256xf32>
    %121 = arith.addf %114, %120 : vector<64x256xf32>
    %122 = vector.extract_strided_slice %1 {offsets = [3, 2, 0], sizes = [8, 8, 128], strides = [1, 1, 1]} : vector<12x12x128xf32> to vector<8x8x128xf32>
    %123 = vector.shape_cast %122 : vector<8x8x128xf32> to vector<64x128xf32>
    %124 = arith.truncf %123 : vector<64x128xf32> to vector<64x128xbf16>
    %c17 = arith.constant 17 : index
    %c0_55 = arith.constant 0 : index
    %c0_56 = arith.constant 0 : index
    %125 = vector.load %arg2[%c17, %c0_55, %c0_56] : memref<25x128x256xbf16, #tpu.memory_space<vmem>>, vector<1x128x256xbf16>
    %126 = vector.shape_cast %125 : vector<1x128x256xbf16> to vector<128x256xbf16>
    %cst_57 = arith.constant dense<0.000000e+00> : vector<64x256xf32>
    %127 = tpu.matmul %124, %126, %cst_57 {dimension_numbers = #tpu.dot_dimension_numbers<[1], [0], [0], [1], [0, 0, 1, 1], [], []>} : vector<64x128xbf16>, vector<128x256xbf16>, vector<64x256xf32> -> vector<64x256xf32>
    %128 = arith.addf %121, %127 : vector<64x256xf32>
    %129 = vector.extract_strided_slice %1 {offsets = [3, 3, 0], sizes = [8, 8, 128], strides = [1, 1, 1]} : vector<12x12x128xf32> to vector<8x8x128xf32>
    %130 = vector.shape_cast %129 : vector<8x8x128xf32> to vector<64x128xf32>
    %131 = arith.truncf %130 : vector<64x128xf32> to vector<64x128xbf16>
    %c18 = arith.constant 18 : index
    %c0_58 = arith.constant 0 : index
    %c0_59 = arith.constant 0 : index
    %132 = vector.load %arg2[%c18, %c0_58, %c0_59] : memref<25x128x256xbf16, #tpu.memory_space<vmem>>, vector<1x128x256xbf16>
    %133 = vector.shape_cast %132 : vector<1x128x256xbf16> to vector<128x256xbf16>
    %cst_60 = arith.constant dense<0.000000e+00> : vector<64x256xf32>
    %134 = tpu.matmul %131, %133, %cst_60 {dimension_numbers = #tpu.dot_dimension_numbers<[1], [0], [0], [1], [0, 0, 1, 1], [], []>} : vector<64x128xbf16>, vector<128x256xbf16>, vector<64x256xf32> -> vector<64x256xf32>
    %135 = arith.addf %128, %134 : vector<64x256xf32>
    %136 = vector.extract_strided_slice %1 {offsets = [3, 4, 0], sizes = [8, 8, 128], strides = [1, 1, 1]} : vector<12x12x128xf32> to vector<8x8x128xf32>
    %137 = vector.shape_cast %136 : vector<8x8x128xf32> to vector<64x128xf32>
    %138 = arith.truncf %137 : vector<64x128xf32> to vector<64x128xbf16>
    %c19 = arith.constant 19 : index
    %c0_61 = arith.constant 0 : index
    %c0_62 = arith.constant 0 : index
    %139 = vector.load %arg2[%c19, %c0_61, %c0_62] : memref<25x128x256xbf16, #tpu.memory_space<vmem>>, vector<1x128x256xbf16>
    %140 = vector.shape_cast %139 : vector<1x128x256xbf16> to vector<128x256xbf16>
    %cst_63 = arith.constant dense<0.000000e+00> : vector<64x256xf32>
    %141 = tpu.matmul %138, %140, %cst_63 {dimension_numbers = #tpu.dot_dimension_numbers<[1], [0], [0], [1], [0, 0, 1, 1], [], []>} : vector<64x128xbf16>, vector<128x256xbf16>, vector<64x256xf32> -> vector<64x256xf32>
    %142 = arith.addf %135, %141 : vector<64x256xf32>
    %143 = vector.extract_strided_slice %1 {offsets = [4, 0, 0], sizes = [8, 8, 128], strides = [1, 1, 1]} : vector<12x12x128xf32> to vector<8x8x128xf32>
    %144 = vector.shape_cast %143 : vector<8x8x128xf32> to vector<64x128xf32>
    %145 = arith.truncf %144 : vector<64x128xf32> to vector<64x128xbf16>
    %c20 = arith.constant 20 : index
    %c0_64 = arith.constant 0 : index
    %c0_65 = arith.constant 0 : index
    %146 = vector.load %arg2[%c20, %c0_64, %c0_65] : memref<25x128x256xbf16, #tpu.memory_space<vmem>>, vector<1x128x256xbf16>
    %147 = vector.shape_cast %146 : vector<1x128x256xbf16> to vector<128x256xbf16>
    %cst_66 = arith.constant dense<0.000000e+00> : vector<64x256xf32>
    %148 = tpu.matmul %145, %147, %cst_66 {dimension_numbers = #tpu.dot_dimension_numbers<[1], [0], [0], [1], [0, 0, 1, 1], [], []>} : vector<64x128xbf16>, vector<128x256xbf16>, vector<64x256xf32> -> vector<64x256xf32>
    %149 = arith.addf %142, %148 : vector<64x256xf32>
    %150 = vector.extract_strided_slice %1 {offsets = [4, 1, 0], sizes = [8, 8, 128], strides = [1, 1, 1]} : vector<12x12x128xf32> to vector<8x8x128xf32>
    %151 = vector.shape_cast %150 : vector<8x8x128xf32> to vector<64x128xf32>
    %152 = arith.truncf %151 : vector<64x128xf32> to vector<64x128xbf16>
    %c21 = arith.constant 21 : index
    %c0_67 = arith.constant 0 : index
    %c0_68 = arith.constant 0 : index
    %153 = vector.load %arg2[%c21, %c0_67, %c0_68] : memref<25x128x256xbf16, #tpu.memory_space<vmem>>, vector<1x128x256xbf16>
    %154 = vector.shape_cast %153 : vector<1x128x256xbf16> to vector<128x256xbf16>
    %cst_69 = arith.constant dense<0.000000e+00> : vector<64x256xf32>
    %155 = tpu.matmul %152, %154, %cst_69 {dimension_numbers = #tpu.dot_dimension_numbers<[1], [0], [0], [1], [0, 0, 1, 1], [], []>} : vector<64x128xbf16>, vector<128x256xbf16>, vector<64x256xf32> -> vector<64x256xf32>
    %156 = arith.addf %149, %155 : vector<64x256xf32>
    %157 = vector.extract_strided_slice %1 {offsets = [4, 2, 0], sizes = [8, 8, 128], strides = [1, 1, 1]} : vector<12x12x128xf32> to vector<8x8x128xf32>
    %158 = vector.shape_cast %157 : vector<8x8x128xf32> to vector<64x128xf32>
    %159 = arith.truncf %158 : vector<64x128xf32> to vector<64x128xbf16>
    %c22 = arith.constant 22 : index
    %c0_70 = arith.constant 0 : index
    %c0_71 = arith.constant 0 : index
    %160 = vector.load %arg2[%c22, %c0_70, %c0_71] : memref<25x128x256xbf16, #tpu.memory_space<vmem>>, vector<1x128x256xbf16>
    %161 = vector.shape_cast %160 : vector<1x128x256xbf16> to vector<128x256xbf16>
    %cst_72 = arith.constant dense<0.000000e+00> : vector<64x256xf32>
    %162 = tpu.matmul %159, %161, %cst_72 {dimension_numbers = #tpu.dot_dimension_numbers<[1], [0], [0], [1], [0, 0, 1, 1], [], []>} : vector<64x128xbf16>, vector<128x256xbf16>, vector<64x256xf32> -> vector<64x256xf32>
    %163 = arith.addf %156, %162 : vector<64x256xf32>
    %164 = vector.extract_strided_slice %1 {offsets = [4, 3, 0], sizes = [8, 8, 128], strides = [1, 1, 1]} : vector<12x12x128xf32> to vector<8x8x128xf32>
    %165 = vector.shape_cast %164 : vector<8x8x128xf32> to vector<64x128xf32>
    %166 = arith.truncf %165 : vector<64x128xf32> to vector<64x128xbf16>
    %c23 = arith.constant 23 : index
    %c0_73 = arith.constant 0 : index
    %c0_74 = arith.constant 0 : index
    %167 = vector.load %arg2[%c23, %c0_73, %c0_74] : memref<25x128x256xbf16, #tpu.memory_space<vmem>>, vector<1x128x256xbf16>
    %168 = vector.shape_cast %167 : vector<1x128x256xbf16> to vector<128x256xbf16>
    %cst_75 = arith.constant dense<0.000000e+00> : vector<64x256xf32>
    %169 = tpu.matmul %166, %168, %cst_75 {dimension_numbers = #tpu.dot_dimension_numbers<[1], [0], [0], [1], [0, 0, 1, 1], [], []>} : vector<64x128xbf16>, vector<128x256xbf16>, vector<64x256xf32> -> vector<64x256xf32>
    %170 = arith.addf %163, %169 : vector<64x256xf32>
    %171 = vector.extract_strided_slice %1 {offsets = [4, 4, 0], sizes = [8, 8, 128], strides = [1, 1, 1]} : vector<12x12x128xf32> to vector<8x8x128xf32>
    %172 = vector.shape_cast %171 : vector<8x8x128xf32> to vector<64x128xf32>
    %173 = arith.truncf %172 : vector<64x128xf32> to vector<64x128xbf16>
    %c24 = arith.constant 24 : index
    %c0_76 = arith.constant 0 : index
    %c0_77 = arith.constant 0 : index
    %174 = vector.load %arg2[%c24, %c0_76, %c0_77] : memref<25x128x256xbf16, #tpu.memory_space<vmem>>, vector<1x128x256xbf16>
    %175 = vector.shape_cast %174 : vector<1x128x256xbf16> to vector<128x256xbf16>
    %cst_78 = arith.constant dense<0.000000e+00> : vector<64x256xf32>
    %176 = tpu.matmul %173, %175, %cst_78 {dimension_numbers = #tpu.dot_dimension_numbers<[1], [0], [0], [1], [0, 0, 1, 1], [], []>} : vector<64x128xbf16>, vector<128x256xbf16>, vector<64x256xf32> -> vector<64x256xf32>
    %177 = arith.addf %170, %176 : vector<64x256xf32>
    %c0_79 = arith.constant 0 : index
    %c0_80 = arith.constant 0 : index
    %178 = vector.load %arg3[%c0_79, %c0_80] : memref<1x256xf32, #tpu.memory_space<vmem>>, vector<1x256xf32>
    %179 = vector.broadcast %178 : vector<1x256xf32> to vector<64x256xf32>
    %180 = arith.addf %177, %179 : vector<64x256xf32>
    %cst_81 = arith.constant 0.000000e+00 : f32
    %181 = vector.broadcast %cst_81 : f32 to vector<64x256xf32>
    %182 = arith.maximumf %180, %181 : vector<64x256xf32>
    %183 = vector.shape_cast %182 : vector<64x256xf32> to vector<4x2x8x256xf32>
    %184 = vector.extract_strided_slice %183 {offsets = [0, 0, 0, 0], sizes = [4, 1, 8, 256], strides = [1, 1, 1, 1]} : vector<4x2x8x256xf32> to vector<4x1x8x256xf32>
    %185 = vector.shape_cast %184 : vector<4x1x8x256xf32> to vector<4x8x256xf32>
    %186 = vector.extract_strided_slice %183 {offsets = [0, 1, 0, 0], sizes = [4, 1, 8, 256], strides = [1, 1, 1, 1]} : vector<4x2x8x256xf32> to vector<4x1x8x256xf32>
    %187 = vector.shape_cast %186 : vector<4x1x8x256xf32> to vector<4x8x256xf32>
    %188 = arith.maximumf %185, %187 : vector<4x8x256xf32>
    %189 = vector.shape_cast %188 : vector<4x8x256xf32> to vector<4x4x2x256xf32>
    %190 = vector.extract_strided_slice %189 {offsets = [0, 0, 0, 0], sizes = [4, 4, 1, 256], strides = [1, 1, 1, 1]} : vector<4x4x2x256xf32> to vector<4x4x1x256xf32>
    %191 = vector.shape_cast %190 : vector<4x4x1x256xf32> to vector<4x4x256xf32>
    %192 = vector.extract_strided_slice %189 {offsets = [0, 0, 1, 0], sizes = [4, 4, 1, 256], strides = [1, 1, 1, 1]} : vector<4x4x2x256xf32> to vector<4x4x1x256xf32>
    %193 = vector.shape_cast %192 : vector<4x4x1x256xf32> to vector<4x4x256xf32>
    %194 = arith.maximumf %191, %193 : vector<4x4x256xf32>
    %c0_82 = arith.constant 0 : index
    %c0_83 = arith.constant 0 : index
    %c0_84 = arith.constant 0 : index
    %c0_85 = arith.constant 0 : index
    %195 = vector.load %arg4[%c0_82, %c0_83, %c0_84, %c0_85] : memref<1x4x4x256xf32, #tpu.memory_space<vmem>>, vector<1x4x4x256xf32>
    %196 = vector.shape_cast %195 : vector<1x4x4x256xf32> to vector<4x4x256xf32>
    %197 = vector.shape_cast %194 : vector<4x4x256xf32> to vector<1x4x4x256xf32>
    tpu.vector_store %arg4[%c0_82, %c0_83, %c0_84, %c0_85], %197 {strides = array<i32>} : memref<1x4x4x256xf32, #tpu.memory_space<vmem>>, vector<1x4x4x256xf32>,
    return
  }
  func.func @transform_0(%arg0: i32) -> (i32, i32, i32, i32) {
    %c0_i32 = arith.constant 0 : i32
    %c0_i32_0 = arith.constant 0 : i32
    %c0_i32_1 = arith.constant 0 : i32
    %c0_i32_2 = arith.constant 0 : i32
    return %arg0, %c0_i32, %c0_i32_0, %c0_i32_1 : i32, i32, i32, i32
  }
  func.func @transform_1(%arg0: i32) -> (i32, i32, i32) {
    %c0_i32 = arith.constant 0 : i32
    %c0_i32_0 = arith.constant 0 : i32
    %c0_i32_1 = arith.constant 0 : i32
    %c0_i32_2 = arith.constant 0 : i32
    return %c0_i32, %c0_i32_0, %c0_i32_1 : i32, i32, i32
  }
  func.func @transform_2(%arg0: i32) -> (i32, i32) {
    %c0_i32 = arith.constant 0 : i32
    %c0_i32_0 = arith.constant 0 : i32
    %c0_i32_1 = arith.constant 0 : i32
    return %c0_i32, %c0_i32_0 : i32, i32
  }
  func.func @transform_3(%arg0: i32) -> (i32, i32, i32, i32) {
    %c0_i32 = arith.constant 0 : i32
    %c0_i32_0 = arith.constant 0 : i32
    %c0_i32_1 = arith.constant 0 : i32
    %c0_i32_2 = arith.constant 0 : i32
    return %arg0, %c0_i32, %c0_i32_0, %c0_i32_1 : i32, i32, i32, i32
  }
}

module attributes {stable_mosaic.version = 11 : i64} {
  func.func @_linear_stack_kernel(%arg0: i32, %arg1: i32, %arg2: memref<8x512xf32, #tpu.memory_space<vmem>>, %arg3: memref<512x256xbf16, #tpu.memory_space<vmem>>, %arg4: memref<1x256xf32, #tpu.memory_space<vmem>>, %arg5: memref<256x128xbf16, #tpu.memory_space<vmem>>, %arg6: memref<1x128xf32, #tpu.memory_space<vmem>>, %arg7: memref<128x128xbf16, #tpu.memory_space<vmem>>, %arg8: memref<1x128xf32, #tpu.memory_space<vmem>>, %arg9: memref<8x128xf32, #tpu.memory_space<vmem>>, %arg10: memref<8x256xf32, #tpu.memory_space<vmem>>) attributes {dimension_semantics = [#tpu.dimension_semantics<parallel>, #tpu.dimension_semantics<arbitrary>], iteration_bounds = array<i64: 1, 8>, scalar_prefetch = 0 : i64, scratch_operands = 1 : i64, tpu.core_type = #tpu.core_type<tc>, window_params = [{transform_indices = @transform_0, window_bounds = array<i64: 8, 512>}, {transform_indices = @transform_1, window_bounds = array<i64: 512, 256>}, {pipeline_mode = #tpu.pipeline_mode<synchronous>, transform_indices = @transform_2, window_bounds = array<i64: 1, 256>}, {pipeline_mode = #tpu.pipeline_mode<synchronous>, transform_indices = @transform_3, window_bounds = array<i64: 256, 128>}, {pipeline_mode = #tpu.pipeline_mode<synchronous>, transform_indices = @transform_4, window_bounds = array<i64: 1, 128>}, {pipeline_mode = #tpu.pipeline_mode<synchronous>, transform_indices = @transform_5, window_bounds = array<i64: 128, 128>}, {pipeline_mode = #tpu.pipeline_mode<synchronous>, transform_indices = @transform_6, window_bounds = array<i64: 1, 128>}, {transform_indices = @transform_7, window_bounds = array<i64: 8, 128>}]} {
    %c0_i32 = arith.constant 0 : i32
    %0 = arith.cmpi eq, %arg1, %c0_i32 : i32
    %1 = arith.extui %0 : i1 to i32
    %c0_i32_0 = arith.constant 0 : i32
    %2 = arith.cmpi ne, %1, %c0_i32_0 : i32
    scf.if %2 {
      %cst_9 = arith.constant 0.000000e+00 : f32
      %13 = vector.broadcast %cst_9 : f32 to vector<8x256xf32>
      %c0_10 = arith.constant 0 : index
      %c0_11 = arith.constant 0 : index
      %14 = vector.load %arg10[%c0_10, %c0_11] : memref<8x256xf32, #tpu.memory_space<vmem>>, vector<8x256xf32>
      tpu.vector_store %arg10[%c0_10, %c0_11], %13 {strides = array<i32>} : memref<8x256xf32, #tpu.memory_space<vmem>>, vector<8x256xf32>,
    } else {
    }
    %c0 = arith.constant 0 : index
    %c0_1 = arith.constant 0 : index
    %3 = vector.load %arg10[%c0, %c0_1] : memref<8x256xf32, #tpu.memory_space<vmem>>, vector<8x256xf32>
    %c0_2 = arith.constant 0 : index
    %c0_3 = arith.constant 0 : index
    %4 = vector.load %arg2[%c0_2, %c0_3] : memref<8x512xf32, #tpu.memory_space<vmem>>, vector<8x512xf32>
    %5 = arith.truncf %4 : vector<8x512xf32> to vector<8x512xbf16>
    %c0_4 = arith.constant 0 : index
    %c0_5 = arith.constant 0 : index
    %6 = vector.load %arg3[%c0_4, %c0_5] : memref<512x256xbf16, #tpu.memory_space<vmem>>, vector<512x256xbf16>
    %cst = arith.constant dense<0.000000e+00> : vector<8x256xf32>
    %7 = tpu.matmul %5, %6, %cst {dimension_numbers = #tpu.dot_dimension_numbers<[1], [0], [0], [1], [0, 0, 1, 1], [], []>} : vector<8x512xbf16>, vector<512x256xbf16>, vector<8x256xf32> -> vector<8x256xf32>
    %8 = arith.addf %3, %7 : vector<8x256xf32>
    %c0_6 = arith.constant 0 : index
    %c0_7 = arith.constant 0 : index
    %9 = vector.load %arg10[%c0_6, %c0_7] : memref<8x256xf32, #tpu.memory_space<vmem>>, vector<8x256xf32>
    tpu.vector_store %arg10[%c0_6, %c0_7], %8 {strides = array<i32>} : memref<8x256xf32, #tpu.memory_space<vmem>>, vector<8x256xf32>,
    %c7_i32 = arith.constant 7 : i32
    %10 = arith.cmpi eq, %arg1, %c7_i32 : i32
    %11 = arith.extui %10 : i1 to i32
    %c0_i32_8 = arith.constant 0 : i32
    %12 = arith.cmpi ne, %11, %c0_i32_8 : i32
    scf.if %12 {
      %c0_9 = arith.constant 0 : index
      %c0_10 = arith.constant 0 : index
      %13 = vector.load %arg10[%c0_9, %c0_10] : memref<8x256xf32, #tpu.memory_space<vmem>>, vector<8x256xf32>
      %c0_11 = arith.constant 0 : index
      %c0_12 = arith.constant 0 : index
      %14 = vector.load %arg4[%c0_11, %c0_12] : memref<1x256xf32, #tpu.memory_space<vmem>>, vector<1x256xf32>
      %15 = vector.broadcast %14 : vector<1x256xf32> to vector<8x256xf32>
      %16 = arith.addf %13, %15 : vector<8x256xf32>
      %cst_13 = arith.constant 0.000000e+00 : f32
      %17 = vector.broadcast %cst_13 : f32 to vector<8x256xf32>
      %18 = arith.maximumf %16, %17 : vector<8x256xf32>
      %19 = arith.truncf %18 : vector<8x256xf32> to vector<8x256xbf16>
      %c0_14 = arith.constant 0 : index
      %c0_15 = arith.constant 0 : index
      %20 = vector.load %arg5[%c0_14, %c0_15] : memref<256x128xbf16, #tpu.memory_space<vmem>>, vector<256x128xbf16>
      %cst_16 = arith.constant dense<0.000000e+00> : vector<8x128xf32>
      %21 = tpu.matmul %19, %20, %cst_16 {dimension_numbers = #tpu.dot_dimension_numbers<[1], [0], [0], [1], [0, 0, 1, 1], [], []>} : vector<8x256xbf16>, vector<256x128xbf16>, vector<8x128xf32> -> vector<8x128xf32>
      %c0_17 = arith.constant 0 : index
      %c0_18 = arith.constant 0 : index
      %22 = vector.load %arg6[%c0_17, %c0_18] : memref<1x128xf32, #tpu.memory_space<vmem>>, vector<1x128xf32>
      %23 = vector.broadcast %22 : vector<1x128xf32> to vector<8x128xf32>
      %24 = arith.addf %21, %23 : vector<8x128xf32>
      %cst_19 = arith.constant 0.000000e+00 : f32
      %25 = vector.broadcast %cst_19 : f32 to vector<8x128xf32>
      %26 = arith.maximumf %24, %25 : vector<8x128xf32>
      %27 = arith.truncf %26 : vector<8x128xf32> to vector<8x128xbf16>
      %c0_20 = arith.constant 0 : index
      %c0_21 = arith.constant 0 : index
      %28 = vector.load %arg7[%c0_20, %c0_21] : memref<128x128xbf16, #tpu.memory_space<vmem>>, vector<128x128xbf16>
      %cst_22 = arith.constant dense<0.000000e+00> : vector<8x128xf32>
      %29 = tpu.matmul %27, %28, %cst_22 {dimension_numbers = #tpu.dot_dimension_numbers<[1], [0], [0], [1], [0, 0, 1, 1], [], []>} : vector<8x128xbf16>, vector<128x128xbf16>, vector<8x128xf32> -> vector<8x128xf32>
      %c0_23 = arith.constant 0 : index
      %c0_24 = arith.constant 0 : index
      %30 = vector.load %arg8[%c0_23, %c0_24] : memref<1x128xf32, #tpu.memory_space<vmem>>, vector<1x128xf32>
      %31 = vector.broadcast %30 : vector<1x128xf32> to vector<8x128xf32>
      %32 = arith.addf %29, %31 : vector<8x128xf32>
      %c0_25 = arith.constant 0 : index
      %c0_26 = arith.constant 0 : index
      %33 = vector.load %arg9[%c0_25, %c0_26] : memref<8x128xf32, #tpu.memory_space<vmem>>, vector<8x128xf32>
      tpu.vector_store %arg9[%c0_25, %c0_26], %32 {strides = array<i32>} : memref<8x128xf32, #tpu.memory_space<vmem>>, vector<8x128xf32>,
    } else {
    }
    return
  }
  func.func @transform_0(%arg0: i32, %arg1: i32) -> (i32, i32) {
    %c0_i32 = arith.constant 0 : i32
    return %arg0, %arg1 : i32, i32
  }
  func.func @transform_1(%arg0: i32, %arg1: i32) -> (i32, i32) {
    %c0_i32 = arith.constant 0 : i32
    %c0_i32_0 = arith.constant 0 : i32
    return %arg1, %c0_i32 : i32, i32
  }
  func.func @transform_2(%arg0: i32, %arg1: i32) -> (i32, i32) {
    %c0_i32 = arith.constant 0 : i32
    %c0_i32_0 = arith.constant 0 : i32
    %c0_i32_1 = arith.constant 0 : i32
    return %c0_i32, %c0_i32_0 : i32, i32
  }
  func.func @transform_3(%arg0: i32, %arg1: i32) -> (i32, i32) {
    %c0_i32 = arith.constant 0 : i32
    %c0_i32_0 = arith.constant 0 : i32
    %c0_i32_1 = arith.constant 0 : i32
    return %c0_i32, %c0_i32_0 : i32, i32
  }
  func.func @transform_4(%arg0: i32, %arg1: i32) -> (i32, i32) {
    %c0_i32 = arith.constant 0 : i32
    %c0_i32_0 = arith.constant 0 : i32
    %c0_i32_1 = arith.constant 0 : i32
    return %c0_i32, %c0_i32_0 : i32, i32
  }
  func.func @transform_5(%arg0: i32, %arg1: i32) -> (i32, i32) {
    %c0_i32 = arith.constant 0 : i32
    %c0_i32_0 = arith.constant 0 : i32
    %c0_i32_1 = arith.constant 0 : i32
    return %c0_i32, %c0_i32_0 : i32, i32
  }
  func.func @transform_6(%arg0: i32, %arg1: i32) -> (i32, i32) {
    %c0_i32 = arith.constant 0 : i32
    %c0_i32_0 = arith.constant 0 : i32
    %c0_i32_1 = arith.constant 0 : i32
    return %c0_i32, %c0_i32_0 : i32, i32
  }
  func.func @transform_7(%arg0: i32, %arg1: i32) -> (i32, i32) {
    %c0_i32 = arith.constant 0 : i32
    %c0_i32_0 = arith.constant 0 : i32
    return %arg0, %c0_i32 : i32, i32
  }
}

</mosaic_0001>

<bundles_post_ra>
// kernel: mnist_forward.5
= control target key start
LH: loop header
LB: loop body
LE: loop exit
PB: predicated region body
PF: predicated region fallthrough
CT: control target
= control target key end

     0   :  { %s1577_s24 = smov 0   ;;  %s1579_s25 = smov 0   ;;  %s1781_s0 = inlined_call_operand.vmem [shape: f32[8,4096], index: 0, kind: input, shape index: {}]   ;;  %s1782_s1 = inlined_call_operand.vmem [shape: bf16[4096,256], index: 1, kind: input, shape index: {}]   ;;  %s1783_s2 = inlined_call_operand.vmem [shape: f32[1,256], index: 2, kind: input, shape index: {}]   ;;  %s1784_s3 = inlined_call_operand.vmem [shape: bf16[256,128], index: 3, kind: input, shape index: {}]   ;;  %s1785_s4 = inlined_call_operand.vmem [shape: f32[1,128], index: 4, kind: input, shape index: {}]   ;;  %s1786_s5 = inlined_call_operand.vmem [shape: bf16[128,128], index: 5, kind: input, shape index: {}]   ;;  %s1787_s6 = inlined_call_operand.vmem [shape: f32[1,128], index: 6, kind: input, shape index: {}]   ;;  %s1788_s7 = inlined_call_operand.vmem [shape: f32[8,128], index: 7, kind: output, shape index: {}]  }
   0x1   :  { %s1581_s26 = smov 0  }
   0x2 LB: > { %s26_s27 = sadd.s32 1, %s1528_s25  ;;  %p1210_p0 = scmp.ge.s32.totalorder %s1532_s26, 1  ;;  %s1532_s26 = sphi %s1581_s26, %s17_s26   ;;  %s1528_s25 = sphi %s1579_s25, %s1790_s25   ;;  %s1524_s24 = sphi %s1577_s24, %s1789_s24  }
   0x3   : > { %p27_p1 = scmp.ge.s32.totalorder %s26_s27, 8  ;;  %p268_p2 = scmp.lt.s32.totalorder %s1532_s26, 9 }
   0x5   : > { %s1792_s27 = smov (%p27_p1, %s26_s27), 0  ;;  %p269_p3 = pnand %p1210_p0, %p268_p2 }
   0x6   : > { %s1211_s28 = sshll.u32 (!%p269_p3), %s1524_s24, 2  ;;  %s1213_s29 = sshll.u32 (!%p269_p3), %s1524_s24, 6 }
   0x7   : > { %272 = sbr.rel (%p269_p3) target bundleno = 758 (0x2f6), region = 48  ;;  %p312_p4 = scmp.lt.s32.totalorder (!%p269_p3), %s1211_s28, 31 }
   0x8   : > { %p320_p5 = scmp.lt.s32.totalorder (!%p269_p3), %s1213_s29, 511  ;;  %p1216_p6 = scmp.ne.s32.totalorder (!%p269_p3), %s1524_s24, 0 }
   0xe   : > { %s1794_s28 = smov (!%p312_p4, %s1211_s28), 31  ;;  %s1796_s29 = smov (!%p320_p5, %s1213_s29), 511 }
   0xf   : > { %s1212_s30 = sshll.u32 %s1794_s28, 3  ;;  %s1311_s11 = sshll.u32 %s1796_s29, 3  ;;  %v1534_v0 = vmov (!%p1216_p6), 0.0  }
  0x10   : > { %s1602_s10 = scalar_lea.vmem %s1781_s0, %s1212_s30  ;;  %s1607_s14 = scalar_lea.vmem %s1782_s1, %s1311_s11  ;;  %335 = vst [vmem:[#allocation2] sm:$0xff] (!%p1216_p6), %v1534_v0  ;;  %336 = vst [vmem:[#allocation2 + $0x8] sm:$0xff] (!%p1216_p6), %v1534_v0 }
  0x11   : > { %334 = sbr.rel (%p1216_p6) target bundleno = 24 (0x18), region = 52 }
  0x18 PF: > { %v1390_v1 = vld [vmem:[%s1607_s14 + $0x4] ss:$8 sps:$4 sm:$0xff]   ;;  %v1394_v3 = vld [vmem:[%s1607_s14] ss:$8 sps:$4 sm:$0xff]   ;;  %v1396_v5 = vld [vmem:[%s1607_s14 + $0x14] ss:$8 sps:$4 sm:$0xff]  }
  0x19   : > { %v1392_v2 = vld [vmem:[%s1607_s14 + $0x104] ss:$8 sps:$4 sm:$0xff]   ;;  %731 = vmatprep.subr.bf16.mxu0 %v1390_v1  ;;  %v1395_v4 = vld [vmem:[%s1607_s14 + $0x100] ss:$8 sps:$4 sm:$0xff]   ;;  %v1398_v6 = vld [vmem:[%s1607_s14 + $0x114] ss:$8 sps:$4 sm:$0xff]  }
  0x1a   : > { %772 = vmatprep.subr.bf16.mxu1 %v1392_v2  ;;  %732 = vmatpush1.bf16.msra.mxu0 %v1394_v3  ;;  %v1400_v7 = vld [vmem:[%s1607_s14 + $0x10] ss:$8 sps:$4 sm:$0xff]   ;;  %v1402_v9 = vld [vmem:[%s1607_s14 + $0x24] ss:$8 sps:$4 sm:$0xff]   ;;  %v1406_v11 = vld [vmem:[%s1607_s14 + $0x20] ss:$8 sps:$4 sm:$0xff]  }
  0x1b   : > { %773 = vmatpush1.bf16.msra.mxu1 %v1395_v4  ;;  %733 = vmatprep.subr.bf16.mxu0 %v1396_v5  ;;  %v1401_v8 = vld [vmem:[%s1607_s14 + $0x110] ss:$8 sps:$4 sm:$0xff]   ;;  %v1404_v10 = vld [vmem:[%s1607_s14 + $0x124] ss:$8 sps:$4 sm:$0xff]   ;;  %v1407_v12 = vld [vmem:[%s1607_s14 + $0x120] ss:$8 sps:$4 sm:$0xff]  }
  0x1c   : > { %774 = vmatprep.subr.bf16.mxu1 %v1398_v6  ;;  %v1408_v13 = vld [vmem:[%s1607_s14 + $0x34] ss:$8 sps:$4 sm:$0xff]   ;;  %v1412_v15 = vld [vmem:[%s1607_s14 + $0x30] ss:$8 sps:$4 sm:$0xff]   ;;  %v1414_v17 = vld [vmem:[%s1607_s14 + $0x44] ss:$8 sps:$4 sm:$0xff]  }
  0x1d   : > { %v1410_v14 = vld [vmem:[%s1607_s14 + $0x134] ss:$8 sps:$4 sm:$0xff]   ;;  %v1413_v16 = vld [vmem:[%s1607_s14 + $0x130] ss:$8 sps:$4 sm:$0xff]   ;;  %v1416_v18 = vld [vmem:[%s1607_s14 + $0x144] ss:$8 sps:$4 sm:$0xff]  }
  0x1e   : > { %734 = vmatpush1.bf16.msra.mxu0 %v1400_v7  ;;  %v1418_v19 = vld [vmem:[%s1607_s14 + $0x40] ss:$8 sps:$4 sm:$0xff]   ;;  %v1420_v21 = vld [vmem:[%s1607_s14 + $0x54] ss:$8 sps:$4 sm:$0xff]   ;;  %v1424_v23 = vld [vmem:[%s1607_s14 + $0x50] ss:$8 sps:$4 sm:$0xff]  }
  0x1f   : > { %775 = vmatpush1.bf16.msra.mxu1 %v1401_v8  ;;  %735 = vmatprep.subr.bf16.mxu0 %v1402_v9  ;;  %v1419_v20 = vld [vmem:[%s1607_s14 + $0x140] ss:$8 sps:$4 sm:$0xff]   ;;  %v1422_v22 = vld [vmem:[%s1607_s14 + $0x154] ss:$8 sps:$4 sm:$0xff]   ;;  %v1425_v24 = vld [vmem:[%s1607_s14 + $0x150] ss:$8 sps:$4 sm:$0xff]  }
  0x20   : > { %776 = vmatprep.subr.bf16.mxu1 %v1404_v10  ;;  %v1426_v25 = vld [vmem:[%s1607_s14 + $0x64] ss:$8 sps:$4 sm:$0xff]   ;;  %v1430_v27 = vld [vmem:[%s1607_s14 + $0x60] ss:$8 sps:$4 sm:$0xff]   ;;  %v1432_v29 = vld [vmem:[%s1607_s14 + $0x74] ss:$8 sps:$4 sm:$0xff]  }
  0x21   : > { %v1428_v26 = vld [vmem:[%s1607_s14 + $0x164] ss:$8 sps:$4 sm:$0xff]   ;;  %v1431_v28 = vld [vmem:[%s1607_s14 + $0x160] ss:$8 sps:$4 sm:$0xff]   ;;  %v1434_v30 = vld [vmem:[%s1607_s14 + $0x174] ss:$8 sps:$4 sm:$0xff]  }
  0x22   : > { %736 = vmatpush1.bf16.msra.mxu0 %v1406_v11  ;;  %v1436_v31 = vld [vmem:[%s1607_s14 + $0x70] ss:$8 sps:$4 sm:$0xff]   ;;  %v1438_v33 = vld [vmem:[%s1607_s14 + $0x84] ss:$8 sps:$4 sm:$0xff]   ;;  %v1442_v35 = vld [vmem:[%s1607_s14 + $0x80] ss:$8 sps:$4 sm:$0xff]  }
  0x23   : > { %777 = vmatpush1.bf16.msra.mxu1 %v1407_v12  ;;  %737 = vmatprep.subr.bf16.mxu0 %v1408_v13  ;;  %v1437_v32 = vld [vmem:[%s1607_s14 + $0x170] ss:$8 sps:$4 sm:$0xff]   ;;  %v1440_v34 = vld [vmem:[%s1607_s14 + $0x184] ss:$8 sps:$4 sm:$0xff]   ;;  %v1443_v36 = vld [vmem:[%s1607_s14 + $0x180] ss:$8 sps:$4 sm:$0xff]  }
  0x24   : > { %778 = vmatprep.subr.bf16.mxu1 %v1410_v14  ;;  %v1444_v37 = vld [vmem:[%s1607_s14 + $0x94] ss:$8 sps:$4 sm:$0xff]   ;;  %v1448_v39 = vld [vmem:[%s1607_s14 + $0x90] ss:$8 sps:$4 sm:$0xff]   ;;  %v1450_v41 = vld [vmem:[%s1607_s14 + $0xa4] ss:$8 sps:$4 sm:$0xff]  }
  0x25   : > { %v1446_v38 = vld [vmem:[%s1607_s14 + $0x194] ss:$8 sps:$4 sm:$0xff]   ;;  %v1449_v40 = vld [vmem:[%s1607_s14 + $0x190] ss:$8 sps:$4 sm:$0xff]   ;;  %v1452_v42 = vld [vmem:[%s1607_s14 + $0x1a4] ss:$8 sps:$4 sm:$0xff]  }
  0x26   : > { %738 = vmatpush1.bf16.msra.mxu0 %v1412_v15  ;;  %v1454_v43 = vld [vmem:[%s1607_s14 + $0xa0] ss:$8 sps:$4 sm:$0xff]   ;;  %v1456_v45 = vld [vmem:[%s1607_s14 + $0xb4] ss:$8 sps:$4 sm:$0xff]   ;;  %v1460_v50 = vld [vmem:[%s1607_s14 + $0xb0] ss:$8 sps:$4 sm:$0xff]  }
  0x27   : > { %779 = vmatpush1.bf16.msra.mxu1 %v1413_v16  ;;  %739 = vmatprep.subr.bf16.mxu0 %v1414_v17  ;;  %v1455_v44 = vld [vmem:[%s1607_s14 + $0x1a0] ss:$8 sps:$4 sm:$0xff]   ;;  %v1458_v46 = vld [vmem:[%s1607_s14 + $0x1b4] ss:$8 sps:$4 sm:$0xff]   ;;  %v1461_v51 = vld [vmem:[%s1607_s14 + $0x1b0] ss:$8 sps:$4 sm:$0xff]  }
  0x28   : > { %780 = vmatprep.subr.bf16.mxu1 %v1416_v18  ;;  %v340_v47 = vld [vmem:[%s1602_s10 + $0x8] sm:$0xff]  ;;  %v342_v49 = vld [vmem:[%s1602_s10 + $0x18] sm:$0xff]  ;;  %v339_v5 = vld [vmem:[%s1602_s10] sm:$0xff]  ;;  %p1281_p7 = scmp.ne.s32.totalorder %s1524_s24, 7 }
  0x29   : > { %v344_v48 = vpack.c.bf16 %v340_v47, %v340_v47  ;;  %v346_v52 = vpack.c.bf16 %v342_v49, %v342_v49  ;;  %v1462_v53 = vld [vmem:[%s1607_s14 + $0xc4] ss:$8 sps:$4 sm:$0xff]   ;;  %v1466_v55 = vld [vmem:[%s1607_s14 + $0xc0] ss:$8 sps:$4 sm:$0xff]   ;;  %v1468_v57 = vld [vmem:[%s1607_s14 + $0xd4] ss:$8 sps:$4 sm:$0xff]   ;;  %v343_v7 = vpack.c.bf16 %v339_v5, %v339_v5 }
  0x2a   : > { %740 = vmatpush1.bf16.msra.mxu0 %v1418_v19  ;;  %v1464_v54 = vld [vmem:[%s1607_s14 + $0x1c4] ss:$8 sps:$4 sm:$0xff]   ;;  %v1467_v56 = vld [vmem:[%s1607_s14 + $0x1c0] ss:$8 sps:$4 sm:$0xff]   ;;  %v1470_v58 = vld [vmem:[%s1607_s14 + $0x1d4] ss:$8 sps:$4 sm:$0xff]  }
  0x2b   : > { %781 = vmatpush1.bf16.msra.mxu1 %v1419_v20  ;;  %741 = vmatprep.subr.bf16.mxu0 %v1420_v21  ;;  %v1472_v59 = vld [vmem:[%s1607_s14 + $0xd0] ss:$8 sps:$4 sm:$0xff]   ;;  %v1474_v61 = vld [vmem:[%s1607_s14 + $0xe4] ss:$8 sps:$4 sm:$0xff]   ;;  %v1478_v63 = vld [vmem:[%s1607_s14 + $0xe0] ss:$8 sps:$4 sm:$0xff]  }
  0x2c   : > { %782 = vmatprep.subr.bf16.mxu1 %v1422_v22  ;;  %763 = vmatprep.mubr.bf16.mxu0 %v344_v48  ;;  %v1473_v60 = vld [vmem:[%s1607_s14 + $0x1d0] ss:$8 sps:$4 sm:$0xff]   ;;  %v1476_v62 = vld [vmem:[%s1607_s14 + $0x1e4] ss:$8 sps:$4 sm:$0xff]   ;;  %v1479_v0 = vld [vmem:[%s1607_s14 + $0x1e0] ss:$8 sps:$4 sm:$0xff]  }
  0x2d   : > { %804 = vmatprep.mubr.bf16.mxu1 %v346_v52  ;;  %v1480_v1 = vld [vmem:[%s1607_s14 + $0xf4] ss:$8 sps:$4 sm:$0xff]   ;;  %v1484_v3 = vld [vmem:[%s1607_s14 + $0xf0] ss:$8 sps:$4 sm:$0xff]   ;;  %v337_v10 = vld [vmem:[#allocation2] sm:$0xff]  ;;  %vm1536_vm0 = vmmov (!%p1281_p7), 0  }
  0x2e   : > { %742 = vmatpush1.bf16.msra.mxu0 %v1424_v23  ;;  %v1482_v2 = vld [vmem:[%s1607_s14 + $0x1f4] ss:$8 sps:$4 sm:$0xff]   ;;  %v1485_v4 = vld [vmem:[%s1607_s14 + $0x1f0] ss:$8 sps:$4 sm:$0xff]   ;;  %v338_v14 = vld [vmem:[#allocation2 + $0x8] sm:$0xff] }
  0x2f   : > { %783 = vmatpush1.bf16.msra.mxu1 %v1425_v24  ;;  %743 = vmatprep.subr.bf16.mxu0 %v1426_v25  ;;  %v341_v6 = vld [vmem:[%s1602_s10 + $0x10] sm:$0xff]  ;;  %v1486_v23 = vld [vmem:[%s1784_s3 + $0x40] sm:$0xff] (!%p1281_p7)   ;;  %v1535_v25 = vmov (!%p1281_p7), 0.0   ;;  %v1503_v47 = vld [vmem:[%s1786_s5 + $0x8] sm:$0xff] (!%p1281_p7)  }
  0x30   : > { %784 = vmatprep.subr.bf16.mxu1 %v1428_v26  ;;  %v345_v8 = vpack.c.bf16 %v341_v6, %v341_v6  ;;  %v1487_v24 = vld [vmem:[%s1784_s3] sm:$0xff] (!%p1281_p7)   ;;  %v1488_v26 = vld [vmem:[%s1784_s3 + $0x48] sm:$0xff] (!%p1281_p7)   ;;  %v1498_v48 = vld [vmem:[%s1784_s3 + $0x70] sm:$0xff] (!%p1281_p7)  }
  0x32   : > { %744 = vmatpush1.bf16.msra.mxu0 %v1430_v27  ;;  %v1489_v27 = vld [vmem:[%s1784_s3 + $0x8] sm:$0xff] (!%p1281_p7)  }
  0x33   : > { %785 = vmatpush1.bf16.msra.mxu1 %v1431_v28  ;;  %745 = vmatprep.subr.bf16.mxu0 %v1432_v29  ;;  %v1490_v28 = vld [vmem:[%s1784_s3 + $0x50] sm:$0xff] (!%p1281_p7)   ;;  %v825_v29 = vlaneseq (!%p1281_p7) }
  0x34   : > { %786 = vmatprep.subr.bf16.mxu1 %v1434_v30  ;;  %v1491_v30 = vld [vmem:[%s1784_s3 + $0x10] sm:$0xff] (!%p1281_p7)  }
  0x36   : > { %746 = vmatpush1.bf16.msra.mxu0 %v1436_v31  ;;  %v1492_v31 = vld [vmem:[%s1784_s3 + $0x58] sm:$0xff] (!%p1281_p7)  }
  0x37   : > { %787 = vmatpush1.bf16.msra.mxu1 %v1437_v32  ;;  %747 = vmatprep.subr.bf16.mxu0 %v1438_v33  ;;  %v826_v32 = vshrl.u32 (!%p1281_p7), %v825_v29, 7  ;;  %v1493_v33 = vld [vmem:[%s1784_s3 + $0x18] sm:$0xff] (!%p1281_p7)  }
  0x38   : > { %788 = vmatprep.subr.bf16.mxu1 %v1440_v34  ;;  %v1494_v34 = vld [vmem:[%s1784_s3 + $0x60] sm:$0xff] (!%p1281_p7)  }
  0x3a   : > { %748 = vmatpush1.bf16.msra.mxu0 %v1442_v35  ;;  %v831_v35 = vsub.s32 (!%p1281_p7), 1, %v826_v32 }
  0x3b   : > { %789 = vmatpush1.bf16.msra.mxu1 %v1443_v36  ;;  %749 = vmatprep.subr.bf16.mxu0 %v1444_v37  ;;  %v827_v36 = vsub.s32 (!%p1281_p7), 0, %v826_v32  ;;  %v1495_v37 = vld [vmem:[%s1784_s3 + $0x20] sm:$0xff] (!%p1281_p7)  }
  0x3c   : > { %790 = vmatprep.subr.bf16.mxu1 %v1446_v38  ;;  %v1496_v38 = vld [vmem:[%s1784_s3 + $0x68] sm:$0xff] (!%p1281_p7)  }
  0x3e   : > { %750 = vmatpush1.bf16.msra.mxu0 %v1448_v39 }
  0x3f   : > { %791 = vmatpush1.bf16.msra.mxu1 %v1449_v40  ;;  %751 = vmatprep.subr.bf16.mxu0 %v1450_v41  ;;  %v823_v40 = vld [vmem:[%s1783_s2] sm:$0x3] (!%p1281_p7)  ;;  %v1497_v41 = vld [vmem:[%s1784_s3 + $0x28] sm:$0xff] (!%p1281_p7)  }
  0x40   : > { %792 = vmatprep.subr.bf16.mxu1 %v1452_v42  ;;  %v832_v42 = vrot.slane (!%p1281_p7), %v823_v40, %v831_v35 }
  0x42   : > { %752 = vmatpush1.bf16.msra.mxu0 %v1454_v43  ;;  %v1502_v43 = vld [vmem:[%s1786_s5] sm:$0xff] (!%p1281_p7)  }
  0x43   : > { %793 = vmatpush1.bf16.msra.mxu1 %v1455_v44  ;;  %753 = vmatprep.subr.bf16.mxu0 %v1456_v45  ;;  %v828_v44 = vrot.slane (!%p1281_p7), %v823_v40, %v827_v36 }
  0x44   : > { %794 = vmatprep.subr.bf16.mxu1 %v1458_v46 }
  0x46   : > { %754 = vmatpush1.bf16.msra.mxu0 %v1460_v50  ;;  %v1499_v50 = vld [vmem:[%s1784_s3 + $0x30] sm:$0xff] (!%p1281_p7)  }
  0x47   : > { %795 = vmatpush1.bf16.msra.mxu1 %v1461_v51  ;;  %755 = vmatprep.subr.bf16.mxu0 %v1462_v53  ;;  %v1504_v53 = vld [vmem:[%s1786_s5 + $0x10] sm:$0xff] (!%p1281_p7)  }
  0x48   : > { %796 = vmatprep.subr.bf16.mxu1 %v1464_v54  ;;  %v1500_v54 = vld [vmem:[%s1784_s3 + $0x78] sm:$0xff] (!%p1281_p7)  }
  0x4a   : > { %756 = vmatpush1.bf16.msra.mxu0 %v1466_v55 }
  0x4b   : > { %797 = vmatpush1.bf16.msra.mxu1 %v1467_v56  ;;  %757 = vmatprep.subr.bf16.mxu0 %v1468_v57  ;;  %v1501_v56 = vld [vmem:[%s1784_s3 + $0x38] sm:$0xff] (!%p1281_p7)  }
  0x4c   : > { %798 = vmatprep.subr.bf16.mxu1 %v1470_v58  ;;  %v1505_v57 = vld [vmem:[%s1786_s5 + $0x18] sm:$0xff] (!%p1281_p7)  }
  0x4e   : > { %758 = vmatpush1.bf16.msra.mxu0 %v1472_v59  ;;  %v1506_v59 = vld [vmem:[%s1786_s5 + $0x20] sm:$0xff] (!%p1281_p7)  }
  0x4f   : > { %799 = vmatpush1.bf16.msra.mxu1 %v1473_v60  ;;  %759 = vmatprep.subr.bf16.mxu0 %v1474_v61  ;;  %v1507_v60 = vld [vmem:[%s1786_s5 + $0x28] sm:$0xff] (!%p1281_p7)   ;;  %v1508_v61 = vld [vmem:[%s1786_s5 + $0x30] sm:$0xff] (!%p1281_p7)  }
  0x50   : > { %800 = vmatprep.subr.bf16.mxu1 %v1476_v62  ;;  %v1509_v62 = vld [vmem:[%s1786_s5 + $0x38] sm:$0xff] (!%p1281_p7)  }
  0x52   : > { %760 = vmatpush1.bf16.msra.mxu0 %v1478_v63 }
  0x53   : > { %801 = vmatpush1.bf16.msra.mxu1 %v1479_v0  ;;  %761 = vmatprep.subr.bf16.mxu0 %v1480_v1  ;;  %v1282_v0 = vld [vmem:[%s1785_s4] ss:$0 sm:$0xff] (!%p1281_p7) }
  0x54   : > { %802 = vmatprep.subr.bf16.mxu1 %v1482_v2 }
  0x56   : > { %762 = vmatpush1.bf16.msra.mxu0 %v1484_v3 }
  0x57   : > { %803 = vmatpush1.bf16.msra.mxu1 %v1485_v4  ;;  %1312 = vmatprep.subr.bf16.mxu0 (!%p1281_p7), %v1486_v23 }
  0x58   : > { %1343 = vmatprep.subr.bf16.mxu1 (!%p1281_p7), %v1535_v25 }
  0x59   : > { %764 = vmatmul.mubr.bf16.vlgmr.msra.gmra.mrb[0].mxu0 %v343_v7 }
  0x5a   : > { %805 = vmatmul.mubr.bf16.vlgmr.msra.gmra.mrb[0].mxu1 %v345_v8  ;;  %1313 = vmatpush3.bf16.msra.mxu0 (!%p1281_p7), %v1487_v24  ;;  %v1299_v8 = vld [vmem:[%s1787_s6] ss:$0 sm:$0xff] (!%p1281_p7) }
  0x5b   : > { %1314 = vmatprep.subr.bf16.mxu0 (!%p1281_p7), %v1488_v26  ;;  %1344 = vmatpush3.bf16.msra.mxu1 (!%p1281_p7), %v1502_v43 }
  0x5c   : > { %1345 = vmatprep.subr.bf16.mxu1 (!%p1281_p7), %v1535_v25  ;;  %1359 = vmatprep.mubr.msk.bf16.mxu1 (!%p1281_p7), %vm1536_vm0, %v1535_v25 }
  0x5e   : > { %1315 = vmatpush3.bf16.msra.mxu0 (!%p1281_p7), %v1489_v27 }
  0x5f   : > { %1316 = vmatprep.subr.bf16.mxu0 (!%p1281_p7), %v1490_v28  ;;  %1346 = vmatpush3.bf16.msra.mxu1 (!%p1281_p7), %v1503_v47 }
  0x60   : > { %1347 = vmatprep.subr.bf16.mxu1 (!%p1281_p7), %v1535_v25 }
  0x62   : > { %1317 = vmatpush3.bf16.msra.mxu0 (!%p1281_p7), %v1491_v30 }
  0x63   : > { %1318 = vmatprep.subr.bf16.mxu0 (!%p1281_p7), %v1492_v31  ;;  %1348 = vmatpush3.bf16.msra.mxu1 (!%p1281_p7), %v1504_v53 }
  0x64   : > { %1349 = vmatprep.subr.bf16.mxu1 (!%p1281_p7), %v1535_v25 }
  0x66   : > { %1319 = vmatpush3.bf16.msra.mxu0 (!%p1281_p7), %v1493_v33 }
  0x67   : > { %1320 = vmatprep.subr.bf16.mxu0 (!%p1281_p7), %v1494_v34  ;;  %1350 = vmatpush3.bf16.msra.mxu1 (!%p1281_p7), %v1505_v57 }
  0x68   : > { %1351 = vmatprep.subr.bf16.mxu1 (!%p1281_p7), %v1535_v25 }
  0x6a   : > { %1321 = vmatpush3.bf16.msra.mxu0 (!%p1281_p7), %v1495_v37 }
  0x6b   : > { %1322 = vmatprep.subr.bf16.mxu0 (!%p1281_p7), %v1496_v38  ;;  %1352 = vmatpush3.bf16.msra.mxu1 (!%p1281_p7), %v1506_v59 }
  0x6c   : > { %1353 = vmatprep.subr.bf16.mxu1 (!%p1281_p7), %v1535_v25 }
  0x6e   : > { %1323 = vmatpush3.bf16.msra.mxu0 (!%p1281_p7), %v1497_v41 }
  0x6f   : > { %1324 = vmatprep.subr.bf16.mxu0 (!%p1281_p7), %v1498_v48  ;;  %1354 = vmatpush3.bf16.msra.mxu1 (!%p1281_p7), %v1507_v60 }
  0x70   : > { %1355 = vmatprep.subr.bf16.mxu1 (!%p1281_p7), %v1535_v25 }
  0x72   : > { %1325 = vmatpush3.bf16.msra.mxu0 (!%p1281_p7), %v1499_v50 }
  0x73   : > { %1326 = vmatprep.subr.bf16.mxu0 (!%p1281_p7), %v1500_v54  ;;  %1356 = vmatpush3.bf16.msra.mxu1 (!%p1281_p7), %v1508_v61 }
  0x74   : > { %1357 = vmatprep.subr.bf16.mxu1 (!%p1281_p7), %v1535_v25 }
  0x76   : > { %1327 = vmatpush3.bf16.msra.mxu0 (!%p1281_p7), %v1501_v56 }
  0x77   : > { %1358 = vmatpush3.bf16.msra.mxu1 (!%p1281_p7), %v1509_v62 }
 0x12c   : > { %v765_v9 = vpop.f32.mrb[0].mxu0 }
 0x12d   : > { %v806_v11 = vpop.f32.mrb[0].mxu1  ;;  %v767_v13 = vpop.f32.mrb[1].mxu0  ;;  %820 = sbr.rel (%p1281_p7) target bundleno = 758 (0x2f6), region = 56 }
 0x12e   : > { %v807_v12 = vadd.f32 %v806_v11, %v765_v9  ;;  %v808_v15 = vpop.f32.mrb[1].mxu1  ;;  %v769_v17 = vpop.f32.mrb[2].mxu0 }
 0x12f   : > { %v809_v16 = vadd.f32 %v808_v15, %v767_v13  ;;  %v810_v18 = vpop.f32.mrb[2].mxu1  ;;  %v770_v20 = vpop.f32.mrb[3].mxu0 }
 0x130   : > { %v813_v19 = vadd.f32 %v807_v12, %v337_v10  ;;  %v811_v21 = vpop.f32.mrb[3].mxu1 }
 0x131   : > { %v814_v22 = vadd.f32 %v809_v16, %v338_v14 }
 0x132   : > { %815 = vst [vmem:[#allocation2] sm:$0xff] %v813_v19 }
 0x133   : > { %816 = vst [vmem:[#allocation2 + $0x8] sm:$0xff] %v814_v22 }
 0x139   : > { %v821_v45 = vld [vmem:[#allocation2] sm:$0xff] }
 0x13a   : > { %v822_v39 = vld [vmem:[#allocation2 + $0x8] sm:$0xff]  ;;  %v835_v51 = vadd.f32 %v828_v44, %v821_v45 }
 0x13b   : > { %v836_v46 = vadd.f32 %v832_v42, %v822_v39 }
 0x13c   : > { %v837_v55 = vmax.f32 %v835_v51, 0.0 }
 0x13d   : > { %v838_v49 = vmax.f32 %v836_v46, 0.0 }
 0x13e   : > { %v839_v58 = vpack.c.bf16 %v837_v55, %v837_v55 }
 0x13f   : > { %v840_v52 = vpack.c.bf16 %v838_v49, %v838_v49 }
 0x141   : > { %1008 = vmatprep.mubr.bf16.mxu0 %v840_v52 }
 0x142   : > { %1009 = vmatmul.mubr.bf16.vlgmr.msra.gmra.mrb[0].mxu0 %v839_v58 }
 0x215   : > { %v1328_v63 = vpop.f32.mrb[0].mxu0 }
 0x216   : > { %v1329_v1 = vpop.f32.mrb[1].mxu0 }
 0x217   : > { %v1330_v2 = vadd.f32 %v1329_v1, %v1328_v63  ;;  %v1331_v3 = vpop.f32.mrb[2].mxu0 }
 0x218   : > { %v1332_v4 = vpop.f32.mrb[3].mxu0 }
 0x219   : > { %v1011_v5 = vadd.f32 %v1330_v2, %v1282_v0 }
 0x21b   : > { %v1016_v6 = vmax.f32 %v1011_v5, 0.0 }
 0x21d   : > { %v1017_v7 = vpack.c.bf16 %v1016_v6, %v1016_v6 }
 0x21f   : > { %1360 = vmatmul.mubr.bf16.vlgmr.msra.gmra.mrb[0].mxu1 %v1017_v7 }
 0x2f2   : > { %v1123_v9 = vpop.f32.mrb[0].mxu1 }
 0x2f3   : > { %v1124_v10 = vadd.f32 %v1299_v8, %v1123_v9  ;;  %v1361_v11 = vpop.f32.mrb[1].mxu1 }
 0x2f4   : > { %v1126_v12 = vpop.f32.mrb[2].mxu1 }
 0x2f5   : > { %1129 = vst [vmem:[%s1788_s7] sm:$0xff] %v1124_v10  ;;  %v1362_v13 = vpop.f32.mrb[3].mxu1 }
 0x2f6 PF: > { %s17_s26 = sadd.s32 1, %s1532_s26   ;;  %s1789_s24 = smov %s1528_s25 }
 0x2f7   : > { %p14_p8 = scmp.ge.s32.totalorder %s17_s26, 10   ;;  %s1790_s25 = smov %s1792_s27 }
 0x2f9   :  { %16 = sbr.rel (!%p14_p8) target bundleno = 2 (0x2), region = 89 }

// kernel: mnist_forward.3
= control target key start
LH: loop header
LB: loop body
LE: loop exit
PB: predicated region body
PF: predicated region fallthrough
CT: control target
= control target key end

     0   :  { %s3512_s12 = smov 0   ;;  %s4503_s0 = inlined_call_operand.vmem [shape: f32[2,24,24,32], index: 0, kind: input, shape index: {}]   ;;  %s4504_s1 = inlined_call_operand.vmem [shape: bf16[32,128], index: 1, kind: input, shape index: {}]   ;;  %s4505_s2 = inlined_call_operand.vmem [shape: f32[1,128], index: 2, kind: input, shape index: {}]   ;;  %s4506_s3 = inlined_call_operand.vmem [shape: f32[2,12,12,128], index: 3, kind: output, shape index: {}]  }
   0x1 LB: > { %s3159_s13 = sadd.s32 4294967295, %s3489_s12   ;;  %p3163_p0 = scmp.ge.s32.totalorder %s3489_s12, 1  ;;  %s3489_s12 = sphi %s3512_s12, %s13_s12  }
   0x2   : > { %p137_p1 = scmp.lt.s32.totalorder %s3489_s12, 3 }
   0x4   : > { %p138_p2 = pnand %p3163_p0, %p137_p1 }
   0x6   : > { %141 = sbr.rel (%p138_p2) target bundleno = 474 (0x1da), region = 32 }
   0xd   : > { %v3480_v0 = vld [vmem:[%s4504_s1] sm:$0xff]   ;;  %p161_p3 = scmp.lt.s32.totalorder %s3159_s13, 1  ;;  %v3481_v1 = vld [vmem:[%s4504_s1 + $0x8] sm:$0xff]   ;;  %vm303_vm0 = vcmask 261120   ;;  %vm2929_vm1 = vcmask 1041409   ;;  %vm2931_vm2 = vcmask 1042434  }
   0xe   : > { %3389 = vmatprep.subr.bf16.mxu0 %v3480_v0  ;;  %3465 = vmatprep.subr.bf16.mxu1 %v3480_v0  ;;  %vm2933_vm3 = vcmask 1043459   ;;  %vm2935_vm4 = vcmask 1044484   ;;  %vm2937_vm5 = vcmask 1045509   ;;  %vm2939_vm6 = vcmask 1046534  }
   0xf   : > { %s4552_s13 = smov (!%p161_p3, %s3159_s13), 1  ;;  %3390 = vmatpush3.bf16.msra.mxu0 %v3480_v0  ;;  %3467 = vmatpush3.bf16.msra.mxu1 %v3480_v0  ;;  %vm2941_vm7 = vcmask 1047559  }
  0x10   : > { %3391 = vmatprep.subr.bf16.mxu0 %v3481_v1  ;;  %3466 = vmatprep.subr.bf16.mxu1 %v3481_v1  ;;  %s3469_s18 = smul.u32 576, %s4552_s13 }
  0x11   : > { %s3470_s24 = smul.u32 192, %s4552_s13 }
  0x12   : > { %s3532_s21 = scalar_lea.vmem %s4503_s0, %s3469_s18 }
  0x13   : > { %3392 = vmatpush3.bf16.msra.mxu0 %v3481_v1  ;;  %3468 = vmatpush3.bf16.msra.mxu1 %v3481_v1  ;;  %v172_v2 = vld [vmem:[%s3532_s21] sm:$0xff]  ;;  %v173_v3 = vld [vmem:[%s3532_s21 + $0x8] sm:$0xff]  ;;  %v174_v7 = vld [vmem:[%s3532_s21 + $0x10] sm:$0xff]  ;;  %s3754_s27 = scalar_lea.vmem %s4506_s3, %s3470_s24 }
  0x14   : > { %v208_v4 = vld [vmem:[%s3532_s21 + $0x120] sm:$0xff]  ;;  %v244_v5 = vpack.c.bf16 %v173_v3, %v172_v2  ;;  %v209_v6 = vld [vmem:[%s3532_s21 + $0x128] sm:$0xff]  ;;  %v175_v8 = vld [vmem:[%s3532_s21 + $0x18] sm:$0xff] }
  0x15   : > { %v262_v9 = vpack.c.bf16 %v209_v6, %v208_v4  ;;  %v245_v10 = vpack.c.bf16 %v175_v8, %v174_v7  ;;  %v210_v11 = vld [vmem:[%s3532_s21 + $0x130] sm:$0xff]  ;;  %v211_v12 = vld [vmem:[%s3532_s21 + $0x138] sm:$0xff]  ;;  %v176_v13 = vld [vmem:[%s3532_s21 + $0x20] sm:$0xff] }
  0x16   : > { %3393 = vmatprep.mubr.msk.bf16.mxu0 %vm303_vm0, %v244_v5  ;;  %v263_v14 = vpack.c.bf16 %v211_v12, %v210_v11  ;;  %v177_v15 = vld [vmem:[%s3532_s21 + $0x28] sm:$0xff]  ;;  %v212_v16 = vld [vmem:[%s3532_s21 + $0x140] sm:$0xff]  ;;  %v178_v20 = vld [vmem:[%s3532_s21 + $0x30] sm:$0xff] }
  0x17   : > { %v213_v17 = vld [vmem:[%s3532_s21 + $0x148] sm:$0xff]  ;;  %3429 = vmatprep.mubr.msk.bf16.mxu1 %vm303_vm0, %v262_v9  ;;  %3394 = vmatmul.mubr.msk.bf16.vlgmr.msra.gmra.mrb[0].mxu0 %vm303_vm0, %v245_v10  ;;  %v246_v18 = vpack.c.bf16 %v177_v15, %v176_v13  ;;  %v179_v21 = vld [vmem:[%s3532_s21 + $0x38] sm:$0xff]  ;;  %v214_v22 = vld [vmem:[%s3532_s21 + $0x150] sm:$0xff] }
  0x18   : > { %v264_v19 = vpack.c.bf16 %v213_v17, %v212_v16  ;;  %3430 = vmatmul.mubr.msk.bf16.vlgmr.msra.gmra.mrb[0].mxu1 %vm303_vm0, %v263_v14  ;;  %v215_v23 = vld [vmem:[%s3532_s21 + $0x158] sm:$0xff]  ;;  %v180_v24 = vld [vmem:[%s3532_s21 + $0x40] sm:$0xff]  ;;  %v181_v25 = vld [vmem:[%s3532_s21 + $0x48] sm:$0xff]  ;;  %v247_v28 = vpack.c.bf16 %v179_v21, %v178_v20 }
  0x19   : > { %3397 = vmatprep.mubr.msk.bf16.mxu0 %vm303_vm0, %v246_v18  ;;  %v216_v26 = vld [vmem:[%s3532_s21 + $0x160] sm:$0xff]  ;;  %v217_v27 = vld [vmem:[%s3532_s21 + $0x168] sm:$0xff]  ;;  %v265_v29 = vpack.c.bf16 %v215_v23, %v214_v22  ;;  %v248_v30 = vpack.c.bf16 %v181_v25, %v180_v24  ;;  %v182_v32 = vld [vmem:[%s3532_s21 + $0x50] sm:$0xff] }
  0x1a   : > { %3433 = vmatprep.mubr.msk.bf16.mxu1 %vm303_vm0, %v264_v19  ;;  %v266_v31 = vpack.c.bf16 %v217_v27, %v216_v26  ;;  %v183_v33 = vld [vmem:[%s3532_s21 + $0x58] sm:$0xff]  ;;  %v218_v34 = vld [vmem:[%s3532_s21 + $0x170] sm:$0xff]  ;;  %v184_v36 = vld [vmem:[%s3532_s21 + $0x60] sm:$0xff] }
  0x1b   : > { %v219_v35 = vld [vmem:[%s3532_s21 + $0x178] sm:$0xff]  ;;  %v185_v37 = vld [vmem:[%s3532_s21 + $0x68] sm:$0xff]  ;;  %v220_v38 = vld [vmem:[%s3532_s21 + $0x180] sm:$0xff]  ;;  %v249_v40 = vpack.c.bf16 %v183_v33, %v182_v32 }
  0x1c   : > { %v221_v39 = vld [vmem:[%s3532_s21 + $0x188] sm:$0xff]  ;;  %v267_v41 = vpack.c.bf16 %v219_v35, %v218_v34  ;;  %v250_v42 = vpack.c.bf16 %v185_v37, %v184_v36  ;;  %v186_v44 = vld [vmem:[%s3532_s21 + $0x70] sm:$0xff]  ;;  %v187_v45 = vld [vmem:[%s3532_s21 + $0x78] sm:$0xff] }
  0x1d   : > { %v268_v43 = vpack.c.bf16 %v221_v39, %v220_v38  ;;  %v222_v46 = vld [vmem:[%s3532_s21 + $0x190] sm:$0xff]  ;;  %v223_v47 = vld [vmem:[%s3532_s21 + $0x198] sm:$0xff]  ;;  %v188_v48 = vld [vmem:[%s3532_s21 + $0x80] sm:$0xff]  ;;  %v251_v52 = vpack.c.bf16 %v187_v45, %v186_v44 }
  0x1e   : > { %v189_v49 = vld [vmem:[%s3532_s21 + $0x88] sm:$0xff]  ;;  %v224_v50 = vld [vmem:[%s3532_s21 + $0x1a0] sm:$0xff]  ;;  %v269_v53 = vpack.c.bf16 %v223_v47, %v222_v46  ;;  %v190_v56 = vld [vmem:[%s3532_s21 + $0x90] sm:$0xff]  ;;  %v3491_v46 = vmov 1983009808  }
  0x1f   : > { %3398 = vmatmul.mubr.msk.bf16.gmra.mrb[4].mxu0 %vm303_vm0, %v247_v28  ;;  %v225_v51 = vld [vmem:[%s3532_s21 + $0x1a8] sm:$0xff]  ;;  %v252_v54 = vpack.c.bf16 %v189_v49, %v188_v48  ;;  %v191_v57 = vld [vmem:[%s3532_s21 + $0x98] sm:$0xff]  ;;  %v226_v58 = vld [vmem:[%s3532_s21 + $0x1b0] sm:$0xff]  ;;  %v879_v47 = vunpack.c.l.s4 %v3491_v46  ;;  %v881_v48 = vlaneseq }
  0x20   : > { %3434 = vmatmul.mubr.msk.bf16.gmra.mrb[4].mxu1 %vm303_vm0, %v265_v29  ;;  %3401 = vmatprep.mubr.msk.bf16.mxu0 %vm303_vm0, %v248_v30  ;;  %v270_v55 = vpack.c.bf16 %v225_v51, %v224_v50  ;;  %v227_v59 = vld [vmem:[%s3532_s21 + $0x1b8] sm:$0xff]  ;;  %v192_v60 = vld [vmem:[%s3532_s21 + $0xa0] sm:$0xff]  ;;  %v193_v61 = vld [vmem:[%s3532_s21 + $0xa8] sm:$0xff]  ;;  %v253_v0 = vpack.c.bf16 %v191_v57, %v190_v56 }
  0x21   : > { %3437 = vmatprep.mubr.msk.bf16.mxu1 %vm303_vm0, %v266_v31  ;;  %v228_v62 = vld [vmem:[%s3532_s21 + $0x1c0] sm:$0xff]  ;;  %v229_v63 = vld [vmem:[%s3532_s21 + $0x1c8] sm:$0xff]  ;;  %v271_v1 = vpack.c.bf16 %v227_v59, %v226_v58  ;;  %v254_v2 = vpack.c.bf16 %v193_v61, %v192_v60  ;;  %v194_v4 = vld [vmem:[%s3532_s21 + $0xb0] sm:$0xff]  ;;  %v880_v51 = vunpack.c.0.s8 %v879_v47 }
  0x22   : > { %v272_v3 = vpack.c.bf16 %v229_v63, %v228_v62  ;;  %v195_v5 = vld [vmem:[%s3532_s21 + $0xb8] sm:$0xff]  ;;  %v230_v6 = vld [vmem:[%s3532_s21 + $0x1d0] sm:$0xff]  ;;  %v196_v8 = vld [vmem:[%s3532_s21 + $0xc0] sm:$0xff] }
  0x23   : > { %v231_v7 = vld [vmem:[%s3532_s21 + $0x1d8] sm:$0xff]  ;;  %v197_v9 = vld [vmem:[%s3532_s21 + $0xc8] sm:$0xff]  ;;  %v232_v10 = vld [vmem:[%s3532_s21 + $0x1e0] sm:$0xff]  ;;  %v255_v12 = vpack.c.bf16 %v195_v5, %v194_v4 }
  0x24   : > { %v233_v11 = vld [vmem:[%s3532_s21 + $0x1e8] sm:$0xff]  ;;  %v273_v13 = vpack.c.bf16 %v231_v7, %v230_v6  ;;  %v256_v14 = vpack.c.bf16 %v197_v9, %v196_v8  ;;  %v198_v16 = vld [vmem:[%s3532_s21 + $0xd0] sm:$0xff]  ;;  %v199_v17 = vld [vmem:[%s3532_s21 + $0xd8] sm:$0xff] }
  0x25   : > { %v274_v15 = vpack.c.bf16 %v233_v11, %v232_v10  ;;  %v234_v18 = vld [vmem:[%s3532_s21 + $0x1f0] sm:$0xff]  ;;  %v235_v19 = vld [vmem:[%s3532_s21 + $0x1f8] sm:$0xff]  ;;  %v200_v20 = vld [vmem:[%s3532_s21 + $0xe0] sm:$0xff]  ;;  %v257_v24 = vpack.c.bf16 %v199_v17, %v198_v16 }
  0x26   : > { %v201_v21 = vld [vmem:[%s3532_s21 + $0xe8] sm:$0xff]  ;;  %v236_v22 = vld [vmem:[%s3532_s21 + $0x200] sm:$0xff]  ;;  %v275_v25 = vpack.c.bf16 %v235_v19, %v234_v18  ;;  %v202_v28 = vld [vmem:[%s3532_s21 + $0xf0] sm:$0xff] }
  0x27   : > { %3402 = vmatmul.mubr.msk.bf16.gmra.mrb[8].mxu0 %vm303_vm0, %v249_v40  ;;  %v237_v23 = vld [vmem:[%s3532_s21 + $0x208] sm:$0xff]  ;;  %v258_v26 = vpack.c.bf16 %v201_v21, %v200_v20  ;;  %v203_v29 = vld [vmem:[%s3532_s21 + $0xf8] sm:$0xff]  ;;  %v238_v30 = vld [vmem:[%s3532_s21 + $0x210] sm:$0xff] }
  0x28   : > { %3438 = vmatmul.mubr.msk.bf16.gmra.mrb[8].mxu1 %vm303_vm0, %v267_v41  ;;  %3405 = vmatprep.mubr.msk.bf16.mxu0 %vm303_vm0, %v250_v42  ;;  %v276_v27 = vpack.c.bf16 %v237_v23, %v236_v22  ;;  %v239_v31 = vld [vmem:[%s3532_s21 + $0x218] sm:$0xff]  ;;  %v204_v32 = vld [vmem:[%s3532_s21 + $0x100] sm:$0xff]  ;;  %v205_v33 = vld [vmem:[%s3532_s21 + $0x108] sm:$0xff]  ;;  %v259_v36 = vpack.c.bf16 %v203_v29, %v202_v28 }
  0x29   : > { %3441 = vmatprep.mubr.msk.bf16.mxu1 %vm303_vm0, %v268_v43  ;;  %v240_v34 = vld [vmem:[%s3532_s21 + $0x220] sm:$0xff]  ;;  %v241_v35 = vld [vmem:[%s3532_s21 + $0x228] sm:$0xff]  ;;  %v277_v37 = vpack.c.bf16 %v239_v31, %v238_v30  ;;  %v260_v38 = vpack.c.bf16 %v205_v33, %v204_v32  ;;  %v206_v40 = vld [vmem:[%s3532_s21 + $0x110] sm:$0xff] }
  0x2a   : > { %v278_v39 = vpack.c.bf16 %v241_v35, %v240_v34  ;;  %v207_v41 = vld [vmem:[%s3532_s21 + $0x118] sm:$0xff]  ;;  %v242_v42 = vld [vmem:[%s3532_s21 + $0x230] sm:$0xff]  ;;  %v3645_v49 = vld [vmem:[%s4505_s2] ss:$0 sm:$0xff] }
  0x2b   : > { %v243_v43 = vld [vmem:[%s3532_s21 + $0x238] sm:$0xff]  ;;  %v261_v44 = vpack.c.bf16 %v207_v41, %v206_v40 }
  0x2c   : > { %v279_v45 = vpack.c.bf16 %v243_v43, %v242_v42 }
  0x2f   : > { %3406 = vmatmul.mubr.msk.bf16.gmra.mrb[12].mxu0 %vm303_vm0, %v251_v52  ;;  %v882_v52 = vshrl.u32 %v881_v48, 7 }
  0x30   : > { %3442 = vmatmul.mubr.msk.bf16.gmra.mrb[12].mxu1 %vm303_vm0, %v269_v53  ;;  %3409 = vmatprep.mubr.msk.bf16.mxu0 %vm303_vm0, %v252_v54 }
  0x31   : > { %3445 = vmatprep.mubr.msk.bf16.mxu1 %vm303_vm0, %v270_v55  ;;  %v3666_v11 = vsub.s32 0, %v882_v52 }
  0x37   : > { %3410 = vmatmul.mubr.msk.bf16.gmra.mrb[16].mxu0 %vm303_vm0, %v253_v0  ;;  %v3653_v0 = vsub.s32 %v880_v51, %v882_v52 }
  0x38   : > { %3446 = vmatmul.mubr.msk.bf16.gmra.mrb[16].mxu1 %vm303_vm0, %v271_v1  ;;  %3413 = vmatprep.mubr.msk.bf16.mxu0 %vm303_vm0, %v254_v2 }
  0x39   : > { %3449 = vmatprep.mubr.msk.bf16.mxu1 %vm303_vm0, %v272_v3 }
  0x3f   : > { %3414 = vmatmul.mubr.msk.bf16.gmra.mrb[20].mxu0 %vm303_vm0, %v255_v12 }
  0x40   : > { %3450 = vmatmul.mubr.msk.bf16.gmra.mrb[20].mxu1 %vm303_vm0, %v273_v13  ;;  %3417 = vmatprep.mubr.msk.bf16.mxu0 %vm303_vm0, %v256_v14 }
  0x41   : > { %3453 = vmatprep.mubr.msk.bf16.mxu1 %vm303_vm0, %v274_v15 }
  0x47   : > { %3418 = vmatmul.mubr.msk.bf16.gmra.mrb[24].mxu0 %vm303_vm0, %v257_v24 }
  0x48   : > { %3454 = vmatmul.mubr.msk.bf16.gmra.mrb[24].mxu1 %vm303_vm0, %v275_v25  ;;  %3421 = vmatprep.mubr.msk.bf16.mxu0 %vm303_vm0, %v258_v26 }
  0x49   : > { %3457 = vmatprep.mubr.msk.bf16.mxu1 %vm303_vm0, %v276_v27 }
  0x4f   : > { %3422 = vmatmul.mubr.msk.bf16.gmra.mrb[28].mxu0 %vm303_vm0, %v259_v36 }
  0x50   : > { %3458 = vmatmul.mubr.msk.bf16.gmra.mrb[28].mxu1 %vm303_vm0, %v277_v37  ;;  %3425 = vmatprep.mubr.msk.bf16.mxu0 %vm303_vm0, %v260_v38 }
  0x51   : > { %3461 = vmatprep.mubr.msk.bf16.mxu1 %vm303_vm0, %v278_v39 }
  0x57   : > { %3426 = vmatmul.mubr.msk.bf16.gmra.mrb[32].mxu0 %vm303_vm0, %v261_v44 }
  0x58   : > { %3462 = vmatmul.mubr.msk.bf16.gmra.mrb[32].mxu1 %vm303_vm0, %v279_v45 }
  0xea   : > { %v3395_v50 = vpop.f32.mrb[0].mxu0 }
  0xeb   : > { %v3431_v53 = vpop.f32.mrb[0].mxu1  ;;  %v446_v54 = vpop.f32.mrb[1].mxu0  ;;  %v3651_v62 = vadd.f32 %v3395_v50, %v3645_v49 }
  0xec   : > { %v447_v55 = vadd.f32 %v3645_v49, %v446_v54  ;;  %v590_v56 = vpop.f32.mrb[1].mxu1  ;;  %v3396_v57 = vpop.f32.mrb[2].mxu0  ;;  %v3657_v3 = vadd.f32 %v3431_v53, %v3645_v49 }
  0xed   : > { %v591_v58 = vadd.f32 %v3645_v49, %v590_v56  ;;  %v458_v59 = vadd.f32 %v3396_v57, %v3645_v49  ;;  %v3432_v60 = vpop.f32.mrb[2].mxu1  ;;  %v449_v61 = vpop.f32.mrb[3].mxu0  ;;  %v735_v10 = vmax.f32 %v3651_v62, 0.0 }
  0xee   : > { %v733_v63 = vmax.f32 %v447_v55, 0.0  ;;  %v602_v1 = vadd.f32 %v3432_v60, %v3645_v49  ;;  %v593_v2 = vpop.f32.mrb[3].mxu1  ;;  %v3660_v6 = vadd.f32 %v3645_v49, %v449_v61  ;;  %v771_v14 = vmax.f32 %v3657_v3, 0.0 }
  0xef   : > { %v769_v4 = vmax.f32 %v591_v58, 0.0  ;;  %v736_v5 = vmax.f32 %v458_v59, 0.0  ;;  %v3663_v8 = vadd.f32 %v3645_v49, %v593_v2 }
  0xf0   : > { %v772_v7 = vmax.f32 %v602_v1, 0.0  ;;  %v734_v17 = vmax.f32 %v3660_v6, 0.0 }
  0xf1   : > { %v805_v9 = vmax.f32 %v733_v63, %v736_v5  ;;  %v770_v22 = vmax.f32 %v3663_v8, 0.0 }
  0xf2   : > { %v823_v12 = vmax.f32 %v769_v4, %v772_v7  ;;  %v3399_v13 = vpop.f32.mrb[4].mxu0 }
  0xf3   : > { %v877_v15 = vcombine.high %v805_v9, %v805_v9  ;;  %v884_v16 = vrot.slane %v805_v9, %v3653_v0  ;;  %v3435_v18 = vpop.f32.mrb[4].mxu1  ;;  %v462_v19 = vpop.f32.mrb[5].mxu0  ;;  %v3674_v23 = vadd.f32 %v3399_v13, %v3645_v49 }
  0xf4   : > { %v1183_v20 = vcombine.high %v823_v12, %v823_v12  ;;  %v1190_v21 = vrot.slane %v823_v12, %v3653_v0  ;;  %v606_v24 = vpop.f32.mrb[5].mxu1  ;;  %v3400_v25 = vpop.f32.mrb[6].mxu0  ;;  %v3678_v29 = vadd.f32 %v3435_v18, %v3645_v49  ;;  %v463_v35 = vadd.f32 %v3645_v49, %v462_v19 }
  0xf5   : > { %v891_v26 = vrot.slane %v877_v15, %v3653_v0  ;;  %v892_v27 = vcombine.high %v884_v16, %v884_v16  ;;  %v3205_v28 = vrot.slane %v884_v16, 9  ;;  %v3436_v30 = vpop.f32.mrb[6].mxu1  ;;  %v465_v31 = vpop.f32.mrb[7].mxu0  ;;  %v607_v2 = vadd.f32 %v3645_v49, %v606_v24 }
  0xf6   : > { %v1197_v32 = vrot.slane %v1183_v20, %v3653_v0  ;;  %v1198_v33 = vcombine.high %v1190_v21, %v1190_v21  ;;  %v3277_v34 = vrot.slane %v1190_v21, 9  ;;  %v609_v36 = vpop.f32.mrb[7].mxu1  ;;  %v737_v58 = vmax.f32 %v463_v35, 0.0 }
  0xf7   : > { %v893_v37 = vcombine.high %v891_v26, %v891_v26  ;;  %v3206_v38 = vrot.slane %v892_v27, 9  ;;  %v3207_v39 = vrot.slane %v891_v26, 9  ;;  %v2065_v40 = vmax.f32 %v884_v16, %v3205_v28 }
  0xf8   : > { %v1199_v41 = vcombine.high %v1197_v32, %v1197_v32  ;;  %v3278_v42 = vrot.slane %v1198_v33, 9  ;;  %v3279_v43 = vrot.slane %v1197_v32, 9  ;;  %v2137_v44 = vmax.f32 %v1190_v21, %v3277_v34 }
  0xf9   : > { %v3208_v45 = vrot.slane %v893_v37, 9  ;;  %v2066_v46 = vmax.f32 %v892_v27, %v3206_v38  ;;  %v2067_v47 = vmax.f32 %v891_v26, %v3207_v39  ;;  %v2356_v48 = vrot.slane %v2065_v40, %v3666_v11 }
  0xfa   : > { %v3280_v50 = vrot.slane %v1199_v41, 9  ;;  %v2138_v51 = vmax.f32 %v1198_v33, %v3278_v42  ;;  %v2139_v52 = vmax.f32 %v1197_v32, %v3279_v43  ;;  %v2644_v53 = vrot.slane %v2137_v44, %v3666_v11  ;;  %v3684_v54 = vpop.f32.mrb[8].mxu0 }
  0xfb   : > { %v2068_v55 = vmax.f32 %v893_v37, %v3208_v45  ;;  %v2360_v56 = vrot.slane %v2066_v46, %v3666_v11  ;;  %v2364_v57 = vrot.slane %v2067_v47, %v3666_v11  ;;  %v3688_v59 = vpop.f32.mrb[8].mxu1  ;;  %v3690_v60 = vpop.f32.mrb[9].mxu0  ;;  %v806_v9 = vmax.f32 %v734_v17, %v737_v58 }
  0xfc   : > { %v2140_v61 = vmax.f32 %v1199_v41, %v3280_v50  ;;  %v2648_v63 = vrot.slane %v2138_v51, %v3666_v11  ;;  %v2652_v1 = vrot.slane %v2139_v52, %v3666_v11  ;;  %v3695_v4 = vpop.f32.mrb[9].mxu1  ;;  %v3697_v5 = vpop.f32.mrb[10].mxu0  ;;  %v3702_v12 = vadd.f32 %v3400_v25, %v3645_v49 }
  0xfd   : > { %v2368_v6 = vrot.slane %v2068_v55, %v3666_v11  ;;  %v2930_v7 = vsel %vm2929_vm1, %v2360_v56, %v2356_v48  ;;  %v3704_v13 = vpop.f32.mrb[10].mxu1  ;;  %v3706_v15 = vpop.f32.mrb[11].mxu0  ;;  %v773_v20 = vmax.f32 %v607_v2, 0.0  ;;  %v894_v17 = vcombine.high %v806_v9, %v806_v9 }
  0xfe   : > { %v2932_v16 = vsel %vm2931_vm2, %v2364_v57, %v2930_v7  ;;  %v2656_v18 = vrot.slane %v2140_v61, %v3666_v11  ;;  %v2996_v19 = vsel %vm2929_vm1, %v2648_v63, %v2644_v53  ;;  %v3711_v21 = vpop.f32.mrb[11].mxu1  ;;  %v901_v25 = vrot.slane %v806_v9, %v3653_v0 }
  0xff   : > { %v2997_v24 = vsel %vm2931_vm2, %v2652_v1, %v2996_v19  ;;  %v2934_v26 = vsel %vm2933_vm3, %v2368_v6, %v2932_v16  ;;  %v824_v27 = vmax.f32 %v770_v22, %v773_v20  ;;  %v740_v32 = vmax.f32 %v3702_v12, 0.0 }
 0x100   : > { %v2998_v28 = vsel %vm2933_vm3, %v2656_v18, %v2997_v24  ;;  %v3721_v33 = vadd.f32 %v3436_v30, %v3645_v49  ;;  %v908_v34 = vrot.slane %v894_v17, %v3653_v0  ;;  %v909_v35 = vcombine.high %v901_v25, %v901_v25 }
 0x101   : > { %v3209_v37 = vrot.slane %v901_v25, 9  ;;  %v466_v38 = vadd.f32 %v3645_v49, %v465_v31  ;;  %v1200_v39 = vcombine.high %v824_v27, %v824_v27  ;;  %v1207_v40 = vrot.slane %v824_v27, %v3653_v0 }
 0x102   : > { %v776_v8 = vmax.f32 %v3721_v33, 0.0  ;;  %v610_v22 = vadd.f32 %v3645_v49, %v609_v36  ;;  %v3728_v41 = vpop.f32.mrb[12].mxu0  ;;  %v910_v42 = vcombine.high %v908_v34, %v908_v34  ;;  %v3210_v43 = vrot.slane %v909_v35, 9 }
 0x103   : > { %v3211_v30 = vrot.slane %v908_v34, 9  ;;  %v2069_v44 = vmax.f32 %v901_v25, %v3209_v37  ;;  %v3730_v45 = vpop.f32.mrb[12].mxu1  ;;  %v3732_v46 = vpop.f32.mrb[13].mxu0  ;;  %v1214_v31 = vrot.slane %v1200_v39, %v3653_v0  ;;  %v1215_v47 = vcombine.high %v1207_v40, %v1207_v40 }
 0x104   : > { %v3281_v48 = vrot.slane %v1207_v40, 9  ;;  %v738_v50 = vmax.f32 %v466_v38, 0.0  ;;  %v3735_v51 = vpop.f32.mrb[13].mxu1  ;;  %v3737_v52 = vpop.f32.mrb[14].mxu0  ;;  %v3212_v36 = vrot.slane %v910_v42, 9  ;;  %v2070_v53 = vmax.f32 %v909_v35, %v3210_v43 }
 0x105   : > { %v2071_v55 = vmax.f32 %v908_v34, %v3211_v30  ;;  %v2372_v56 = vrot.slane %v2069_v44, %v3666_v11  ;;  %v3741_v57 = vpop.f32.mrb[14].mxu1  ;;  %v3743_v58 = vpop.f32.mrb[15].mxu0  ;;  %v1216_v61 = vcombine.high %v1214_v31, %v1214_v31  ;;  %v3282_v63 = vrot.slane %v1215_v47, 9 }
 0x106   : > { %v3283_v1 = vrot.slane %v1214_v31, 9  ;;  %v2141_v2 = vmax.f32 %v1207_v40, %v3281_v48  ;;  %v3745_v6 = vpop.f32.mrb[15].mxu1  ;;  %v2072_v7 = vmax.f32 %v910_v42, %v3212_v36  ;;  %v2376_v9 = vrot.slane %v2070_v53, %v3666_v11 }
 0x107   : > { %v2380_v16 = vrot.slane %v2071_v55, %v3666_v11  ;;  %v2936_v18 = vsel %vm2935_vm4, %v2372_v56, %v2934_v26  ;;  %v3284_v19 = vrot.slane %v1216_v61, 9  ;;  %v2142_v20 = vmax.f32 %v1215_v47, %v3282_v63 }
 0x108   : > { %v2143_v24 = vmax.f32 %v1214_v31, %v3283_v1  ;;  %v2660_v17 = vrot.slane %v2141_v2, %v3666_v11  ;;  %v2384_v25 = vrot.slane %v2072_v7, %v3666_v11  ;;  %v2938_v27 = vsel %vm2937_vm5, %v2376_v9, %v2936_v18 }
 0x109   : > { %v807_v34 = vmax.f32 %v735_v10, %v738_v50  ;;  %v774_v35 = vmax.f32 %v610_v22, 0.0  ;;  %v2940_v26 = vsel %vm2939_vm6, %v2380_v16, %v2938_v27  ;;  %v2144_v37 = vmax.f32 %v1216_v61, %v3284_v19 }
 0x10a   : > { %v2664_v38 = vrot.slane %v2142_v20, %v3666_v11  ;;  %v2668_v39 = vrot.slane %v2143_v24, %v3666_v11  ;;  %v3763_v40 = vpop.f32.mrb[16].mxu0  ;;  %v2942_v42 = vsel %vm2941_vm7, %v2384_v25, %v2940_v26  ;;  %v2999_v43 = vsel %vm2935_vm4, %v2660_v17, %v2998_v28 }
 0x10b   : > { %v911_v30 = vcombine.high %v807_v34, %v807_v34  ;;  %v918_v44 = vrot.slane %v807_v34, %v3653_v0  ;;  %v3768_v31 = vpop.f32.mrb[16].mxu1  ;;  %v3770_v62 = vpop.f32.mrb[17].mxu0  ;;  %3080 = vst [vmem:[%s3754_s27] sm:$0xff] %v2942_v42  ;;  %v2672_v10 = vrot.slane %v2144_v37, %v3666_v11  ;;  %v825_v47 = vmax.f32 %v771_v14, %v774_v35 }
 0x10c   : > { %v3000_v22 = vsel %vm2937_vm5, %v2664_v38, %v2999_v43  ;;  %v487_v48 = vadd.f32 %v3684_v54, %v3645_v49  ;;  %v3779_v28 = vpop.f32.mrb[17].mxu1  ;;  %v3781_v50 = vpop.f32.mrb[18].mxu0 }
 0x10d   : > { %v3001_v36 = vsel %vm2939_vm6, %v2668_v39, %v3000_v22  ;;  %v925_v53 = vrot.slane %v911_v30, %v3653_v0  ;;  %v926_v55 = vcombine.high %v918_v44, %v918_v44  ;;  %v3213_v56 = vrot.slane %v918_v44, 9  ;;  %v3785_v61 = vpop.f32.mrb[18].mxu1  ;;  %v3787_v63 = vpop.f32.mrb[19].mxu0 }
 0x10e   : > { %v3002_v3 = vsel %vm2941_vm7, %v2672_v10, %v3001_v36  ;;  %v1217_v14 = vcombine.high %v825_v47, %v825_v47  ;;  %v1224_v1 = vrot.slane %v825_v47, %v3653_v0  ;;  %v743_v54 = vmax.f32 %v487_v48, 0.0  ;;  %v3791_v2 = vpop.f32.mrb[19].mxu1 }
 0x10f   : > { %3092 = vst [vmem:[%s3754_s27 + $0x60] sm:$0xff] %v3002_v3  ;;  %v927_v7 = vcombine.high %v925_v53, %v925_v53  ;;  %v3214_v9 = vrot.slane %v926_v55, 9  ;;  %v3215_v16 = vrot.slane %v925_v53, 9  ;;  %v2073_v18 = vmax.f32 %v918_v44, %v3213_v56 }
 0x110   : > { %v1231_v19 = vrot.slane %v1217_v14, %v3653_v0  ;;  %v1232_v20 = vcombine.high %v1224_v1, %v1224_v1  ;;  %v3285_v24 = vrot.slane %v1224_v1, 9  ;;  %v809_v17 = vmax.f32 %v740_v32, %v743_v54 }
 0x111   : > { %v3216_v25 = vrot.slane %v927_v7, 9  ;;  %v2074_v27 = vmax.f32 %v926_v55, %v3214_v9  ;;  %v2075_v34 = vmax.f32 %v925_v53, %v3215_v16  ;;  %v2388_v35 = vrot.slane %v2073_v18, %v3666_v11 }
 0x112   : > { %v1233_v26 = vcombine.high %v1231_v19, %v1231_v19  ;;  %v3286_v37 = vrot.slane %v1232_v20, 9  ;;  %v3287_v38 = vrot.slane %v1231_v19, 9  ;;  %v2145_v39 = vmax.f32 %v1224_v1, %v3285_v24  ;;  %v3798_v42 = vpop.f32.mrb[20].mxu0 }
 0x113   : > { %v2076_v43 = vmax.f32 %v927_v7, %v3216_v25  ;;  %v2392_v30 = vrot.slane %v2074_v27, %v3666_v11  ;;  %v2396_v44 = vrot.slane %v2075_v34, %v3666_v11  ;;  %v945_v10 = vcombine.high %v809_v17, %v809_v17  ;;  %v3802_v22 = vpop.f32.mrb[20].mxu1  ;;  %v3804_v12 = vpop.f32.mrb[21].mxu0 }
 0x114   : > { %v3288_v32 = vrot.slane %v1233_v26, 9  ;;  %v2146_v47 = vmax.f32 %v1232_v20, %v3286_v37  ;;  %v2147_v48 = vmax.f32 %v1231_v19, %v3287_v38  ;;  %v2676_v36 = vrot.slane %v2145_v39, %v3666_v11  ;;  %v3807_v53 = vpop.f32.mrb[21].mxu1  ;;  %v3809_v55 = vpop.f32.mrb[22].mxu0 }
 0x115   : > { %v2400_v56 = vrot.slane %v2076_v43, %v3666_v11  ;;  %v2943_v3 = vsel %vm2929_vm1, %v2392_v30, %v2388_v35  ;;  %v952_v14 = vrot.slane %v809_v17, %v3653_v0  ;;  %v959_v1 = vrot.slane %v945_v10, %v3653_v0  ;;  %v3815_v54 = vpop.f32.mrb[22].mxu1  ;;  %v3817_v7 = vpop.f32.mrb[23].mxu0 }
 0x116   : > { %4507 = vst [vmem:[#allocation2_spill] sm:$0xff] %v3817_v7  ;;  %v2944_v9 = vsel %vm2931_vm2, %v2396_v44, %v2943_v3  ;;  %v2148_v16 = vmax.f32 %v1233_v26, %v3288_v32  ;;  %v2680_v18 = vrot.slane %v2146_v47, %v3666_v11  ;;  %v2684_v19 = vrot.slane %v2147_v48, %v3666_v11  ;;  %v3822_v20 = vpop.f32.mrb[23].mxu1 }
 0x117   : > { %4508 = vst [vmem:[#allocation3_spill] sm:$0xff] %v3822_v20  ;;  %v2945_v24 = vsel %vm2933_vm3, %v2400_v56, %v2944_v9  ;;  %v960_v25 = vcombine.high %v952_v14, %v952_v14  ;;  %v961_v27 = vcombine.high %v959_v1, %v959_v1  ;;  %v3221_v17 = vrot.slane %v952_v14, 9 }
 0x118   : > { %3081 = vst [vmem:[%s3754_s27 + $0x8] sm:$0xf] %v2945_v24  ;;  %v2688_v34 = vrot.slane %v2148_v16, %v3666_v11  ;;  %v3003_v35 = vsel %vm2929_vm1, %v2680_v18, %v2676_v36  ;;  %v3223_v37 = vrot.slane %v959_v1, 9  ;;  %v631_v26 = vadd.f32 %v3688_v59, %v3645_v49 }
 0x119   : > { %v3004_v38 = vsel %vm2931_vm2, %v2684_v19, %v3003_v35  ;;  %v3222_v39 = vrot.slane %v960_v25, 9  ;;  %v3224_v43 = vrot.slane %v961_v27, 9  ;;  %v3831_v30 = vmax.f32 %v952_v14, %v3221_v17 }
 0x11a   : > { %v3005_v44 = vsel %vm2933_vm3, %v2688_v34, %v3004_v38  ;;  %v3834_v10 = vmax.f32 %v959_v1, %v3223_v37  ;;  %v779_v32 = vmax.f32 %v631_v26, 0.0  ;;  %v479_v47 = vadd.f32 %v3645_v49, %v3690_v60  ;;  %v3838_v48 = vpop.f32.mrb[24].mxu0 }
 0x11b   : > { %4509 = vst [vmem:[#allocation4_spill] sm:$0xff] %v3838_v48  ;;  %3093 = vst [vmem:[%s3754_s27 + $0x68] sm:$0xf] %v3005_v44  ;;  %v3842_v59 = vmax.f32 %v960_v25, %v3222_v39  ;;  %v623_v56 = vadd.f32 %v3645_v49, %v3695_v4  ;;  %v3846_v3 = vpop.f32.mrb[24].mxu1  ;;  %v3848_v14 = vpop.f32.mrb[25].mxu0  ;;  %v490_v16 = vadd.f32 %v3697_v5, %v3645_v49 }
 0x11c   : > { %4510 = vst [vmem:[#allocation5_spill] sm:$0xff] %v3846_v3  ;;  %4511 = vst [vmem:[#allocation6_spill] sm:$0xff] %v3848_v14  ;;  %v827_v9 = vmax.f32 %v776_v8, %v779_v32  ;;  %v741_v60 = vmax.f32 %v479_v47, 0.0  ;;  %v3855_v18 = vpop.f32.mrb[25].mxu1  ;;  %v3857_v19 = vpop.f32.mrb[26].mxu0  ;;  %v3859_v24 = vmax.f32 %v961_v27, %v3224_v43  ;;  %v634_v17 = vadd.f32 %v3704_v13, %v3645_v49 }
 0x11d   : > { %4512 = vst [vmem:[#allocation7_spill] sm:$0xff] %v3855_v18  ;;  %4513 = vst [vmem:[#allocation8_spill] sm:$0xff] %v3857_v19  ;;  %v777_v25 = vmax.f32 %v623_v56, 0.0  ;;  %v3865_v34 = vpop.f32.mrb[26].mxu1  ;;  %v3867_v33 = vpop.f32.mrb[27].mxu0  ;;  %v744_v37 = vmax.f32 %v490_v16, 0.0  ;;  %v482_v13 = vadd.f32 %v3645_v49, %v3706_v15  ;;  %v3880_v39 = vadd.f32 %v3645_v49, %v3711_v21 }
 0x11e   : > { %4514 = vst [vmem:[#allocation9_spill] sm:$0xff] %v3865_v34  ;;  %4515 = vst [vmem:[#allocation10_spill] sm:$0xff] %v3867_v33  ;;  %v1251_v8 = vcombine.high %v827_v9, %v827_v9  ;;  %v1258_v35 = vrot.slane %v827_v9, %v3653_v0  ;;  %v3872_v27 = vpop.f32.mrb[27].mxu1  ;;  %v780_v38 = vmax.f32 %v634_v17, 0.0  ;;  %v3887_v16 = vadd.f32 %v3728_v41, %v3645_v49 }
 0x11f   : > { %4516 = vst [vmem:[#allocation11_spill] sm:$0xff] %v3872_v27  ;;  %v810_v47 = vmax.f32 %v741_v60, %v744_v37  ;;  %v3891_v15 = vadd.f32 %v3730_v45, %v3645_v49  ;;  %v742_v1 = vmax.f32 %v482_v13, 0.0  ;;  %v778_v36 = vmax.f32 %v3880_v39, 0.0 }
 0x120   : > { %v1265_v43 = vrot.slane %v1251_v8, %v3653_v0  ;;  %v1266_v44 = vcombine.high %v1258_v35, %v1258_v35  ;;  %v3293_v32 = vrot.slane %v1258_v35, 9  ;;  %v828_v9 = vmax.f32 %v777_v25, %v780_v38 }
 0x121   : > { %v962_v60 = vcombine.high %v810_v47, %v810_v47  ;;  %v969_v37 = vrot.slane %v810_v47, %v3653_v0 }
 0x122   : > { %v1267_v17 = vcombine.high %v1265_v43, %v1265_v43  ;;  %v3294_v21 = vrot.slane %v1266_v44, 9  ;;  %v3295_v5 = vrot.slane %v1265_v43, 9  ;;  %v3893_v26 = vmax.f32 %v1258_v35, %v3293_v32  ;;  %v3895_v8 = vpop.f32.mrb[28].mxu0 }
 0x123   : > { %4517 = vst [vmem:[#allocation12_spill] sm:$0xff] %v3895_v8  ;;  %v1268_v56 = vcombine.high %v828_v9, %v828_v9  ;;  %v1275_v25 = vrot.slane %v828_v9, %v3653_v0  ;;  %v3899_v38 = vpop.f32.mrb[28].mxu1  ;;  %v3901_v41 = vpop.f32.mrb[29].mxu0  ;;  %v976_v8 = vrot.slane %v962_v60, %v3653_v0  ;;  %v977_v47 = vcombine.high %v969_v37, %v969_v37 }
 0x124   : > { %4518 = vst [vmem:[#allocation13_spill] sm:$0xff] %v3899_v38  ;;  %4519 = vst [vmem:[#allocation14_spill] sm:$0xff] %v3901_v41  ;;  %v3296_v4 = vrot.slane %v1267_v17, 9  ;;  %v3903_v45 = vmax.f32 %v1266_v44, %v3294_v21  ;;  %v3906_v35 = vpop.f32.mrb[29].mxu1  ;;  %v3908_v32 = vpop.f32.mrb[30].mxu0  ;;  %v3225_v27 = vrot.slane %v969_v37, 9  ;;  %v3916_v41 = vmax.f32 %v1265_v43, %v3295_v5 }
 0x125   : > { %4520 = vst [vmem:[#allocation15_spill] sm:$0xff] %v3906_v35  ;;  %4521 = vst [vmem:[#allocation16_spill] sm:$0xff] %v3908_v32  ;;  %v1282_v9 = vrot.slane %v1268_v56, %v3653_v0  ;;  %v3912_v33 = vpop.f32.mrb[30].mxu1  ;;  %v3914_v38 = vpop.f32.mrb[31].mxu0  ;;  %v1283_v39 = vcombine.high %v1275_v25, %v1275_v25  ;;  %v978_v32 = vcombine.high %v976_v8, %v976_v8  ;;  %v3226_v60 = vrot.slane %v977_v47, 9 }
 0x126   : > { %4522 = vst [vmem:[#allocation17_spill] sm:$0xff] %v3912_v33  ;;  %4523 = vst [vmem:[#allocation18_spill] sm:$0xff] %v3914_v38  ;;  %v3918_v44 = vmax.f32 %v1267_v17, %v3296_v4  ;;  %v3922_v21 = vpop.f32.mrb[31].mxu1  ;;  %v3227_v35 = vrot.slane %v976_v8, 9  ;;  %v2085_v3 = vmax.f32 %v969_v37, %v3225_v27  ;;  %v3297_v34 = vrot.slane %v1275_v25, 9 }
 0x127   : > { %4524 = vst [vmem:[#allocation19_spill] sm:$0xff] %v3922_v21  ;;  %v1284_v33 = vcombine.high %v1282_v9, %v1282_v9  ;;  %v3298_v38 = vrot.slane %v1283_v39, 9  ;;  %v3228_v5 = vrot.slane %v978_v32, 9  ;;  %v2086_v43 = vmax.f32 %v977_v47, %v3226_v60 }
 0x128   : > { %v2087_v4 = vmax.f32 %v976_v8, %v3227_v35  ;;  %v2436_v17 = vrot.slane %v2085_v3, %v3666_v11  ;;  %v3299_v19 = vrot.slane %v1282_v9, 9  ;;  %v2157_v18 = vmax.f32 %v1275_v25, %v3297_v34 }
 0x129   : > { %v3300_v13 = vrot.slane %v1284_v33, 9  ;;  %v2158_v48 = vmax.f32 %v1283_v39, %v3298_v38  ;;  %v2088_v14 = vmax.f32 %v978_v32, %v3228_v5  ;;  %v2440_v27 = vrot.slane %v2086_v43, %v3666_v11 }
 0x12a   : > { %v3927_v21 = vpop.f32.mrb[32].mxu0  ;;  %v2444_v37 = vrot.slane %v2087_v4, %v3666_v11  ;;  %v4525_v56 = vmax.f32 %v3674_v23, 0.0  ;;  %v2159_v47 = vmax.f32 %v1282_v9, %v3299_v19  ;;  %v2724_v3 = vrot.slane %v2157_v18, %v3666_v11 }
 0x12b   : > { %v3933_v7 = vpop.f32.mrb[32].mxu1  ;;  %v2160_v8 = vmax.f32 %v1284_v33, %v3300_v13  ;;  %v2728_v35 = vrot.slane %v2158_v48, %v3666_v11  ;;  %v3937_v34 = vpop.f32.mrb[33].mxu0  ;;  %v2448_v25 = vrot.slane %v2088_v14, %v3666_v11  ;;  %v2953_v38 = vsel %vm2929_vm1, %v2440_v27, %v2436_v17 }
 0x12c   : > { %v808_v20 = vmax.f32 %v4525_v56, %v742_v1  ;;  %v3942_v23 = vpop.f32.mrb[33].mxu1  ;;  %v2954_v1 = vsel %vm2931_vm2, %v2444_v37, %v2953_v38  ;;  %v2732_v19 = vrot.slane %v2159_v47, %v3666_v11  ;;  %v4526_v56 = vmax.f32 %v3678_v29, 0.0 }
 0x12d   : > { %v2736_v18 = vrot.slane %v2160_v8, %v3666_v11  ;;  %v3013_v48 = vsel %vm2929_vm1, %v2728_v35, %v2724_v3  ;;  %v2955_v33 = vsel %vm2933_vm3, %v2448_v25, %v2954_v1  ;;  %v495_v43 = vadd.f32 %v3645_v49, %v3732_v46 }
 0x12e   : > { %v928_v32 = vcombine.high %v808_v20, %v808_v20  ;;  %v935_v39 = vrot.slane %v808_v20, %v3653_v0  ;;  %v2716_v20 = vrot.slane %v3916_v41, %v3666_v11  ;;  %3083 = vst [vmem:[%s3754_s27 + $0x18] sm:$0xf] %v2955_v33  ;;  %v3014_v60 = vsel %vm2931_vm2, %v2732_v19, %v3013_v48 }
 0x12f   : > { %v826_v5 = vmax.f32 %v4526_v56, %v778_v36  ;;  %v3015_v4 = vsel %vm2933_vm3, %v2736_v18, %v3014_v60  ;;  %v745_v35 = vmax.f32 %v495_v43, 0.0  ;;  %v639_v29 = vadd.f32 %v3645_v49, %v3735_v51 }
 0x130   : > { %v942_v14 = vrot.slane %v928_v32, %v3653_v0  ;;  %v943_v9 = vcombine.high %v935_v39, %v935_v39  ;;  %v3217_v13 = vrot.slane %v935_v39, 9  ;;  %3095 = vst [vmem:[%s3754_s27 + $0x78] sm:$0xf] %v3015_v4  ;;  %v650_v43 = vadd.f32 %v3741_v57, %v3645_v49  ;;  %v3973_v4 = vpop.f32.mrb[34].mxu0 }
 0x131   : > { %v1234_v8 = vcombine.high %v826_v5, %v826_v5  ;;  %v1241_v3 = vrot.slane %v826_v5, %v3653_v0  ;;  %v781_v33 = vmax.f32 %v639_v29, 0.0  ;;  %v506_v5 = vadd.f32 %v3737_v52, %v3645_v49  ;;  %v3980_v29 = vpop.f32.mrb[35].mxu0 }
 0x132   : > { %v944_v17 = vcombine.high %v942_v14, %v942_v14  ;;  %v3218_v27 = vrot.slane %v943_v9, 9  ;;  %v3219_v37 = vrot.slane %v942_v14, 9  ;;  %v2077_v47 = vmax.f32 %v935_v39, %v3217_v13 }
 0x133   : > { %v1248_v46 = vrot.slane %v1234_v8, %v3653_v0  ;;  %v1249_v1 = vcombine.high %v1241_v3, %v1241_v3  ;;  %v3289_v19 = vrot.slane %v1241_v3, 9  ;;  %v4527_v52 = vrot.slane %v3831_v30, %v3666_v11 }
 0x134   : > { %v3220_v25 = vrot.slane %v944_v17, 9  ;;  %v2078_v38 = vmax.f32 %v943_v9, %v3218_v27  ;;  %v2079_v32 = vmax.f32 %v942_v14, %v3219_v37  ;;  %v2404_v36 = vrot.slane %v2077_v47, %v3666_v11 }
 0x135   : > { %v1250_v13 = vcombine.high %v1248_v46, %v1248_v46  ;;  %v3290_v60 = vrot.slane %v1249_v1, 9  ;;  %v3291_v56 = vrot.slane %v1248_v46, 9  ;;  %v2149_v9 = vmax.f32 %v1241_v3, %v3289_v19 }
 0x136   : > { %v2080_v18 = vmax.f32 %v944_v17, %v3220_v25  ;;  %v2408_v48 = vrot.slane %v2078_v38, %v3666_v11  ;;  %v2412_v39 = vrot.slane %v2079_v32, %v3666_v11  ;;  %v3975_v17 = vpop.f32.mrb[34].mxu1  ;;  %v748_v38 = vmax.f32 %v506_v5, 0.0 }
 0x137   : > { %v3292_v37 = vrot.slane %v1250_v13, 9  ;;  %v2150_v47 = vmax.f32 %v1249_v1, %v3290_v60  ;;  %v2151_v8 = vmax.f32 %v1248_v46, %v3291_v56  ;;  %v2692_v25 = vrot.slane %v2149_v9, %v3666_v11 }
 0x138   : > { %v2416_v14 = vrot.slane %v2080_v18, %v3666_v11  ;;  %v2946_v51 = vsel %vm2929_vm1, %v2408_v48, %v2404_v36  ;;  %v784_v32 = vmax.f32 %v650_v43, 0.0  ;;  %v2720_v46 = vrot.slane %v3918_v44, %v3666_v11 }
 0x139   : > { %v2947_v27 = vsel %vm2931_vm2, %v2412_v39, %v2946_v51  ;;  %v2152_v36 = vmax.f32 %v1250_v13, %v3292_v37  ;;  %v2696_v19 = vrot.slane %v2150_v47, %v3666_v11  ;;  %v2700_v1 = vrot.slane %v2151_v8, %v3666_v11 }
 0x13a   : > { %v2948_v3 = vsel %vm2933_vm3, %v2416_v14, %v2947_v27  ;;  %v4528_v18 = vrot.slane %v3842_v59, %v3666_v11  ;;  %v811_v39 = vmax.f32 %v745_v35, %v748_v38  ;;  %v829_v60 = vmax.f32 %v781_v33, %v784_v32 }
 0x13b   : > { %v2949_v57 = vsel %vm2935_vm4, %v4527_v52, %v2948_v3  ;;  %v4529_v30 = vrot.slane %v3834_v10, %v3666_v11  ;;  %v2704_v13 = vrot.slane %v2152_v36, %v3666_v11  ;;  %v3006_v9 = vsel %vm2929_vm1, %v2696_v19, %v2692_v25  ;;  %v4027_v52 = vpop.f32.mrb[35].mxu1 }
 0x13c   : > { %v2950_v48 = vsel %vm2937_vm5, %v4528_v18, %v2949_v57  ;;  %v4002_v14 = vadd.f32 %v3645_v49, %v3743_v58  ;;  %v4530_v59 = vrot.slane %v3859_v24, %v3666_v11  ;;  %v3007_v35 = vsel %vm2931_vm2, %v2700_v1, %v3006_v9 }
 0x13d   : > { %v2951_v56 = vsel %vm2939_vm6, %v4529_v30, %v2950_v48  ;;  %v979_v33 = vcombine.high %v811_v39, %v811_v39  ;;  %v986_v10 = vrot.slane %v811_v39, %v3653_v0  ;;  %v3008_v51 = vsel %vm2933_vm3, %v2704_v13, %v3007_v35 }
 0x13e   : > { %v2952_v44 = vsel %vm2941_vm7, %v4530_v59, %v2951_v56  ;;  %v1285_v5 = vcombine.high %v829_v60, %v829_v60  ;;  %v1292_v43 = vrot.slane %v829_v60, %v3653_v0  ;;  %v4015_v58 = vadd.f32 %v3645_v49, %v3745_v6 }
 0x13f   : > { %3082 = vst [vmem:[%s3754_s27 + $0x10] sm:$0xff] %v2952_v44  ;;  %v4531_v24 = vrot.slane %v3893_v26, %v3666_v11  ;;  %v993_v37 = vrot.slane %v979_v33, %v3653_v0  ;;  %v994_v47 = vcombine.high %v986_v10, %v986_v10  ;;  %v3229_v8 = vrot.slane %v986_v10, 9 }
 0x140   : > { %v4532_v3 = vrot.slane %v3903_v45, %v3666_v11  ;;  %v1299_v38 = vrot.slane %v1285_v5, %v3653_v0  ;;  %v1300_v32 = vcombine.high %v1292_v43, %v1292_v43  ;;  %v3301_v6 = vrot.slane %v1292_v43, 9 }
 0x141   : > { %v3009_v27 = vsel %vm2935_vm4, %v4531_v24, %v3008_v51  ;;  %v995_v57 = vcombine.high %v993_v37, %v993_v37  ;;  %v3230_v36 = vrot.slane %v994_v47, 9  ;;  %v3231_v19 = vrot.slane %v993_v37, 9 }
 0x142   : > { %v3010_v25 = vsel %vm2937_vm5, %v4532_v3, %v3009_v27  ;;  %v2089_v18 = vmax.f32 %v986_v10, %v3229_v8  ;;  %v1301_v45 = vcombine.high %v1299_v38, %v1299_v38  ;;  %v3302_v48 = vrot.slane %v1300_v32, 9 }
 0x143   : > { %v3011_v26 = vsel %vm2939_vm6, %v2716_v20, %v3010_v25  ;;  %v3232_v39 = vrot.slane %v995_v57, 9  ;;  %v2090_v60 = vmax.f32 %v994_v47, %v3230_v36  ;;  %v2091_v30 = vmax.f32 %v993_v37, %v3231_v19 }
 0x144   : > { %v3012_v1 = vsel %vm2941_vm7, %v2720_v46, %v3011_v26  ;;  %v3303_v56 = vrot.slane %v1299_v38, 9  ;;  %v2452_v13 = vrot.slane %v2089_v18, %v3666_v11  ;;  %v3304_v9 = vrot.slane %v1301_v45, 9 }
 0x145   : > { %3094 = vst [vmem:[%s3754_s27 + $0x70] sm:$0xff] %v3012_v1  ;;  %v2161_v59 = vmax.f32 %v1292_v43, %v3301_v6  ;;  %v2162_v41 = vmax.f32 %v1300_v32, %v3302_v48  ;;  %v2092_v44 = vmax.f32 %v995_v57, %v3232_v39  ;;  %v2456_v20 = vrot.slane %v2090_v60, %v3666_v11 }
 0x146   : > { %v2460_v35 = vrot.slane %v2091_v30, %v3666_v11  ;;  %v2163_v33 = vmax.f32 %v1299_v38, %v3303_v56  ;;  %v747_v46 = vmax.f32 %v3887_v16, 0.0  ;;  %v2164_v10 = vmax.f32 %v1301_v45, %v3304_v9 }
 0x147   : > { %v2740_v51 = vrot.slane %v2161_v59, %v3666_v11  ;;  %v2744_v5 = vrot.slane %v2162_v41, %v3666_v11  ;;  %v783_v24 = vmax.f32 %v3891_v15, 0.0  ;;  %v2464_v27 = vrot.slane %v2092_v44, %v3666_v11 }
 0x148   : > { %v2956_v43 = vsel %vm2929_vm1, %v2456_v20, %v2452_v13  ;;  %v2748_v37 = vrot.slane %v2163_v33, %v3666_v11  ;;  %v2752_v8 = vrot.slane %v2164_v10, %v3666_v11  ;;  %v746_v16 = vmax.f32 %v4002_v14, 0.0 }
 0x149   : > { %v2957_v47 = vsel %vm2931_vm2, %v2460_v35, %v2956_v43  ;;  %v3016_v3 = vsel %vm2929_vm1, %v2744_v5, %v2740_v51  ;;  %v782_v38 = vmax.f32 %v4015_v58, 0.0  ;;  %v4053_v15 = vadd.f32 %v3763_v40, %v3645_v49 }
 0x14a   : > { %v3017_v25 = vsel %vm2931_vm2, %v2748_v37, %v3016_v3  ;;  %v511_v32 = vadd.f32 %v3645_v49, %v3770_v62  ;;  %v4059_v6 = vadd.f32 %v3768_v31, %v3645_v49  ;;  %v2958_v26 = vsel %vm2933_vm3, %v2464_v27, %v2957_v47 }
 0x14b   : > { %v655_v14 = vadd.f32 %v3645_v49, %v3779_v28  ;;  %v522_v57 = vadd.f32 %v3781_v50, %v3645_v49  ;;  %v666_v40 = vadd.f32 %v3785_v61, %v3645_v49  ;;  %v514_v36 = vadd.f32 %v3645_v49, %v3787_v63 }
 0x14c   : > { %v749_v58 = vmax.f32 %v511_v32, 0.0  ;;  %v658_v62 = vadd.f32 %v3645_v49, %v3791_v2  ;;  %v3018_v19 = vsel %vm2933_vm3, %v2752_v8, %v3017_v25  ;;  %v535_v1 = vadd.f32 %v3798_v42, %v3645_v49 }
 0x14d   : > { %v785_v31 = vmax.f32 %v655_v14, 0.0  ;;  %v679_v28 = vadd.f32 %v3802_v22, %v3645_v49  ;;  %v752_v18 = vmax.f32 %v522_v57, 0.0  ;;  %v750_v45 = vmax.f32 %v514_v36, 0.0 }
 0x14e   : > { %v812_v50 = vmax.f32 %v746_v16, %v749_v58  ;;  %v786_v48 = vmax.f32 %v658_v62, 0.0  ;;  %v788_v39 = vmax.f32 %v666_v40, 0.0  ;;  %v755_v60 = vmax.f32 %v535_v1, 0.0 }
 0x14f   : > { %v830_v61 = vmax.f32 %v782_v38, %v785_v31  ;;  %v791_v63 = vmax.f32 %v679_v28, 0.0  ;;  %v813_v56 = vmax.f32 %v747_v46, %v750_v45 }
 0x150   : > { %v996_v30 = vcombine.high %v812_v50, %v812_v50  ;;  %v1003_v2 = vrot.slane %v812_v50, %v3653_v0  ;;  %v831_v13 = vmax.f32 %v783_v24, %v786_v48  ;;  %v4079_v42 = vmax.f32 %v752_v18, %v755_v60 }
 0x151   : > { %v1302_v9 = vcombine.high %v830_v61, %v830_v61  ;;  %v1309_v59 = vrot.slane %v830_v61, %v3653_v0  ;;  %v4081_v41 = vmax.f32 %v788_v39, %v791_v63  ;;  %v1013_v20 = vcombine.high %v813_v56, %v813_v56 }
 0x152   : > { %v1010_v49 = vrot.slane %v996_v30, %v3653_v0  ;;  %v1011_v22 = vcombine.high %v1003_v2, %v1003_v2  ;;  %v3233_v44 = vrot.slane %v1003_v2, 9  ;;  %v1020_v51 = vrot.slane %v813_v56, %v3653_v0 }
 0x153   : > { %v1316_v35 = vrot.slane %v1302_v9, %v3653_v0  ;;  %v1317_v33 = vcombine.high %v1309_v59, %v1309_v59  ;;  %v3305_v10 = vrot.slane %v1309_v59, 9  ;;  %v1027_v61 = vrot.slane %v1013_v20, %v3653_v0 }
 0x154   : > { %v1012_v46 = vcombine.high %v1010_v49, %v1010_v49  ;;  %v3234_v5 = vrot.slane %v1011_v22, 9  ;;  %v3235_v24 = vrot.slane %v1010_v49, 9  ;;  %v2093_v27 = vmax.f32 %v1003_v2, %v3233_v44 }
 0x155   : > { %v1318_v43 = vcombine.high %v1316_v35, %v1316_v35  ;;  %v3306_v37 = vrot.slane %v1317_v33, 9  ;;  %v3307_v47 = vrot.slane %v1316_v35, 9  ;;  %v2165_v8 = vmax.f32 %v1309_v59, %v3305_v10 }
 0x156   : > { %v3236_v3 = vrot.slane %v1012_v46, 9  ;;  %v2094_v16 = vmax.f32 %v1011_v22, %v3234_v5  ;;  %v2095_v25 = vmax.f32 %v1010_v49, %v3235_v24  ;;  %v2468_v38 = vrot.slane %v2093_v27, %v3666_v11 }
 0x157   : > { %v3308_v32 = vrot.slane %v1318_v43, 9  ;;  %v2166_v14 = vmax.f32 %v1317_v33, %v3306_v37  ;;  %v2167_v57 = vmax.f32 %v1316_v35, %v3307_v47  ;;  %v2756_v58 = vrot.slane %v2165_v8, %v3666_v11 }
 0x158   : > { %v2096_v40 = vmax.f32 %v1012_v46, %v3236_v3  ;;  %v2472_v36 = vrot.slane %v2094_v16, %v3666_v11  ;;  %v2476_v62 = vrot.slane %v2095_v25, %v3666_v11  ;;  %v2959_v31 = vsel %vm2935_vm4, %v2468_v38, %v2958_v26 }
 0x159   : > { %v2168_v1 = vmax.f32 %v1318_v43, %v3308_v32  ;;  %v2760_v28 = vrot.slane %v2166_v14, %v3666_v11  ;;  %v2764_v50 = vrot.slane %v2167_v57, %v3666_v11  ;;  %v3019_v18 = vsel %vm2935_vm4, %v2756_v58, %v3018_v19 }
 0x15a   : > { %v2480_v45 = vrot.slane %v2096_v40, %v3666_v11  ;;  %v2960_v48 = vsel %vm2937_vm5, %v2472_v36, %v2959_v31  ;;  %v1028_v39 = vcombine.high %v1020_v51, %v1020_v51  ;;  %v3237_v30 = vrot.slane %v1020_v51, 9 }
 0x15b   : > { %v2961_v60 = vsel %vm2939_vm6, %v2476_v62, %v2960_v48  ;;  %v2768_v26 = vrot.slane %v2168_v1, %v3666_v11  ;;  %v3020_v63 = vsel %vm2937_vm5, %v2760_v28, %v3019_v18  ;;  %v1029_v19 = vcombine.high %v1027_v61, %v1027_v61 }
 0x15c   : > { %v2962_v2 = vsel %vm2941_vm7, %v2480_v45, %v2961_v60  ;;  %v3021_v56 = vsel %vm2939_vm6, %v2764_v50, %v3020_v63  ;;  %v3238_v9 = vrot.slane %v1028_v39, 9  ;;  %v3239_v49 = vrot.slane %v1027_v61, 9 }
 0x15d   : > { %3084 = vst [vmem:[%s3754_s27 + $0x20] sm:$0xff] %v2962_v2  ;;  %v3022_v59 = vsel %vm2941_vm7, %v2768_v26, %v3021_v56  ;;  %v2097_v22 = vmax.f32 %v1020_v51, %v3237_v30  ;;  %v1319_v44 = vcombine.high %v831_v13, %v831_v13  ;;  %v3240_v20 = vrot.slane %v1029_v19, 9  ;;  %v4133_v2 = vld [vmem:[%s4505_s2] ss:$0 sm:$0xff] }
 0x15e   : > { %3096 = vst [vmem:[%s3754_s27 + $0x80] sm:$0xff] %v3022_v59  ;;  %v2098_v35 = vmax.f32 %v1028_v39, %v3238_v9  ;;  %v1326_v33 = vrot.slane %v831_v13, %v3653_v0  ;;  %v1047_v10 = vcombine.high %v4079_v42, %v4079_v42  ;;  %v2099_v46 = vmax.f32 %v1027_v61, %v3239_v49 }
 0x15f   : > { %v2484_v5 = vrot.slane %v2097_v22, %v3666_v11  ;;  %v1333_v24 = vrot.slane %v1319_v44, %v3653_v0  ;;  %v1054_v27 = vrot.slane %v4079_v42, %v3653_v0  ;;  %v2100_v43 = vmax.f32 %v1029_v19, %v3240_v20 }
 0x160   : > { %v2488_v51 = vrot.slane %v2098_v35, %v3666_v11  ;;  %v1334_v37 = vcombine.high %v1326_v33, %v1326_v33  ;;  %v3309_v47 = vrot.slane %v1326_v33, 9  ;;  %v2492_v8 = vrot.slane %v2099_v46, %v3666_v11 }
 0x161   : > { %v1335_v13 = vcombine.high %v1333_v24, %v1333_v24  ;;  %v3311_v3 = vrot.slane %v1333_v24, 9  ;;  %v1061_v16 = vrot.slane %v1047_v10, %v3653_v0  ;;  %v2496_v25 = vrot.slane %v2100_v43, %v3666_v11 }
 0x162   : > { %v2963_v38 = vsel %vm2929_vm1, %v2488_v51, %v2484_v5  ;;  %v3310_v32 = vrot.slane %v1334_v37, 9  ;;  %v2169_v14 = vmax.f32 %v1326_v33, %v3309_v47  ;;  %v1062_v40 = vcombine.high %v1054_v27, %v1054_v27 }
 0x163   : > { %v2964_v42 = vsel %vm2931_vm2, %v2492_v8, %v2963_v38  ;;  %v3312_v57 = vrot.slane %v1335_v13, 9  ;;  %v2171_v58 = vmax.f32 %v1333_v24, %v3311_v3  ;;  %v1063_v1 = vcombine.high %v1061_v16, %v1061_v16  ;;  %v4533_v3 = vld [vmem:[#allocation2_spill] sm:$0xff] }
 0x164   : > { %v2965_v36 = vsel %vm2933_vm3, %v2496_v25, %v2964_v42  ;;  %v2170_v62 = vmax.f32 %v1334_v37, %v3310_v32  ;;  %v2772_v31 = vrot.slane %v2169_v14, %v3666_v11  ;;  %v3245_v18 = vrot.slane %v1054_v27, 9 }
 0x165   : > { %3085 = vst [vmem:[%s3754_s27 + $0x28] sm:$0xf] %v2965_v36  ;;  %v2172_v28 = vmax.f32 %v1335_v13, %v3312_v57  ;;  %v2780_v50 = vrot.slane %v2171_v58, %v3666_v11  ;;  %v3246_v45 = vrot.slane %v1062_v40, 9  ;;  %v3247_v61 = vrot.slane %v1061_v16, 9  ;;  %v4534_v36 = vld [vmem:[#allocation3_spill] sm:$0xff] }
 0x166   : > { %v2776_v48 = vrot.slane %v2170_v62, %v3666_v11  ;;  %v3248_v39 = vrot.slane %v1063_v1, 9  ;;  %v1353_v60 = vcombine.high %v4081_v41, %v4081_v41  ;;  %v4126_v63 = vmax.f32 %v1054_v27, %v3245_v18 }
 0x167   : > { %v2784_v26 = vrot.slane %v2172_v28, %v3666_v11  ;;  %v1360_v30 = vrot.slane %v4081_v41, %v3653_v0  ;;  %v527_v56 = vadd.f32 %v4133_v2, %v3804_v12  ;;  %v751_v19 = vmax.f32 %v4053_v15, 0.0 }
 0x168   : > { %v787_v9 = vmax.f32 %v4059_v6, 0.0  ;;  %v3023_v59 = vsel %vm2929_vm1, %v2776_v48, %v2772_v31  ;;  %v1367_v49 = vrot.slane %v1353_v60, %v3653_v0  ;;  %v4142_v44 = vmax.f32 %v1062_v40, %v3246_v45 }
 0x169   : > { %v3024_v22 = vsel %vm2931_vm2, %v2780_v50, %v3023_v59  ;;  %v4144_v41 = vmax.f32 %v1061_v16, %v3247_v61  ;;  %v1368_v20 = vcombine.high %v1360_v30, %v1360_v30  ;;  %v4147_v33 = vmax.f32 %v1063_v1, %v3248_v39 }
 0x16a   : > { %v3025_v35 = vsel %vm2933_vm3, %v2784_v26, %v3024_v22  ;;  %v2516_v12 = vrot.slane %v4126_v63, %v3666_v11  ;;  %v1369_v15 = vcombine.high %v1367_v49, %v1367_v49  ;;  %v3317_v10 = vrot.slane %v1360_v30, 9 }
 0x16b   : > { %3097 = vst [vmem:[%s3754_s27 + $0x88] sm:$0xf] %v3025_v35  ;;  %v3318_v46 = vrot.slane %v1368_v20, 9  ;;  %v3319_v5 = vrot.slane %v1367_v49, 9  ;;  %v753_v24 = vmax.f32 %v527_v56, 0.0  ;;  %v671_v43 = vadd.f32 %v4133_v2, %v3807_v53 }
 0x16c   : > { %v3320_v27 = vrot.slane %v1369_v15, 9  ;;  %v538_v51 = vadd.f32 %v4133_v2, %v3809_v55  ;;  %v682_v37 = vadd.f32 %v4133_v2, %v3815_v54  ;;  %v4158_v47 = vmax.f32 %v1360_v30, %v3317_v10  ;;  %v4535_v30 = vld [vmem:[#allocation6_spill] sm:$0xff] }
 0x16d   : > { %v4160_v8 = vmax.f32 %v1368_v20, %v3318_v46  ;;  %v4162_v13 = vmax.f32 %v1367_v49, %v3319_v5  ;;  %v530_v16 = vadd.f32 %v4133_v2, %v4533_v3  ;;  %v789_v38 = vmax.f32 %v671_v43, 0.0 }
 0x16e   : > { %v4166_v25 = vmax.f32 %v1369_v15, %v3320_v27  ;;  %v756_v32 = vmax.f32 %v538_v51, 0.0  ;;  %v792_v53 = vmax.f32 %v682_v37, 0.0  ;;  %v2520_v55 = vrot.slane %v4142_v44, %v3666_v11 }
 0x16f   : > { %v2524_v54 = vrot.slane %v4144_v41, %v3666_v11  ;;  %v2528_v14 = vrot.slane %v4147_v33, %v3666_v11  ;;  %v754_v42 = vmax.f32 %v530_v16, 0.0  ;;  %v2804_v57 = vrot.slane %v4158_v47, %v3666_v11 }
 0x170   : > { %v816_v58 = vmax.f32 %v753_v24, %v756_v32  ;;  %v834_v40 = vmax.f32 %v789_v38, %v792_v53  ;;  %v674_v62 = vadd.f32 %v4133_v2, %v4534_v36  ;;  %v2808_v31 = vrot.slane %v4160_v8, %v3666_v11 }
 0x171   : > { %v2812_v1 = vrot.slane %v4162_v13, %v3666_v11  ;;  %v2816_v28 = vrot.slane %v4166_v25, %v3666_v11  ;;  %v814_v50 = vmax.f32 %v751_v19, %v754_v42  ;;  %v4189_v56 = vadd.f32 %v4133_v2, %v4535_v30 }
 0x172   : > { %v1064_v18 = vcombine.high %v816_v58, %v816_v58  ;;  %v1071_v45 = vrot.slane %v816_v58, %v3653_v0  ;;  %v1370_v48 = vcombine.high %v834_v40, %v834_v40  ;;  %v1377_v61 = vrot.slane %v834_v40, %v3653_v0 }
 0x173   : > { %v1030_v39 = vcombine.high %v814_v50, %v814_v50  ;;  %v1037_v60 = vrot.slane %v814_v50, %v3653_v0  ;;  %v790_v26 = vmax.f32 %v674_v62, 0.0 }
 0x174   : > { %v1078_v59 = vrot.slane %v1064_v18, %v3653_v0  ;;  %v1079_v49 = vcombine.high %v1071_v45, %v1071_v45  ;;  %v3249_v22 = vrot.slane %v1071_v45, 9  ;;  %v1384_v19 = vrot.slane %v1370_v48, %v3653_v0 }
 0x175   : > { %v1385_v20 = vcombine.high %v1377_v61, %v1377_v61  ;;  %v3321_v35 = vrot.slane %v1377_v61, 9  ;;  %v1044_v15 = vrot.slane %v1030_v39, %v3653_v0  ;;  %v1045_v10 = vcombine.high %v1037_v60, %v1037_v60 }
 0x176   : > { %v1080_v46 = vcombine.high %v1078_v59, %v1078_v59  ;;  %v3250_v5 = vrot.slane %v1079_v49, 9  ;;  %v3251_v24 = vrot.slane %v1078_v59, 9  ;;  %v2109_v27 = vmax.f32 %v1071_v45, %v3249_v22 }
 0x177   : > { %v1386_v43 = vcombine.high %v1384_v19, %v1384_v19  ;;  %v3322_v51 = vrot.slane %v1385_v20, 9  ;;  %v3323_v37 = vrot.slane %v1384_v19, 9  ;;  %v2181_v3 = vmax.f32 %v1377_v61, %v3321_v35 }
 0x178   : > { %v3252_v16 = vrot.slane %v1080_v46, 9  ;;  %v2110_v38 = vmax.f32 %v1079_v49, %v3250_v5  ;;  %v2111_v32 = vmax.f32 %v1078_v59, %v3251_v24  ;;  %v2532_v53 = vrot.slane %v2109_v27, %v3666_v11 }
 0x179   : > { %v3324_v42 = vrot.slane %v1386_v43, 9  ;;  %v2182_v58 = vmax.f32 %v1385_v20, %v3322_v51  ;;  %v2183_v40 = vmax.f32 %v1384_v19, %v3323_v37  ;;  %v2820_v36 = vrot.slane %v2181_v3, %v3666_v11 }
 0x17a   : > { %v2112_v62 = vmax.f32 %v1080_v46, %v3252_v16  ;;  %v2536_v50 = vrot.slane %v2110_v38, %v3666_v11  ;;  %v2540_v18 = vrot.slane %v2111_v32, %v3666_v11  ;;  %v1046_v45 = vcombine.high %v1044_v15, %v1044_v15 }
 0x17b   : > { %v2184_v48 = vmax.f32 %v1386_v43, %v3324_v42  ;;  %v2824_v61 = vrot.slane %v2182_v58, %v3666_v11  ;;  %v2828_v39 = vrot.slane %v2183_v40, %v3666_v11  ;;  %v3241_v30 = vrot.slane %v1037_v60, 9  ;;  %v4536_v42 = vld [vmem:[#allocation4_spill] sm:$0xff] }
 0x17c   : > { %v2544_v59 = vrot.slane %v2112_v62, %v3666_v11  ;;  %v2973_v49 = vsel %vm2929_vm1, %v2536_v50, %v2532_v53  ;;  %v3242_v22 = vrot.slane %v1045_v10, 9  ;;  %v3243_v19 = vrot.slane %v1044_v15, 9  ;;  %v4538_v62 = vld [vmem:[#allocation8_spill] sm:$0xff] }
 0x17d   : > { %v2974_v20 = vsel %vm2931_vm2, %v2540_v18, %v2973_v49  ;;  %v2832_v35 = vrot.slane %v2184_v48, %v3666_v11  ;;  %v3033_v46 = vsel %vm2929_vm1, %v2824_v61, %v2820_v36  ;;  %v3244_v5 = vrot.slane %v1046_v45, 9  ;;  %v4539_v18 = vld [vmem:[#allocation9_spill] sm:$0xff] }
 0x17e   : > { %v2975_v24 = vsel %vm2933_vm3, %v2544_v59, %v2974_v20  ;;  %v3034_v27 = vsel %vm2931_vm2, %v2828_v39, %v3033_v46  ;;  %v2101_v43 = vmax.f32 %v1037_v60, %v3241_v30  ;;  %v2102_v51 = vmax.f32 %v1045_v10, %v3242_v22 }
 0x17f   : > { %3087 = vst [vmem:[%s3754_s27 + $0x38] sm:$0xf] %v2975_v24  ;;  %v3035_v37 = vsel %vm2933_vm3, %v2832_v35, %v3034_v27  ;;  %v2103_v3 = vmax.f32 %v1044_v15, %v3243_v19  ;;  %v2104_v16 = vmax.f32 %v1046_v45, %v3244_v5  ;;  %v832_v38 = vmax.f32 %v787_v9, %v790_v26  ;;  %v4537_v9 = vld [vmem:[#allocation7_spill] sm:$0xff] }
 0x180   : > { %3099 = vst [vmem:[%s3754_s27 + $0x98] sm:$0xf] %v3035_v37  ;;  %v2500_v32 = vrot.slane %v2101_v43, %v3666_v11  ;;  %v2504_v53 = vrot.slane %v2102_v51, %v3666_v11  ;;  %v4216_v58 = vadd.f32 %v4133_v2, %v4536_v42  ;;  %v757_v60 = vmax.f32 %v4189_v56, 0.0 }
 0x181   : > { %v2508_v10 = vrot.slane %v2103_v3, %v3666_v11  ;;  %v2512_v40 = vrot.slane %v2104_v16, %v3666_v11  ;;  %v1336_v15 = vcombine.high %v832_v38, %v832_v38  ;;  %v1343_v36 = vrot.slane %v832_v38, %v3653_v0 }
 0x182   : > { %v2966_v6 = vsel %vm2929_vm1, %v2504_v53, %v2500_v32  ;;  %v687_v26 = vadd.f32 %v4133_v2, %v4537_v9  ;;  %v554_v50 = vadd.f32 %v4133_v2, %v4538_v62  ;;  %v698_v45 = vadd.f32 %v4133_v2, %v4539_v18 }
 0x183   : > { %v2967_v56 = vsel %vm2931_vm2, %v2508_v10, %v2966_v6  ;;  %v1350_v48 = vrot.slane %v1336_v15, %v3653_v0  ;;  %v1351_v61 = vcombine.high %v1343_v36, %v1343_v36  ;;  %v3313_v39 = vrot.slane %v1343_v36, 9 }
 0x184   : > { %v2968_v30 = vsel %vm2933_vm3, %v2512_v40, %v2967_v56  ;;  %v793_v59 = vmax.f32 %v687_v26, 0.0  ;;  %v760_v49 = vmax.f32 %v554_v50, 0.0  ;;  %v796_v22 = vmax.f32 %v698_v45, 0.0  ;;  %v4540_v40 = vld [vmem:[#allocation5_spill] sm:$0xff] }
 0x185   : > { %v2969_v19 = vsel %vm2935_vm4, %v2516_v12, %v2968_v30  ;;  %v1352_v20 = vcombine.high %v1350_v48, %v1350_v48  ;;  %v3314_v35 = vrot.slane %v1351_v61, 9  ;;  %v3315_v46 = vrot.slane %v1350_v48, 9 }
 0x186   : > { %v2970_v5 = vsel %vm2937_vm5, %v2520_v55, %v2969_v19  ;;  %v2173_v24 = vmax.f32 %v1343_v36, %v3313_v39  ;;  %v817_v27 = vmax.f32 %v757_v60, %v760_v49  ;;  %v835_v43 = vmax.f32 %v793_v59, %v796_v22 }
 0x187   : > { %v2971_v51 = vsel %vm2939_vm6, %v2524_v54, %v2970_v5  ;;  %v3316_v63 = vrot.slane %v1352_v20, 9  ;;  %v2174_v37 = vmax.f32 %v1351_v61, %v3314_v35  ;;  %v2175_v12 = vmax.f32 %v1350_v48, %v3315_v46 }
 0x188   : > { %v2972_v3 = vsel %vm2941_vm7, %v2528_v14, %v2971_v51  ;;  %v2788_v44 = vrot.slane %v2173_v24, %v3666_v11  ;;  %v1081_v16 = vcombine.high %v817_v27, %v817_v27  ;;  %v1088_v55 = vrot.slane %v817_v27, %v3653_v0 }
 0x189   : > { %3086 = vst [vmem:[%s3754_s27 + $0x30] sm:$0xff] %v2972_v3  ;;  %v2176_v38 = vmax.f32 %v1352_v20, %v3316_v63  ;;  %v2792_v32 = vrot.slane %v2174_v37, %v3666_v11  ;;  %v2796_v41 = vrot.slane %v2175_v12, %v3666_v11  ;;  %v1387_v54 = vcombine.high %v835_v43, %v835_v43  ;;  %v4542_v12 = vld [vmem:[#allocation11_spill] sm:$0xff] }
 0x18a   : > { %v1095_v53 = vrot.slane %v1081_v16, %v3653_v0  ;;  %v1096_v42 = vcombine.high %v1088_v55, %v1088_v55  ;;  %v3253_v60 = vrot.slane %v1088_v55, 9  ;;  %v1394_v33 = vrot.slane %v835_v43, %v3653_v0 }
 0x18b   : > { %v2800_v14 = vrot.slane %v2176_v38, %v3666_v11  ;;  %v3026_v10 = vsel %vm2929_vm1, %v2792_v32, %v2788_v44  ;;  %v4259_v15 = vadd.f32 %v4133_v2, %v4540_v40  ;;  %v1401_v36 = vrot.slane %v1387_v54, %v3653_v0  ;;  %v4543_v38 = vld [vmem:[#allocation14_spill] sm:$0xff] }
 0x18c   : > { %v3027_v6 = vsel %vm2931_vm2, %v2796_v41, %v3026_v10  ;;  %v1097_v9 = vcombine.high %v1095_v53, %v1095_v53  ;;  %v3254_v26 = vrot.slane %v1096_v42, 9  ;;  %v3255_v62 = vrot.slane %v1095_v53, 9  ;;  %v4545_v10 = vld [vmem:[#allocation16_spill] sm:$0xff] }
 0x18d   : > { %v3028_v50 = vsel %vm2933_vm3, %v2800_v14, %v3027_v6  ;;  %v2113_v18 = vmax.f32 %v1088_v55, %v3253_v60  ;;  %v1402_v45 = vcombine.high %v1394_v33, %v1394_v33  ;;  %v1403_v56 = vcombine.high %v1401_v36, %v1401_v36  ;;  %v4544_v14 = vld [vmem:[#allocation15_spill] sm:$0xff]  ;;  %v4546_v6 = vld [vmem:[#allocation17_spill] sm:$0xff] }
 0x18e   : > { %v3029_v48 = vsel %vm2935_vm4, %v2804_v57, %v3028_v50  ;;  %v3256_v61 = vrot.slane %v1097_v9, 9  ;;  %v2114_v39 = vmax.f32 %v1096_v42, %v3254_v26  ;;  %v2115_v30 = vmax.f32 %v1095_v53, %v3255_v62  ;;  %v4548_v62 = vld [vmem:[#allocation19_spill] sm:$0xff] }
 0x18f   : > { %v3030_v59 = vsel %vm2937_vm5, %v2808_v31, %v3029_v48  ;;  %v2548_v49 = vrot.slane %v2113_v18, %v3666_v11  ;;  %v3325_v22 = vrot.slane %v1394_v33, 9  ;;  %v3326_v19 = vrot.slane %v1402_v45, 9 }
 0x190   : > { %v3031_v47 = vsel %vm2939_vm6, %v2812_v1, %v3030_v59  ;;  %v2116_v20 = vmax.f32 %v1097_v9, %v3256_v61  ;;  %v2552_v57 = vrot.slane %v2114_v39, %v3666_v11  ;;  %v2556_v35 = vrot.slane %v2115_v30, %v3666_v11  ;;  %v4541_v1 = vld [vmem:[#allocation10_spill] sm:$0xff] }
 0x191   : > { %v3032_v8 = vsel %vm2941_vm7, %v2816_v28, %v3031_v47  ;;  %v3327_v31 = vrot.slane %v1401_v36, 9  ;;  %v3328_v46 = vrot.slane %v1403_v56, 9  ;;  %v2185_v5 = vmax.f32 %v1394_v33, %v3325_v22 }
 0x192   : > { %3098 = vst [vmem:[%s3754_s27 + $0x90] sm:$0xff] %v3032_v8  ;;  %v2560_v24 = vrot.slane %v2116_v20, %v3666_v11  ;;  %v2976_v13 = vsel %vm2929_vm1, %v2552_v57, %v2548_v49  ;;  %v2186_v27 = vmax.f32 %v1402_v45, %v3326_v19  ;;  %v546_v43 = vadd.f32 %v4133_v2, %v4541_v1 }
 0x193   : > { %v2977_v51 = vsel %vm2931_vm2, %v2556_v35, %v2976_v13  ;;  %v2187_v63 = vmax.f32 %v1401_v36, %v3327_v31  ;;  %v2188_v37 = vmax.f32 %v1403_v56, %v3328_v46  ;;  %v2836_v25 = vrot.slane %v2185_v5, %v3666_v11 }
 0x194   : > { %v2840_v28 = vrot.slane %v2186_v27, %v3666_v11  ;;  %v690_v3 = vadd.f32 %v4133_v2, %v4542_v12  ;;  %v759_v44 = vmax.f32 %v4216_v58, 0.0  ;;  %v559_v32 = vadd.f32 %v4133_v2, %v4543_v38 }
 0x195   : > { %v2844_v16 = vrot.slane %v2187_v63, %v3666_v11  ;;  %v2848_v55 = vrot.slane %v2188_v37, %v3666_v11  ;;  %v795_v41 = vmax.f32 %v4259_v15, 0.0  ;;  %v758_v53 = vmax.f32 %v546_v43, 0.0  ;;  %v4547_v15 = vld [vmem:[#allocation18_spill] sm:$0xff] }
 0x196   : > { %v3036_v54 = vsel %vm2929_vm1, %v2840_v28, %v2836_v25  ;;  %v2978_v42 = vsel %vm2933_vm3, %v2560_v24, %v2977_v51  ;;  %v761_v33 = vmax.f32 %v559_v32, 0.0  ;;  %v703_v58 = vadd.f32 %v4133_v2, %v4544_v14 }
 0x197   : > { %v3037_v60 = vsel %vm2931_vm2, %v2844_v16, %v3036_v54  ;;  %v4306_v40 = vadd.f32 %v4133_v2, %v4545_v10  ;;  %v794_v36 = vmax.f32 %v690_v3, 0.0  ;;  %v4310_v9 = vadd.f32 %v4133_v2, %v4546_v6 }
 0x198   : > { %v562_v26 = vadd.f32 %v4133_v2, %v4547_v15  ;;  %v706_v50 = vadd.f32 %v4133_v2, %v4548_v62  ;;  %v818_v18 = vmax.f32 %v758_v53, %v761_v33  ;;  %v797_v45 = vmax.f32 %v703_v58, 0.0 }
 0x199   : > { %v3038_v56 = vsel %vm2933_vm3, %v2848_v55, %v3037_v60  ;;  %v4319_v48 = vadd.f32 %v4133_v2, %v3927_v21  ;;  %v764_v61 = vmax.f32 %v4306_v40, 0.0  ;;  %v4324_v59 = vadd.f32 %v4133_v2, %v3933_v7 }
 0x19a   : > { %v762_v39 = vmax.f32 %v562_v26, 0.0  ;;  %v798_v30 = vmax.f32 %v706_v50, 0.0  ;;  %v1098_v49 = vcombine.high %v818_v18, %v818_v18  ;;  %v1105_v22 = vrot.slane %v818_v18, %v3653_v0 }
 0x19b   : > { %v836_v19 = vmax.f32 %v794_v36, %v797_v45  ;;  %v800_v47 = vmax.f32 %v4310_v9, 0.0  ;;  %v767_v35 = vmax.f32 %v4319_v48, 0.0  ;;  %v803_v21 = vmax.f32 %v4324_v59, 0.0 }
 0x19c   : > { %v819_v20 = vmax.f32 %v759_v44, %v762_v39  ;;  %v837_v57 = vmax.f32 %v795_v41, %v798_v30  ;;  %v1112_v8 = vrot.slane %v1098_v49, %v3653_v0  ;;  %v1113_v31 = vcombine.high %v1105_v22, %v1105_v22 }
 0x19d   : > { %v3257_v46 = vrot.slane %v1105_v22, 9  ;;  %v1404_v5 = vcombine.high %v836_v19, %v836_v19  ;;  %v1411_v7 = vrot.slane %v836_v19, %v3653_v0 }
 0x19e   : > { %v1115_v24 = vcombine.high %v819_v20, %v819_v20  ;;  %v1122_v13 = vrot.slane %v819_v20, %v3653_v0  ;;  %v1421_v27 = vcombine.high %v837_v57, %v837_v57  ;;  %v1114_v1 = vcombine.high %v1112_v8, %v1112_v8 }
 0x19f   : > { %v3258_v43 = vrot.slane %v1113_v31, 9  ;;  %v3259_v51 = vrot.slane %v1112_v8, 9  ;;  %v2117_v63 = vmax.f32 %v1105_v22, %v3257_v46  ;;  %v1418_v37 = vrot.slane %v1404_v5, %v3653_v0 }
 0x1a0   : > { %v1419_v25 = vcombine.high %v1411_v7, %v1411_v7  ;;  %v3329_v28 = vrot.slane %v1411_v7, 9  ;;  %v1129_v12 = vrot.slane %v1115_v24, %v3653_v0  ;;  %v3260_v3 = vrot.slane %v1114_v1, 9 }
 0x1a1   : > { %v2118_v44 = vmax.f32 %v1113_v31, %v3258_v43  ;;  %v2119_v16 = vmax.f32 %v1112_v8, %v3259_v51  ;;  %v2564_v55 = vrot.slane %v2117_v63, %v3666_v11  ;;  %v1420_v38 = vcombine.high %v1418_v37, %v1418_v37 }
 0x1a2   : > { %v3330_v32 = vrot.slane %v1419_v25, 9  ;;  %v3331_v41 = vrot.slane %v1418_v37, 9  ;;  %v2189_v54 = vmax.f32 %v1411_v7, %v3329_v28  ;;  %v2120_v53 = vmax.f32 %v1114_v1, %v3260_v3 }
 0x1a3   : > { %v2568_v60 = vrot.slane %v2118_v44, %v3666_v11  ;;  %v2572_v33 = vrot.slane %v2119_v16, %v3666_v11  ;;  %v2979_v14 = vsel %vm2935_vm4, %v2564_v55, %v2978_v42  ;;  %v3332_v58 = vrot.slane %v1420_v38, 9 }
 0x1a4   : > { %v2190_v10 = vmax.f32 %v1419_v25, %v3330_v32  ;;  %v2191_v36 = vmax.f32 %v1418_v37, %v3331_v41  ;;  %v2852_v6 = vrot.slane %v2189_v54, %v3666_v11  ;;  %v2576_v15 = vrot.slane %v2120_v53, %v3666_v11 }
 0x1a5   : > { %v2980_v26 = vsel %vm2937_vm5, %v2568_v60, %v2979_v14  ;;  %v1130_v62 = vcombine.high %v1122_v13, %v1122_v13  ;;  %v1131_v50 = vcombine.high %v1129_v12, %v1129_v12  ;;  %v2192_v45 = vmax.f32 %v1420_v38, %v3332_v58 }
 0x1a6   : > { %v2981_v18 = vsel %vm2939_vm6, %v2572_v33, %v2980_v26  ;;  %v2856_v39 = vrot.slane %v2190_v10, %v3666_v11  ;;  %v2860_v30 = vrot.slane %v2191_v36, %v3666_v11  ;;  %v3039_v49 = vsel %vm2935_vm4, %v2852_v6, %v3038_v56 }
 0x1a7   : > { %v2982_v42 = vsel %vm2941_vm7, %v2576_v15, %v2981_v18  ;;  %v3261_v22 = vrot.slane %v1122_v13, 9  ;;  %v3262_v19 = vrot.slane %v1130_v62, 9  ;;  %v2864_v20 = vrot.slane %v2192_v45, %v3666_v11 }
 0x1a8   : > { %3088 = vst [vmem:[%s3754_s27 + $0x40] sm:$0xff] %v2982_v42  ;;  %v3040_v8 = vsel %vm2937_vm5, %v2856_v39, %v3039_v49  ;;  %v3263_v31 = vrot.slane %v1129_v12, 9  ;;  %v3264_v46 = vrot.slane %v1131_v50, 9  ;;  %v1428_v1 = vrot.slane %v837_v57, %v3653_v0 }
 0x1a9   : > { %v3041_v5 = vsel %vm2939_vm6, %v2860_v30, %v3040_v8  ;;  %v2121_v7 = vmax.f32 %v1122_v13, %v3261_v22  ;;  %v2122_v24 = vmax.f32 %v1130_v62, %v3262_v19  ;;  %v1435_v63 = vrot.slane %v1421_v27, %v3653_v0  ;;  %v4550_v62 = vld [vmem:[#allocation13_spill] sm:$0xff] }
 0x1aa   : > { %v3042_v43 = vsel %vm2941_vm7, %v2864_v20, %v3041_v5  ;;  %v2123_v51 = vmax.f32 %v1129_v12, %v3263_v31  ;;  %v2124_v56 = vmax.f32 %v1131_v50, %v3264_v46  ;;  %v1436_v28 = vcombine.high %v1428_v1, %v1428_v1 }
 0x1ab   : > { %3100 = vst [vmem:[%s3754_s27 + $0xa0] sm:$0xff] %v3042_v43  ;;  %v2580_v37 = vrot.slane %v2121_v7, %v3666_v11  ;;  %v2584_v25 = vrot.slane %v2122_v24, %v3666_v11  ;;  %v3333_v3 = vrot.slane %v1428_v1, 9  ;;  %v1437_v16 = vcombine.high %v1435_v63, %v1435_v63 }
 0x1ac   : > { %v2588_v44 = vrot.slane %v2123_v51, %v3666_v11  ;;  %v2592_v13 = vrot.slane %v2124_v56, %v3666_v11  ;;  %v3335_v57 = vrot.slane %v1435_v63, 9  ;;  %v3334_v12 = vrot.slane %v1436_v28, 9 }
 0x1ad   : > { %v2983_v55 = vsel %vm2929_vm1, %v2584_v25, %v2580_v37  ;;  %v2193_v38 = vmax.f32 %v1428_v1, %v3333_v3  ;;  %v821_v27 = vmax.f32 %v764_v61, %v767_v35  ;;  %v3336_v41 = vrot.slane %v1437_v16, 9 }
 0x1ae   : > { %v2984_v32 = vsel %vm2931_vm2, %v2588_v44, %v2983_v55  ;;  %v2195_v54 = vmax.f32 %v1435_v63, %v3335_v57  ;;  %v839_v53 = vmax.f32 %v800_v47, %v803_v21  ;;  %v2194_v33 = vmax.f32 %v1436_v28, %v3334_v12  ;;  %v4549_v21 = vld [vmem:[#allocation12_spill] sm:$0xff] }
 0x1af   : > { %v2985_v60 = vsel %vm2933_vm3, %v2592_v13, %v2984_v32  ;;  %v2196_v14 = vmax.f32 %v1437_v16, %v3336_v41  ;;  %v2868_v40 = vrot.slane %v2193_v38, %v3666_v11  ;;  %v1149_v58 = vcombine.high %v821_v27, %v821_v27 }
 0x1b0   : > { %3089 = vst [vmem:[%s3754_s27 + $0x48] sm:$0xf] %v2985_v60  ;;  %v2876_v48 = vrot.slane %v2195_v54, %v3666_v11  ;;  %v2872_v61 = vrot.slane %v2194_v33, %v3666_v11  ;;  %v1156_v47 = vrot.slane %v821_v27, %v3653_v0  ;;  %v567_v10 = vadd.f32 %v4133_v2, %v4549_v21 }
 0x1b1   : > { %v2880_v35 = vrot.slane %v2196_v14, %v3666_v11  ;;  %v1455_v6 = vcombine.high %v839_v53, %v839_v53  ;;  %v575_v15 = vadd.f32 %v4133_v2, %v3937_v34  ;;  %v1163_v26 = vrot.slane %v1149_v58, %v3653_v0 }
 0x1b2   : > { %v3043_v59 = vsel %vm2929_vm1, %v2872_v61, %v2868_v40  ;;  %v711_v50 = vadd.f32 %v4133_v2, %v4550_v62  ;;  %v1164_v18 = vcombine.high %v1156_v47, %v1156_v47  ;;  %v3269_v45 = vrot.slane %v1156_v47, 9 }
 0x1b3   : > { %v3044_v9 = vsel %vm2931_vm2, %v2876_v48, %v3043_v59  ;;  %v4388_v39 = vrot.slane %v839_v53, %v3653_v0  ;;  %v719_v30 = vadd.f32 %v4133_v2, %v3942_v23  ;;  %v763_v42 = vmax.f32 %v567_v10, 0.0 }
 0x1b4   : > { %v3045_v36 = vsel %vm2933_vm3, %v2880_v35, %v3044_v9  ;;  %v4393_v49 = vrot.slane %v1455_v6, %v3653_v0  ;;  %v765_v22 = vmax.f32 %v575_v15, 0.0  ;;  %v586_v34 = vadd.f32 %v4133_v2, %v3973_v4 }
 0x1b5   : > { %3101 = vst [vmem:[%s3754_s27 + $0xa8] sm:$0xf] %v3045_v36  ;;  %v4397_v19 = vcombine.high %v1163_v26, %v1163_v26  ;;  %v3271_v20 = vrot.slane %v1163_v26, 9  ;;  %v801_v8 = vmax.f32 %v719_v30, 0.0  ;;  %v730_v31 = vadd.f32 %v4133_v2, %v3975_v17 }
 0x1b6   : > { %v799_v46 = vmax.f32 %v711_v50, 0.0  ;;  %v768_v5 = vmax.f32 %v586_v34, 0.0  ;;  %v578_v23 = vadd.f32 %v4133_v2, %v3980_v29  ;;  %v722_v7 = vadd.f32 %v4133_v2, %v4027_v52 }
 0x1b7   : > { %v3270_v24 = vrot.slane %v1164_v18, 9  ;;  %v4405_v1 = vmax.f32 %v1156_v47, %v3269_v45  ;;  %v4409_v4 = vcombine.high %v4388_v39, %v4388_v39  ;;  %v804_v43 = vmax.f32 %v730_v31, 0.0 }
 0x1b8   : > { %v4413_v51 = vcombine.high %v4393_v49, %v4393_v49  ;;  %v822_v17 = vmax.f32 %v765_v22, %v768_v5  ;;  %v766_v56 = vmax.f32 %v578_v23, 0.0  ;;  %v802_v63 = vmax.f32 %v722_v7, 0.0 }
 0x1b9   : > { %v3272_v29 = vrot.slane %v4397_v19, 9  ;;  %v4416_v37 = vmax.f32 %v1163_v26, %v3271_v20  ;;  %v3341_v52 = vrot.slane %v4388_v39, 9  ;;  %v840_v2 = vmax.f32 %v801_v8, %v804_v43 }
 0x1ba   : > { %v1166_v25 = vcombine.high %v822_v17, %v822_v17  ;;  %v1173_v28 = vrot.slane %v822_v17, %v3653_v0  ;;  %v820_v3 = vmax.f32 %v763_v42, %v766_v56  ;;  %v4420_v44 = vmax.f32 %v799_v46, %v802_v63 }
 0x1bb   : > { %v4422_v13 = vmax.f32 %v1164_v18, %v3270_v24  ;;  %v2612_v16 = vrot.slane %v4405_v1, %v3666_v11  ;;  %v1472_v57 = vcombine.high %v840_v2, %v840_v2  ;;  %v1479_v55 = vrot.slane %v840_v2, %v3653_v0 }
 0x1bc   : > { %v1180_v12 = vrot.slane %v1166_v25, %v3653_v0  ;;  %v1181_v38 = vcombine.high %v1173_v28, %v1173_v28  ;;  %v3273_v27 = vrot.slane %v1173_v28, 9  ;;  %v1132_v32 = vcombine.high %v820_v3, %v820_v3 }
 0x1bd   : > { %v1486_v41 = vrot.slane %v1472_v57, %v3653_v0  ;;  %v1487_v54 = vcombine.high %v1479_v55, %v1479_v55  ;;  %v3345_v53 = vrot.slane %v1479_v55, 9  ;;  %v1139_v60 = vrot.slane %v820_v3, %v3653_v0 }
 0x1be   : > { %v1182_v33 = vcombine.high %v1180_v12, %v1180_v12  ;;  %v3274_v14 = vrot.slane %v1181_v38, 9  ;;  %v3275_v48 = vrot.slane %v1180_v12, 9  ;;  %v2133_v40 = vmax.f32 %v1173_v28, %v3273_v27 }
 0x1bf   : > { %v1488_v61 = vcombine.high %v1486_v41, %v1486_v41  ;;  %v3346_v35 = vrot.slane %v1487_v54, 9  ;;  %v3347_v58 = vrot.slane %v1486_v41, 9  ;;  %v2205_v59 = vmax.f32 %v1479_v55, %v3345_v53 }
 0x1c0   : > { %v3276_v9 = vrot.slane %v1182_v33, 9  ;;  %v2134_v47 = vmax.f32 %v1181_v38, %v3274_v14  ;;  %v2135_v21 = vmax.f32 %v1180_v12, %v3275_v48  ;;  %v2628_v10 = vrot.slane %v2133_v40, %v3666_v11 }
 0x1c1   : > { %v3348_v36 = vrot.slane %v1488_v61, 9  ;;  %v2206_v6 = vmax.f32 %v1487_v54, %v3346_v35  ;;  %v2207_v15 = vmax.f32 %v1486_v41, %v3347_v58  ;;  %v2916_v26 = vrot.slane %v2205_v59, %v3666_v11 }
 0x1c2   : > { %v2136_v62 = vmax.f32 %v1182_v33, %v3276_v9  ;;  %v2632_v50 = vrot.slane %v2134_v47, %v3666_v11  ;;  %v2636_v18 = vrot.slane %v2135_v21, %v3666_v11  ;;  %v1146_v45 = vrot.slane %v1132_v32, %v3653_v0 }
 0x1c3   : > { %v2208_v30 = vmax.f32 %v1488_v61, %v3348_v36  ;;  %v2920_v42 = vrot.slane %v2206_v6, %v3666_v11  ;;  %v2924_v22 = vrot.slane %v2207_v15, %v3666_v11  ;;  %v1147_v34 = vcombine.high %v1139_v60, %v1139_v60 }
 0x1c4   : > { %v2640_v20 = vrot.slane %v2136_v62, %v3666_v11  ;;  %v2993_v8 = vsel %vm2929_vm1, %v2632_v50, %v2628_v10  ;;  %v1148_v31 = vcombine.high %v1146_v45, %v1146_v45  ;;  %v3265_v46 = vrot.slane %v1139_v60, 9 }
 0x1c5   : > { %v2994_v5 = vsel %vm2931_vm2, %v2636_v18, %v2993_v8  ;;  %v2928_v23 = vrot.slane %v2208_v30, %v3666_v11  ;;  %v3053_v7 = vsel %vm2929_vm1, %v2920_v42, %v2916_v26  ;;  %v3266_v24 = vrot.slane %v1147_v34, 9 }
 0x1c6   : > { %v2995_v43 = vsel %vm2933_vm3, %v2640_v20, %v2994_v5  ;;  %v3054_v17 = vsel %vm2931_vm2, %v2924_v22, %v3053_v7  ;;  %v3267_v56 = vrot.slane %v1146_v45, 9  ;;  %v3268_v63 = vrot.slane %v1148_v31, 9 }
 0x1c7   : > { %3091 = vst [vmem:[%s3754_s27 + $0x58] sm:$0xf] %v2995_v43  ;;  %v3055_v2 = vsel %vm2933_vm3, %v2928_v23, %v3054_v17  ;;  %v2125_v25 = vmax.f32 %v1139_v60, %v3265_v46  ;;  %v2126_v28 = vmax.f32 %v1147_v34, %v3266_v24  ;;  %v1438_v3 = vcombine.high %v4420_v44, %v4420_v44 }
 0x1c8   : > { %v3342_v57 = vrot.slane %v4409_v4, 9  ;;  %3103 = vst [vmem:[%s3754_s27 + $0xb8] sm:$0xf] %v3055_v2  ;;  %v2127_v55 = vmax.f32 %v1146_v45, %v3267_v56  ;;  %v2128_v12 = vmax.f32 %v1148_v31, %v3268_v63  ;;  %v1445_v38 = vrot.slane %v4420_v44, %v3653_v0 }
 0x1c9   : > { %v3343_v27 = vrot.slane %v4393_v49, 9  ;;  %v2596_v32 = vrot.slane %v2125_v25, %v3666_v11  ;;  %v2600_v41 = vrot.slane %v2126_v28, %v3666_v11  ;;  %v1452_v54 = vrot.slane %v1438_v3, %v3653_v0 }
 0x1ca   : > { %v2604_v53 = vrot.slane %v2127_v55, %v3666_v11  ;;  %v2608_v60 = vrot.slane %v2128_v12, %v3666_v11  ;;  %v1453_v33 = vcombine.high %v1445_v38, %v1445_v38  ;;  %v3337_v14 = vrot.slane %v1445_v38, 9 }
 0x1cb   : > { %v2132_v48 = vmax.f32 %v4397_v19, %v3272_v29  ;;  %v2986_v44 = vsel %vm2929_vm1, %v2600_v41, %v2596_v32  ;;  %v1454_v40 = vcombine.high %v1452_v54, %v1452_v54  ;;  %v3339_v61 = vrot.slane %v1452_v54, 9 }
 0x1cc   : > { %v2620_v35 = vrot.slane %v4416_v37, %v3666_v11  ;;  %v2987_v58 = vsel %vm2931_vm2, %v2604_v53, %v2986_v44  ;;  %v3338_v0 = vrot.slane %v1453_v33, 9  ;;  %v2197_v59 = vmax.f32 %v1445_v38, %v3337_v14 }
 0x1cd   : > { %v2616_v9 = vrot.slane %v4422_v13, %v3666_v11  ;;  %v2988_v47 = vsel %vm2933_vm3, %v2608_v60, %v2987_v58  ;;  %v3340_v21 = vrot.slane %v1454_v40, 9  ;;  %v2199_v10 = vmax.f32 %v1452_v54, %v3339_v61 }
 0x1ce   : > { %v3344_v19 = vrot.slane %v4413_v51, 9  ;;  %v2201_v29 = vmax.f32 %v4388_v39, %v3341_v52  ;;  %v2989_v37 = vsel %vm2935_vm4, %v2612_v16, %v2988_v47  ;;  %v2198_v36 = vmax.f32 %v1453_v33, %v3338_v0 }
 0x1cf   : > { %v2624_v6 = vrot.slane %v2132_v48, %v3666_v11  ;;  %v2990_v13 = vsel %vm2937_vm5, %v2616_v9, %v2989_v37  ;;  %v2200_v15 = vmax.f32 %v1454_v40, %v3340_v21  ;;  %v2892_v26 = vrot.slane %v2199_v10, %v3666_v11 }
 0x1d0   : > { %v2202_v62 = vmax.f32 %v4409_v4, %v3342_v57  ;;  %v2991_v50 = vsel %vm2939_vm6, %v2620_v35, %v2990_v13  ;;  %v2884_v18 = vrot.slane %v2197_v59, %v3666_v11  ;;  %v2888_v39 = vrot.slane %v2198_v36, %v3666_v11 }
 0x1d1   : > { %v2203_v1 = vmax.f32 %v4393_v49, %v3343_v27  ;;  %v2992_v52 = vsel %vm2941_vm7, %v2624_v6, %v2991_v50  ;;  %v2896_v16 = vrot.slane %v2200_v15, %v3666_v11  ;;  %v2204_v45 = vmax.f32 %v4413_v51, %v3344_v19 }
 0x1d2   : > { %3090 = vst [vmem:[%s3754_s27 + $0x50] sm:$0xff] %v2992_v52  ;;  %v3046_v30 = vsel %vm2929_vm1, %v2888_v39, %v2884_v18  ;;  %v2900_v4 = vrot.slane %v2201_v29, %v3666_v11  ;;  %v2904_v22 = vrot.slane %v2202_v62, %v3666_v11 }
 0x1d3   : > { %v3047_v42 = vsel %vm2931_vm2, %v2892_v26, %v3046_v30  ;;  %v2908_v49 = vrot.slane %v2203_v1, %v3666_v11  ;;  %v2912_v8 = vrot.slane %v2204_v45, %v3666_v11 }
 0x1d4   : > { %v3048_v34 = vsel %vm2933_vm3, %v2896_v16, %v3047_v42 }
 0x1d5   : > { %v3049_v20 = vsel %vm2935_vm4, %v2900_v4, %v3048_v34 }
 0x1d6   : > { %v3050_v31 = vsel %vm2937_vm5, %v2904_v22, %v3049_v20 }
 0x1d7   : > { %v3051_v51 = vsel %vm2939_vm6, %v2908_v49, %v3050_v31 }
 0x1d8   : > { %v3052_v46 = vsel %vm2941_vm7, %v2912_v8, %v3051_v51 }
 0x1d9   : > { %3102 = vst [vmem:[%s3754_s27 + $0xb0] sm:$0xff] %v3052_v46 }
 0x1da PF: > { %s13_s12 = sadd.s32 1, %s3489_s12  }
 0x1db   : > { %p10_p4 = scmp.ge.s32.totalorder %s13_s12, 4  }
 0x1dd   :  { %12 = sbr.rel (!%p10_p4) target bundleno = 1 (0x1), region = 62 }

// kernel: mnist_forward.4
= control target key start
LH: loop header
LB: loop body
LE: loop exit
PB: predicated region body
PF: predicated region fallthrough
CT: control target
= control target key end

     0   :  { %s7383_s12 = smov 0   ;;  %s9366_s0 = inlined_call_operand.vmem [shape: f32[2,12,12,128], index: 0, kind: input, shape index: {}]   ;;  %s9367_s1 = inlined_call_operand.vmem [shape: bf16[25,128,256], index: 1, kind: input, shape index: {}]   ;;  %s9368_s2 = inlined_call_operand.vmem [shape: f32[1,256], index: 2, kind: input, shape index: {}]   ;;  %s9369_s3 = inlined_call_operand.vmem [shape: f32[2,4,4,256], index: 3, kind: output, shape index: {}]  }
   0x1 LB: > { %s5521_s13 = sadd.s32 4294967295, %s7358_s12   ;;  %p5525_p0 = scmp.ge.s32.totalorder %s7358_s12, 1  ;;  %s7358_s12 = sphi %s7383_s12, %s13_s12  }
   0x2   : > { %p137_p1 = scmp.lt.s32.totalorder %s7358_s12, 3 }
   0x4   : > { %p138_p2 = pnand %p5525_p0, %p137_p1 }
   0x6   : > { %141 = sbr.rel (%p138_p2) target bundleno = 692 (0x2b4), region = 32 }
   0xd   : > { %v6744_v0 = vld [vmem:[%s9367_s1 + $0x84] ss:$8 sps:$4 sm:$0xff]   ;;  %v9370_v2 = vmov 0   ;;  %v6748_v3 = vld [vmem:[%s9367_s1 + $0x80] ss:$8 sps:$4 sm:$0xff]   ;;  %p161_p3 = scmp.lt.s32.totalorder %s5521_s13, 1 }
   0xe   : > { %v6746_v1 = vld [vmem:[%s9367_s1 + $0x604] ss:$8 sps:$4 sm:$0xff]   ;;  %398 = vmatprep.mubr.bf16.mxu1 %v9370_v2  ;;  %2743 = vmatprep.mubr.bf16.mxu0 %v9370_v2  ;;  %v6749_v4 = vld [vmem:[%s9367_s1 + $0x600] ss:$8 sps:$4 sm:$0xff]   ;;  %v6750_v5 = vld [vmem:[%s9367_s1 + $0x94] ss:$8 sps:$4 sm:$0xff]  }
   0xf   : > { %366 = vmatprep.subr.bf16.mxu1 %v6744_v0  ;;  %2711 = vmatprep.subr.bf16.mxu0 %v6746_v1  ;;  %v6752_v6 = vld [vmem:[%s9367_s1 + $0x614] ss:$8 sps:$4 sm:$0xff]   ;;  %v6754_v7 = vld [vmem:[%s9367_s1 + $0x90] ss:$8 sps:$4 sm:$0xff]   ;;  %v6756_v9 = vld [vmem:[%s9367_s1 + $0xa4] ss:$8 sps:$4 sm:$0xff]  }
  0x10   : > { %367 = vmatpush1.bf16.msra.mxu1 %v6748_v3  ;;  %2712 = vmatpush1.bf16.msra.mxu0 %v6749_v4  ;;  %v6755_v8 = vld [vmem:[%s9367_s1 + $0x610] ss:$8 sps:$4 sm:$0xff]   ;;  %v6758_v10 = vld [vmem:[%s9367_s1 + $0x624] ss:$8 sps:$4 sm:$0xff]   ;;  %v6760_v11 = vld [vmem:[%s9367_s1 + $0xa0] ss:$8 sps:$4 sm:$0xff]  }
  0x11   : > { %368 = vmatprep.subr.bf16.mxu1 %v6750_v5  ;;  %2713 = vmatprep.subr.bf16.mxu0 %v6752_v6  ;;  %v6761_v12 = vld [vmem:[%s9367_s1 + $0x620] ss:$8 sps:$4 sm:$0xff]   ;;  %v6762_v13 = vld [vmem:[%s9367_s1 + $0xb4] ss:$8 sps:$4 sm:$0xff]   ;;  %s9392_s13 = smov (!%p161_p3, %s5521_s13), 1  ;;  %vm232_vm0 = vcmask 1046528  }
  0x12   : > { %v6764_v14 = vld [vmem:[%s9367_s1 + $0x634] ss:$8 sps:$4 sm:$0xff]   ;;  %v6766_v15 = vld [vmem:[%s9367_s1 + $0xb0] ss:$8 sps:$4 sm:$0xff]   ;;  %v6768_v17 = vld [vmem:[%s9367_s1 + $0xc4] ss:$8 sps:$4 sm:$0xff]  }
  0x13   : > { %v6767_v16 = vld [vmem:[%s9367_s1 + $0x630] ss:$8 sps:$4 sm:$0xff]   ;;  %v6770_v18 = vld [vmem:[%s9367_s1 + $0x644] ss:$8 sps:$4 sm:$0xff]   ;;  %s6732_s25 = smul.u32 192, %s9392_s13  ;;  %vm592_vm1 = vcmask 1045504  }
  0x14   : > { %369 = vmatpush1.bf16.msra.mxu1 %v6754_v7  ;;  %2714 = vmatpush1.bf16.msra.mxu0 %v6755_v8  ;;  %v6772_v19 = vld [vmem:[%s9367_s1 + $0xc0] ss:$8 sps:$4 sm:$0xff]   ;;  %v6774_v21 = vld [vmem:[%s9367_s1 + $0xd4] ss:$8 sps:$4 sm:$0xff]   ;;  %v6778_v23 = vld [vmem:[%s9367_s1 + $0xd0] ss:$8 sps:$4 sm:$0xff]  }
  0x15   : > { %370 = vmatprep.subr.bf16.mxu1 %v6756_v9  ;;  %2715 = vmatprep.subr.bf16.mxu0 %v6758_v10  ;;  %v6773_v20 = vld [vmem:[%s9367_s1 + $0x640] ss:$8 sps:$4 sm:$0xff]   ;;  %v6776_v22 = vld [vmem:[%s9367_s1 + $0x654] ss:$8 sps:$4 sm:$0xff]   ;;  %s7469_s9 = scalar_lea.vmem %s9366_s0, %s6732_s25  ;;  %v6779_v24 = vld [vmem:[%s9367_s1 + $0x650] ss:$8 sps:$4 sm:$0xff]  }
  0x16   : > { %v6780_v25 = vld [vmem:[%s9367_s1 + $0xe4] ss:$8 sps:$4 sm:$0xff]   ;;  %v7487_v28 = vld [vmem:[%s7469_s9 + $0x8] sm:$0xf]  ;;  %v7496_v31 = vld [vmem:[%s7469_s9 + $0x10] sm:$0xff]  ;;  %vm815_vm2 = vcmask 1044480  }
  0x17   : > { %v6782_v26 = vld [vmem:[%s9367_s1 + $0x664] ss:$8 sps:$4 sm:$0xff]   ;;  %v6784_v29 = vld [vmem:[%s9367_s1 + $0xe0] ss:$8 sps:$4 sm:$0xff]   ;;  %v7499_v32 = vld [vmem:[%s7469_s9 + $0x18] sm:$0xf] }
  0x18   : > { %371 = vmatpush1.bf16.msra.mxu1 %v6760_v11  ;;  %2716 = vmatpush1.bf16.msra.mxu0 %v6761_v12  ;;  %v7484_v27 = vld [vmem:[%s7469_s9] sm:$0xff]  ;;  %v234_v34 = vrot.slane %v7487_v28, 1  ;;  %v6786_v35 = vld [vmem:[%s9367_s1 + $0xf4] ss:$8 sps:$4 sm:$0xff]   ;;  %v236_v36 = vrot.slane %v7496_v31, 1  ;;  %v237_v37 = vrot.slane %v7499_v32, 1 }
  0x19   : > { %372 = vmatprep.subr.bf16.mxu1 %v6762_v13  ;;  %2717 = vmatprep.subr.bf16.mxu0 %v6764_v14  ;;  %v6785_v30 = vld [vmem:[%s9367_s1 + $0x660] ss:$8 sps:$4 sm:$0xff]   ;;  %v233_v33 = vrot.slane %v7484_v27, 1  ;;  %v6788_v39 = vld [vmem:[%s9367_s1 + $0x674] ss:$8 sps:$4 sm:$0xff]   ;;  %v593_v42 = vrot.slane %v7484_v27, 2 }
  0x1a   : > { %v7509_v38 = vld [vmem:[%s7469_s9 + $0x20] sm:$0xff]  ;;  %v7515_v40 = vld [vmem:[%s7469_s9 + $0x28] sm:$0xf]  ;;  %v7518_v41 = vld [vmem:[%s7469_s9 + $0x30] sm:$0xff]  ;;  %v594_v45 = vrot.slane %v7487_v28, 2  ;;  %v596_v46 = vrot.slane %v7496_v31, 2  ;;  %v7529_v48 = vsel %vm232_vm0, %v236_v36, %v237_v37 }
  0x1b   : > { %v235_v43 = vsel %vm232_vm0, %v233_v33, %v234_v34  ;;  %v7523_v44 = vld [vmem:[%s7469_s9 + $0x38] sm:$0xf]  ;;  %v597_v47 = vrot.slane %v7499_v32, 2  ;;  %v599_v49 = vrot.slane %v7509_v38, 2  ;;  %v600_v50 = vrot.slane %v7515_v40, 2  ;;  %v7584_v11 = vld [vmem:[%s7469_s9 + $0x40] sm:$0xff] }
  0x1c   : > { %373 = vmatpush1.bf16.msra.mxu1 %v6766_v15  ;;  %2718 = vmatpush1.bf16.msra.mxu0 %v6767_v16  ;;  %v602_v51 = vrot.slane %v7518_v41, 2  ;;  %v7535_v52 = vsel %vm592_vm1, %v593_v42, %v594_v45  ;;  %v603_v54 = vrot.slane %v7523_v44, 2  ;;  %v239_v55 = vrot.slane %v7509_v38, 1  ;;  %v6790_v56 = vld [vmem:[%s9367_s1 + $0xf0] ss:$8 sps:$4 sm:$0xff]   ;;  %v7644_v45 = vld [vmem:[%s7469_s9 + $0x60] sm:$0xff] }
  0x1d   : > { %374 = vmatprep.subr.bf16.mxu1 %v6768_v17  ;;  %2719 = vmatprep.subr.bf16.mxu0 %v6770_v18  ;;  %v7538_v53 = vsel %vm592_vm1, %v596_v46, %v597_v47  ;;  %v6791_v57 = vld [vmem:[%s9367_s1 + $0x670] ss:$8 sps:$4 sm:$0xff]   ;;  %v7549_v58 = vsel %vm592_vm1, %v599_v49, %v600_v50  ;;  %v240_v60 = vrot.slane %v7515_v40, 1  ;;  %v6794_v61 = vld [vmem:[%s9367_s1 + $0x4] ss:$8 sps:$4 sm:$0xff]   ;;  %v265_v1 = vpack.c.bf16 %v7529_v48, %v235_v43  ;;  %s6331_s21 = sshll.u32 %s9392_s13, 5 }
  0x1e   : > { %v604_v62 = vsel %vm592_vm1, %v602_v51, %v603_v54  ;;  %v6797_v0 = vld [vmem:[%s9367_s1 + $0x684] ss:$8 sps:$4 sm:$0xff]   ;;  %v6792_v3 = vld [vmem:[%s9367_s1] ss:$8 sps:$4 sm:$0xff]   ;;  %v6800_v7 = vld [vmem:[%s9367_s1 + $0x14] ss:$8 sps:$4 sm:$0xff]   ;;  %v7599_v17 = vpack.c.bf16 %v7584_v11, %v7518_v41  ;;  %s9326_s23 = scalar_lea.vmem %s9369_s3, %s6331_s21 }
  0x1f   : > { %v6795_v4 = vld [vmem:[%s9367_s1 + $0x680] ss:$8 sps:$4 sm:$0xff]   ;;  %v7571_v5 = vsel %vm232_vm0, %v239_v55, %v240_v60  ;;  %v7574_v6 = vpack.c.bf16 %v604_v62, %v7549_v58  ;;  %v242_v8 = vrot.slane %v7518_v41, 1  ;;  %v243_v9 = vrot.slane %v7523_v44, 1  ;;  %v7590_v13 = vld [vmem:[%s7469_s9 + $0x50] sm:$0xff] }
  0x20   : > { %375 = vmatpush1.bf16.msra.mxu1 %v6772_v19  ;;  %2720 = vmatpush1.bf16.msra.mxu0 %v6773_v20  ;;  %v7587_v12 = vld [vmem:[%s7469_s9 + $0x48] sm:$0xf]  ;;  %v7593_v14 = vld [vmem:[%s7469_s9 + $0x58] sm:$0xf]  ;;  %v605_v15 = vrot.slane %v7584_v11, 2  ;;  %v608_v19 = vrot.slane %v7590_v13, 2 }
  0x21   : > { %376 = vmatprep.subr.bf16.mxu1 %v6774_v21  ;;  %2721 = vmatprep.subr.bf16.mxu0 %v6776_v22  ;;  %v606_v16 = vrot.slane %v7587_v12, 2  ;;  %v6803_v18 = vld [vmem:[%s9367_s1 + $0x694] ss:$8 sps:$4 sm:$0xff]   ;;  %v609_v20 = vrot.slane %v7593_v14, 2  ;;  %v245_v22 = vrot.slane %v7584_v11, 1  ;;  %v248_v42 = vrot.slane %v7590_v13, 1 }
  0x22   : > { %v6806_v33 = vld [vmem:[%s9367_s1 + $0x24] ss:$8 sps:$4 sm:$0xff]   ;;  %v6804_v37 = vld [vmem:[%s9367_s1 + $0x20] ss:$8 sps:$4 sm:$0xff]   ;;  %v7650_v47 = vld [vmem:[%s7469_s9 + $0x70] sm:$0xff]  ;;  %v249_v51 = vrot.slane %v7593_v14, 1 }
  0x23   : > { %v607_v21 = vsel %vm592_vm1, %v605_v15, %v606_v16  ;;  %v6809_v34 = vld [vmem:[%s9367_s1 + $0x6a4] ss:$8 sps:$4 sm:$0xff]   ;;  %v7647_v46 = vld [vmem:[%s7469_s9 + $0x68] sm:$0xf]  ;;  %v6812_v50 = vld [vmem:[%s9367_s1 + $0x34] ss:$8 sps:$4 sm:$0xff]  }
  0x24   : > { %377 = vmatpush1.bf16.msra.mxu1 %v6778_v23  ;;  %2722 = vmatpush1.bf16.msra.mxu0 %v6779_v24  ;;  %v244_v23 = vsel %vm232_vm0, %v242_v8, %v243_v9  ;;  %v7610_v24 = vpack.c.bf16 %v607_v21, %v604_v62  ;;  %v7660_v54 = vld [vmem:[%s7469_s9 + $0x78] sm:$0xf]  ;;  %v611_v55 = vrot.slane %v7644_v45, 2  ;;  %v612_v60 = vrot.slane %v7647_v46, 2 }
  0x25   : > { %378 = vmatprep.subr.bf16.mxu1 %v6780_v25  ;;  %2723 = vmatprep.subr.bf16.mxu0 %v6782_v26  ;;  %v246_v25 = vrot.slane %v7587_v12, 1  ;;  %v6798_v26 = vld [vmem:[%s9367_s1 + $0x10] ss:$8 sps:$4 sm:$0xff]   ;;  %v7632_v36 = vpack.c.bf16 %v244_v23, %v7571_v5  ;;  %v615_v62 = vrot.slane %v7660_v54, 2  ;;  %v250_v15 = vsel %vm232_vm0, %v248_v42, %v249_v51 }
  0x26   : > { %v6810_v8 = vld [vmem:[%s9367_s1 + $0x30] ss:$8 sps:$4 sm:$0xff]   ;;  %vm1038_vm3 = vcmask 1043456   ;;  %v1052_v63 = vrot.slane %v7587_v12, 4  ;;  %v1054_v10 = vrot.slane %v7590_v13, 4  ;;  %vm5428_vm4 = vcmask 1041409  }
  0x27   : > { %9378 = vst [vmem:[#allocation2_spill] sm:$0xff] %v7632_v36  ;;  %v6813_v9 = vld [vmem:[%s9367_s1 + $0x6b0] ss:$8 sps:$4 sm:$0xff]   ;;  %vm5430_vm5 = vcmask 1045509   ;;  %vm5432_vm6 = vcmask 1042434   ;;  %vm5434_vm7 = vcmask 1046534  }
  0x28   : > { %379 = vmatpush1.bf16.msra.mxu1 %v6784_v29  ;;  %2724 = vmatpush1.bf16.msra.mxu0 %v6785_v30  ;;  %v6801_v29 = vld [vmem:[%s9367_s1 + $0x690] ss:$8 sps:$4 sm:$0xff]   ;;  %v7620_v30 = vsel %vm592_vm1, %v608_v19, %v609_v20  ;;  %v6818_v19 = vld [vmem:[%s9367_s1 + $0x44] ss:$8 sps:$4 sm:$0xff]   ;;  %v7693_v20 = vsel %vm592_vm1, %v611_v55, %v612_v60  ;;  %v255_v60 = vrot.slane %v7660_v54, 1  ;;  %vm5436_vm8 = vcmask 1043459  }
  0x29   : > { %380 = vmatprep.subr.bf16.mxu1 %v6786_v35  ;;  %2725 = vmatprep.subr.bf16.mxu0 %v6788_v39  ;;  %v247_v35 = vsel %vm232_vm0, %v245_v22, %v246_v25  ;;  %v6807_v39 = vld [vmem:[%s9367_s1 + $0x6a0] ss:$8 sps:$4 sm:$0xff]   ;;  %v7653_v49 = vpack.c.bf16 %v7620_v30, %v607_v21  ;;  %v6821_v22 = vld [vmem:[%s9367_s1 + $0x6c4] ss:$8 sps:$4 sm:$0xff]   ;;  %v7727_v42 = vld [vmem:[%s7469_s9 + $0x98] sm:$0xf] }
  0x2a   : > { %v7641_v43 = vpack.c.bf16 %v247_v35, %v244_v23  ;;  %v7704_v25 = vld [vmem:[%s7469_s9 + $0x80] sm:$0xff]  ;;  %v7733_v51 = vpack.c.bf16 %v250_v15, %v247_v35  ;;  %vm5438_vm9 = vcmask 1047559  }
  0x2c   : > { %381 = vmatpush1.bf16.msra.mxu1 %v6790_v56  ;;  %2726 = vmatpush1.bf16.msra.mxu0 %v6791_v57  ;;  %v825_v56 = vrot.slane %v7518_v41, 3  ;;  %v6815_v57 = vld [vmem:[%s9367_s1 + $0x6b4] ss:$8 sps:$4 sm:$0xff]   ;;  %9379 = vst [vmem:[#allocation3_spill] sm:$0xff] %v7733_v51 }
  0x2d   : > { %519 = vmatprep.subr.bf16.mxu1 %v6794_v61  ;;  %2902 = vmatprep.subr.bf16.mxu0 %v6797_v0  ;;  %v614_v61 = vrot.slane %v7650_v47, 2  ;;  %v7672_v0 = vpack.c.bf16 %v7644_v45, %v7590_v13 }
  0x2f   : > { %399 = vmatmul.mubr.bf16.vlgmr.msra.gmra.mrb[0].mxu1 %v265_v1  ;;  %2744 = vmatmul.mubr.bf16.vlgmr.msra.gmra.mrb[0].mxu0 %v7574_v6  ;;  %v251_v1 = vrot.slane %v7644_v45, 1  ;;  %v7696_v21 = vsel %vm592_vm1, %v614_v61, %v615_v62  ;;  %v1647_v61 = vrot.slane %v7704_v25, 2 }
  0x30   : > { %520 = vmatpush1.bf16.msra.mxu1 %v6792_v3  ;;  %2903 = vmatpush1.bf16.msra.mxu0 %v6795_v4  ;;  %v252_v3 = vrot.slane %v7647_v46, 1  ;;  %v826_v4 = vrot.slane %v7523_v44, 3  ;;  %v7737_v55 = vpack.c.bf16 %v7696_v21, %v7693_v20 }
  0x31   : > { %521 = vmatprep.subr.bf16.mxu1 %v6800_v7  ;;  %2904 = vmatprep.subr.bf16.mxu0 %v6803_v18  ;;  %v828_v7 = vrot.slane %v7584_v11, 3  ;;  %v829_v18 = vrot.slane %v7587_v12, 3  ;;  %v6834_v12 = vld [vmem:[%s9367_s1 + $0x70] ss:$8 sps:$4 sm:$0xff]  }
  0x32   : > { %408 = vmatprep.mubr.bf16.mxu1 %v9370_v2  ;;  %2753 = vmatprep.mubr.bf16.mxu0 %v9370_v2  ;;  %v253_v16 = vsel %vm232_vm0, %v251_v1, %v252_v3  ;;  %v2610_v1 = vrot.slane %v7727_v42, 2  ;;  %v6827_v3 = vld [vmem:[%s9367_s1 + $0x6d4] ss:$8 sps:$4 sm:$0xff]  }
  0x33   : > { %v7701_v23 = vpack.c.bf16 %v253_v16, %v250_v15 }
  0x34   : > { %522 = vmatpush1.bf16.msra.mxu1 %v6798_v26  ;;  %2905 = vmatpush1.bf16.msra.mxu0 %v6801_v29  ;;  %v7707_v26 = vld [vmem:[%s7469_s9 + $0x88] sm:$0xf]  ;;  %v7710_v29 = vld [vmem:[%s7469_s9 + $0x90] sm:$0xff] }
  0x35   : > { %523 = vmatprep.subr.bf16.mxu1 %v6806_v33  ;;  %2906 = vmatprep.subr.bf16.mxu0 %v6809_v34  ;;  %v7713_v33 = vsel %vm815_vm2, %v825_v56, %v826_v4  ;;  %v7716_v34 = vsel %vm815_vm2, %v828_v7, %v829_v18  ;;  %v6824_v56 = vld [vmem:[%s9367_s1 + $0x54] ss:$8 sps:$4 sm:$0xff]   ;;  %v1648_v62 = vrot.slane %v7707_v26, 2  ;;  %v2609_v35 = vrot.slane %v7710_v29, 2  ;;  %v6822_v4 = vld [vmem:[%s9367_s1 + $0x50] ss:$8 sps:$4 sm:$0xff]  }
  0x36   : > { %v6825_v7 = vld [vmem:[%s9367_s1 + $0x6d0] ss:$8 sps:$4 sm:$0xff]  }
  0x37   : > { %409 = vmatmul.mubr.bf16.gmra.mrb[4].mxu1 %v7632_v36  ;;  %2754 = vmatmul.mubr.bf16.gmra.mrb[4].mxu0 %v7653_v49  ;;  %v7766_v15 = vsel %vm592_vm1, %v1647_v61, %v1648_v62  ;;  %v7769_v18 = vsel %vm592_vm1, %v2609_v35, %v2610_v1  ;;  %v1049_v61 = vrot.slane %v7523_v44, 4  ;;  %v6828_v62 = vld [vmem:[%s9367_s1 + $0x60] ss:$8 sps:$4 sm:$0xff]   ;;  %v6836_v44 = vld [vmem:[%s9367_s1 + $0x74] ss:$8 sps:$4 sm:$0xff]   ;;  %v819_v36 = vrot.slane %v7496_v31, 3 }
  0x38   : > { %524 = vmatpush1.bf16.msra.mxu1 %v6804_v37  ;;  %2907 = vmatpush1.bf16.msra.mxu0 %v6807_v39  ;;  %v6816_v37 = vld [vmem:[%s9367_s1 + $0x40] ss:$8 sps:$4 sm:$0xff]   ;;  %v7790_v35 = vpack.c.bf16 %v7769_v18, %v7766_v15 }
  0x39   : > { %525 = vmatprep.subr.bf16.mxu1 %v6812_v50  ;;  %2908 = vmatprep.subr.bf16.mxu0 %v6815_v57  ;;  %v6819_v39 = vld [vmem:[%s9367_s1 + $0x6c0] ss:$8 sps:$4 sm:$0xff]   ;;  %v7731_v50 = vpack.c.bf16 %v7716_v34, %v7713_v33  ;;  %v254_v57 = vrot.slane %v7650_v47, 1 }
  0x3a   : > { %418 = vmatprep.mubr.bf16.mxu1 %v9370_v2  ;;  %2763 = vmatprep.mubr.bf16.mxu0 %v9370_v2  ;;  %9381 = vst [vmem:[#allocation5_spill] sm:$0xff] %v7790_v35  ;;  %v6831_v1 = vld [vmem:[%s9367_s1 + $0x6e0] ss:$8 sps:$4 sm:$0xff]  }
  0x3c   : > { %526 = vmatpush1.bf16.msra.mxu1 %v6810_v8  ;;  %2909 = vmatpush1.bf16.msra.mxu0 %v6813_v9  ;;  %v7760_v8 = vsel %vm232_vm0, %v254_v57, %v255_v60  ;;  %v6830_v9 = vld [vmem:[%s9367_s1 + $0x64] ss:$8 sps:$4 sm:$0xff]   ;;  %v822_v57 = vrot.slane %v7509_v38, 3  ;;  %v823_v60 = vrot.slane %v7515_v40, 3 }
  0x3d   : > { %527 = vmatprep.subr.bf16.mxu1 %v6818_v19  ;;  %2910 = vmatprep.subr.bf16.mxu0 %v6821_v22  ;;  %v1045_v19 = vrot.slane %v7509_v38, 4  ;;  %v6833_v22 = vld [vmem:[%s9367_s1 + $0x6e4] ss:$8 sps:$4 sm:$0xff]  }
  0x3e   : > { %v7836_v59 = vsel %vm815_vm2, %v822_v57, %v823_v60  ;;  %v832_v57 = vrot.slane %v7593_v14, 3 }
  0x3f   : > { %419 = vmatmul.mubr.bf16.gmra.mrb[8].mxu1 %v7733_v51  ;;  %2764 = vmatmul.mubr.bf16.gmra.mrb[8].mxu0 %v7737_v55  ;;  %v1040_v51 = vrot.slane %v7487_v28, 4 }
  0x40   : > { %528 = vmatpush1.bf16.msra.mxu1 %v6816_v37  ;;  %2911 = vmatpush1.bf16.msra.mxu0 %v6819_v39  ;;  %v1046_v37 = vrot.slane %v7515_v40, 4  ;;  %v1048_v39 = vrot.slane %v7518_v41, 4  ;;  %v1051_v40 = vrot.slane %v7584_v11, 4 }
  0x41   : > { %529 = vmatprep.subr.bf16.mxu1 %v6824_v56  ;;  %2912 = vmatprep.subr.bf16.mxu0 %v6827_v3  ;;  %v7783_v56 = vpack.c.bf16 %v7760_v8, %v253_v16 }
  0x42   : > { %428 = vmatprep.mubr.bf16.mxu1 %v9370_v2  ;;  %2773 = vmatprep.mubr.bf16.mxu0 %v9370_v2  ;;  %v7796_v3 = vsel %vm1038_vm3, %v1045_v19, %v1046_v37  ;;  %v7803_v16 = vsel %vm1038_vm3, %v1048_v39, %v1049_v61  ;;  %v6839_v19 = vld [vmem:[%s9367_s1 + $0x6f4] ss:$8 sps:$4 sm:$0xff]   ;;  %v7813_v37 = vsel %vm1038_vm3, %v1051_v40, %v1052_v63  ;;  %v1058_v39 = vrot.slane %v7647_v46, 4  ;;  %v6842_v40 = vld [vmem:[%s9367_s1 + $0x104] ss:$8 sps:$4 sm:$0xff]  }
  0x43   : > { %9380 = vst [vmem:[#allocation4_spill] sm:$0xff] %v7783_v56  ;;  %v7829_v63 = vpack.c.bf16 %v7813_v37, %v7803_v16  ;;  %v1060_v61 = vrot.slane %v7650_v47, 4 }
  0x44   : > { %530 = vmatpush1.bf16.msra.mxu1 %v6822_v4  ;;  %2913 = vmatpush1.bf16.msra.mxu0 %v6825_v7  ;;  %v1055_v4 = vrot.slane %v7593_v14, 4  ;;  %v1057_v7 = vrot.slane %v7644_v45, 4  ;;  %v816_v14 = vrot.slane %v7484_v27, 3 }
  0x45   : > { %531 = vmatprep.subr.bf16.mxu1 %v6830_v9  ;;  %2914 = vmatprep.subr.bf16.mxu0 %v6833_v22  ;;  %v6837_v9 = vld [vmem:[%s9367_s1 + $0x6f0] ss:$8 sps:$4 sm:$0xff]  }
  0x46   : > { %v7825_v22 = vsel %vm1038_vm3, %v1054_v10, %v1055_v4  ;;  %v7839_v2 = vsel %vm1038_vm3, %v1057_v7, %v1058_v39  ;;  %v1061_v10 = vrot.slane %v7660_v54, 4  ;;  %v6845_v4 = vld [vmem:[%s9367_s1 + $0x704] ss:$8 sps:$4 sm:$0xff]   ;;  %v196_v7 = vpack.c.bf16 %v7496_v31, %v7484_v27  ;;  %v6843_v39 = vld [vmem:[%s9367_s1 + $0x700] ss:$8 sps:$4 sm:$0xff]  }
  0x47   : > { %429 = vmatmul.mubr.bf16.gmra.mrb[12].mxu1 %v7783_v56  ;;  %2774 = vmatmul.mubr.bf16.gmra.mrb[12].mxu0 %v7790_v35  ;;  %v6851_v35 = vld [vmem:[%s9367_s1 + $0x714] ss:$8 sps:$4 sm:$0xff]  }
  0x48   : > { %532 = vmatpush1.bf16.msra.mxu1 %v6828_v62  ;;  %2915 = vmatpush1.bf16.msra.mxu0 %v6831_v1  ;;  %v9382_v62 = vmov 0   ;;  %v831_v1 = vrot.slane %v7590_v13, 3  ;;  %v7850_v60 = vsel %vm1038_vm3, %v1060_v61, %v1061_v10  ;;  %v6848_v61 = vld [vmem:[%s9367_s1 + $0x114] ss:$8 sps:$4 sm:$0xff]   ;;  %v817_v10 = vrot.slane %v7487_v28, 3 }
  0x49   : > { %533 = vmatprep.subr.bf16.mxu1 %v6836_v44  ;;  %2916 = vmatprep.subr.bf16.mxu0 %v6839_v19  ;;  %v6840_v44 = vld [vmem:[%s9367_s1 + $0x100] ss:$8 sps:$4 sm:$0xff]   ;;  %v7859_v19 = vpack.c.bf16 %v7713_v33, %v7836_v59  ;;  %v6854_v28 = vld [vmem:[%s9367_s1 + $0x124] ss:$8 sps:$4 sm:$0xff]  }
  0x4a   : > { %551 = vmatprep.mubr.bf16.mxu1 %v9382_v62  ;;  %2934 = vmatprep.mubr.bf16.mxu0 %v9382_v62  ;;  %v7878_v56 = vsel %vm815_vm2, %v816_v14, %v817_v10  ;;  %v1043_v10 = vrot.slane %v7499_v32, 4 }
  0x4c   : > { %534 = vmatpush1.bf16.msra.mxu1 %v6834_v12  ;;  %2917 = vmatpush1.bf16.msra.mxu0 %v6837_v9  ;;  %v820_v12 = vrot.slane %v7499_v32, 3  ;;  %v1039_v9 = vrot.slane %v7484_v27, 4  ;;  %v1042_v27 = vrot.slane %v7496_v31, 4  ;;  %v6852_v32 = vld [vmem:[%s9367_s1 + $0x120] ss:$8 sps:$4 sm:$0xff]  }
  0x4d   : > { %726 = vmatprep.subr.bf16.mxu1 %v6842_v40  ;;  %3093 = vmatprep.subr.bf16.mxu0 %v6845_v4  ;;  %v6846_v40 = vld [vmem:[%s9367_s1 + $0x110] ss:$8 sps:$4 sm:$0xff]  }
  0x4e   : > { %v6849_v4 = vld [vmem:[%s9367_s1 + $0x710] ss:$8 sps:$4 sm:$0xff]   ;;  %v7889_v33 = vsel %vm815_vm2, %v819_v36, %v820_v12  ;;  %v7899_v14 = vsel %vm1038_vm3, %v1039_v9, %v1040_v51  ;;  %v6857_v36 = vld [vmem:[%s9367_s1 + $0x724] ss:$8 sps:$4 sm:$0xff]   ;;  %v7913_v51 = vpack.c.bf16 %v7518_v41, %v7509_v38  ;;  %v6860_v41 = vld [vmem:[%s9367_s1 + $0x134] ss:$8 sps:$4 sm:$0xff]   ;;  %v7936_v9 = vpack.c.bf16 %v7693_v20, %v7620_v30 }
  0x4f   : > { %552 = vmatmul.mubr.bf16.vlgmr.msra.gmra.mrb[0].mxu1 %v196_v7  ;;  %2935 = vmatmul.mubr.bf16.vlgmr.msra.gmra.mrb[0].mxu0 %v7859_v19  ;;  %v7896_v7 = vsel %vm815_vm2, %v831_v1, %v832_v57  ;;  %v7909_v1 = vsel %vm1038_vm3, %v1042_v27, %v1043_v10  ;;  %v6855_v57 = vld [vmem:[%s9367_s1 + $0x720] ss:$8 sps:$4 sm:$0xff]   ;;  %v838_v12 = vrot.slane %v7660_v54, 3  ;;  %v6861_v54 = vld [vmem:[%s9367_s1 + $0x730] ss:$8 sps:$4 sm:$0xff]   ;;  %v1841_v27 = vrot.slane %v7704_v25, 3 }
  0x50   : > { %727 = vmatpush1.bf16.msra.mxu1 %v6840_v44  ;;  %3094 = vmatpush1.bf16.msra.mxu0 %v6843_v39  ;;  %v834_v44 = vrot.slane %v7644_v45, 3  ;;  %v835_v39 = vrot.slane %v7647_v46, 3  ;;  %v6858_v46 = vld [vmem:[%s9367_s1 + $0x130] ss:$8 sps:$4 sm:$0xff]   ;;  %v6864_v10 = vld [vmem:[%s9367_s1 + $0x140] ss:$8 sps:$4 sm:$0xff]  }
  0x51   : > { %728 = vmatprep.subr.bf16.mxu1 %v6848_v61  ;;  %3095 = vmatprep.subr.bf16.mxu0 %v6851_v35  ;;  %v7920_v35 = vpack.c.bf16 %v7896_v7, %v7716_v34  ;;  %v837_v61 = vrot.slane %v7650_v47, 3  ;;  %v6863_v34 = vld [vmem:[%s9367_s1 + $0x734] ss:$8 sps:$4 sm:$0xff]  }
  0x52   : > { %561 = vmatprep.mubr.bf16.mxu1 %v9382_v62  ;;  %2944 = vmatprep.mubr.bf16.mxu0 %v9382_v62  ;;  %v7950_v30 = vsel %vm815_vm2, %v834_v44, %v835_v39  ;;  %v6867_v44 = vld [vmem:[%s9367_s1 + $0x740] ss:$8 sps:$4 sm:$0xff]   ;;  %v6875_v39 = vld [vmem:[%s9367_s1 + $0x754] ss:$8 sps:$4 sm:$0xff]  }
  0x53   : > { %v7953_v20 = vsel %vm815_vm2, %v837_v61, %v838_v12  ;;  %v6870_v61 = vld [vmem:[%s9367_s1 + $0x150] ss:$8 sps:$4 sm:$0xff]  }
  0x54   : > { %729 = vmatpush1.bf16.msra.mxu1 %v6846_v40  ;;  %3096 = vmatpush1.bf16.msra.mxu0 %v6849_v4  ;;  %v6866_v40 = vld [vmem:[%s9367_s1 + $0x144] ss:$8 sps:$4 sm:$0xff]   ;;  %v6873_v12 = vld [vmem:[%s9367_s1 + $0x750] ss:$8 sps:$4 sm:$0xff]  }
  0x55   : > { %730 = vmatprep.subr.bf16.mxu1 %v6854_v28  ;;  %3097 = vmatprep.subr.bf16.mxu0 %v6857_v36  ;;  %v6869_v4 = vld [vmem:[%s9367_s1 + $0x744] ss:$8 sps:$4 sm:$0xff]   ;;  %v7963_v28 = vpack.c.bf16 %v7590_v13, %v7584_v11  ;;  %v7970_v36 = vpack.c.bf16 %v7953_v20, %v7950_v30  ;;  %v6872_v11 = vld [vmem:[%s9367_s1 + $0x154] ss:$8 sps:$4 sm:$0xff]   ;;  %v2800_v13 = vrot.slane %v7710_v29, 3 }
  0x57   : > { %562 = vmatmul.mubr.bf16.gmra.mrb[4].mxu1 %v7913_v51  ;;  %2945 = vmatmul.mubr.bf16.gmra.mrb[4].mxu0 %v7920_v35 }
  0x58   : > { %731 = vmatpush1.bf16.msra.mxu1 %v6852_v32  ;;  %3098 = vmatpush1.bf16.msra.mxu0 %v6855_v57  ;;  %v1842_v32 = vrot.slane %v7707_v26, 3  ;;  %v2801_v57 = vrot.slane %v7727_v42, 3 }
  0x59   : > { %732 = vmatprep.subr.bf16.mxu1 %v6860_v41  ;;  %3099 = vmatprep.subr.bf16.mxu0 %v6863_v34  ;;  %v7986_v41 = vpack.c.bf16 %v7766_v15, %v7696_v21  ;;  %v6878_v34 = vld [vmem:[%s9367_s1 + $0x164] ss:$8 sps:$4 sm:$0xff]  }
  0x5a   : > { %571 = vmatprep.mubr.bf16.mxu1 %v9382_v62  ;;  %2954 = vmatprep.mubr.bf16.mxu0 %v9382_v62  ;;  %v8000_v21 = vsel %vm815_vm2, %v1841_v27, %v1842_v32  ;;  %v8003_v15 = vsel %vm815_vm2, %v2800_v13, %v2801_v57  ;;  %v6879_v27 = vld [vmem:[%s9367_s1 + $0x760] ss:$8 sps:$4 sm:$0xff]   ;;  %v6890_v32 = vld [vmem:[%s9367_s1 + $0x184] ss:$8 sps:$4 sm:$0xff]   ;;  %v8051_v57 = vpack.c.bf16 %v7803_v16, %v7796_v3 }
  0x5b   : > { %v6888_v13 = vld [vmem:[%s9367_s1 + $0x180] ss:$8 sps:$4 sm:$0xff]   ;;  %v9383_v16 = vpack.c.bf16 %v7538_v53, %v7535_v52  ;;  %v6905_v52 = vld [vmem:[%s9367_s1 + $0x7a4] ss:$8 sps:$4 sm:$0xff]  }
  0x5c   : > { %733 = vmatpush1.bf16.msra.mxu1 %v6858_v46  ;;  %3100 = vmatpush1.bf16.msra.mxu0 %v6861_v54  ;;  %v6881_v46 = vld [vmem:[%s9367_s1 + $0x764] ss:$8 sps:$4 sm:$0xff]   ;;  %v8012_v54 = vpack.c.bf16 %v7650_v47, %v7644_v45  ;;  %v6887_v45 = vld [vmem:[%s9367_s1 + $0x774] ss:$8 sps:$4 sm:$0xff]   ;;  %v6882_v47 = vld [vmem:[%s9367_s1 + $0x170] ss:$8 sps:$4 sm:$0xff]  }
  0x5d   : > { %734 = vmatprep.subr.bf16.mxu1 %v6866_v40  ;;  %3101 = vmatprep.subr.bf16.mxu0 %v6869_v4  ;;  %v6876_v40 = vld [vmem:[%s9367_s1 + $0x160] ss:$8 sps:$4 sm:$0xff]   ;;  %v8019_v4 = vpack.c.bf16 %v8003_v15, %v8000_v21 }
  0x5f   : > { %572 = vmatmul.mubr.bf16.gmra.mrb[8].mxu1 %v7963_v28  ;;  %2955 = vmatmul.mubr.bf16.gmra.mrb[8].mxu0 %v7970_v36 }
  0x60   : > { %735 = vmatpush1.bf16.msra.mxu1 %v6864_v10  ;;  %3102 = vmatpush1.bf16.msra.mxu0 %v6867_v44  ;;  %v6884_v10 = vld [vmem:[%s9367_s1 + $0x174] ss:$8 sps:$4 sm:$0xff]   ;;  %v6885_v44 = vld [vmem:[%s9367_s1 + $0x770] ss:$8 sps:$4 sm:$0xff]  }
  0x61   : > { %736 = vmatprep.subr.bf16.mxu1 %v6872_v11  ;;  %3103 = vmatprep.subr.bf16.mxu0 %v6875_v39  ;;  %v6893_v11 = vld [vmem:[%s9367_s1 + $0x784] ss:$8 sps:$4 sm:$0xff]   ;;  %v6891_v39 = vld [vmem:[%s9367_s1 + $0x780] ss:$8 sps:$4 sm:$0xff]  }
  0x62   : > { %581 = vmatprep.mubr.bf16.mxu1 %v9382_v62  ;;  %2964 = vmatprep.mubr.bf16.mxu0 %v9382_v62 }
  0x64   : > { %737 = vmatpush1.bf16.msra.mxu1 %v6870_v61  ;;  %3104 = vmatpush1.bf16.msra.mxu0 %v6873_v12  ;;  %v6896_v61 = vld [vmem:[%s9367_s1 + $0x194] ss:$8 sps:$4 sm:$0xff]  }
  0x65   : > { %738 = vmatprep.subr.bf16.mxu1 %v6878_v34  ;;  %3105 = vmatprep.subr.bf16.mxu0 %v6881_v46  ;;  %v6899_v12 = vld [vmem:[%s9367_s1 + $0x794] ss:$8 sps:$4 sm:$0xff]   ;;  %v6894_v34 = vld [vmem:[%s9367_s1 + $0x190] ss:$8 sps:$4 sm:$0xff]  }
  0x66   : > { %v6897_v46 = vld [vmem:[%s9367_s1 + $0x790] ss:$8 sps:$4 sm:$0xff]  }
  0x67   : > { %582 = vmatmul.mubr.bf16.gmra.mrb[12].mxu1 %v8012_v54  ;;  %2965 = vmatmul.mubr.bf16.gmra.mrb[12].mxu0 %v8019_v4 }
  0x68   : > { %739 = vmatpush1.bf16.msra.mxu1 %v6876_v40  ;;  %3106 = vmatpush1.bf16.msra.mxu0 %v6879_v27  ;;  %v6902_v40 = vld [vmem:[%s9367_s1 + $0x1a4] ss:$8 sps:$4 sm:$0xff]   ;;  %v6900_v27 = vld [vmem:[%s9367_s1 + $0x1a0] ss:$8 sps:$4 sm:$0xff]  }
  0x69   : > { %740 = vmatprep.subr.bf16.mxu1 %v6884_v10  ;;  %3107 = vmatprep.subr.bf16.mxu0 %v6887_v45  ;;  %v8085_v10 = vpack.c.bf16 %v7825_v22, %v7813_v37  ;;  %v6903_v45 = vld [vmem:[%s9367_s1 + $0x7a0] ss:$8 sps:$4 sm:$0xff]   ;;  %v8098_v37 = vpack.c.bf16 %v7950_v30, %v7896_v7  ;;  %v8121_v30 = vpack.c.bf16 %v7850_v60, %v7839_v2 }
  0x6a   : > { %758 = vmatprep.mubr.bf16.mxu1 %v9382_v62  ;;  %3125 = vmatprep.mubr.bf16.mxu0 %v9382_v62  ;;  %v6912_v7 = vld [vmem:[%s9367_s1 + $0x1c0] ss:$8 sps:$4 sm:$0xff]  }
  0x6c   : > { %741 = vmatpush1.bf16.msra.mxu1 %v6882_v47  ;;  %3108 = vmatpush1.bf16.msra.mxu0 %v6885_v44  ;;  %v6908_v47 = vld [vmem:[%s9367_s1 + $0x1b4] ss:$8 sps:$4 sm:$0xff]  }
  0x6d   : > { %949 = vmatprep.subr.bf16.mxu1 %v6890_v32  ;;  %3280 = vmatprep.subr.bf16.mxu0 %v6893_v11  ;;  %v6911_v44 = vld [vmem:[%s9367_s1 + $0x7b4] ss:$8 sps:$4 sm:$0xff]   ;;  %v6906_v32 = vld [vmem:[%s9367_s1 + $0x1b0] ss:$8 sps:$4 sm:$0xff]  }
  0x6e   : > { %v6909_v11 = vld [vmem:[%s9367_s1 + $0x7b0] ss:$8 sps:$4 sm:$0xff]  }
  0x6f   : > { %759 = vmatmul.mubr.bf16.vlgmr.msra.gmra.mrb[0].mxu1 %v9383_v16  ;;  %3126 = vmatmul.mubr.bf16.vlgmr.msra.gmra.mrb[0].mxu0 %v8051_v57  ;;  %v2991_v16 = vrot.slane %v7710_v29, 4  ;;  %v6918_v29 = vld [vmem:[%s9367_s1 + $0x1d0] ss:$8 sps:$4 sm:$0xff]  }
  0x70   : > { %950 = vmatpush1.bf16.msra.mxu1 %v6888_v13  ;;  %3281 = vmatpush1.bf16.msra.mxu0 %v6891_v39  ;;  %v6914_v13 = vld [vmem:[%s9367_s1 + $0x1c4] ss:$8 sps:$4 sm:$0xff]   ;;  %v2035_v39 = vrot.slane %v7704_v25, 4 }
  0x71   : > { %951 = vmatprep.subr.bf16.mxu1 %v6896_v61  ;;  %3282 = vmatprep.subr.bf16.mxu0 %v6899_v12  ;;  %v2036_v61 = vrot.slane %v7707_v26, 4  ;;  %v6915_v12 = vld [vmem:[%s9367_s1 + $0x7c0] ss:$8 sps:$4 sm:$0xff]   ;;  %v6923_v26 = vld [vmem:[%s9367_s1 + $0x7d4] ss:$8 sps:$4 sm:$0xff]  }
  0x72   : > { %768 = vmatprep.mubr.bf16.mxu1 %v9382_v62  ;;  %3135 = vmatprep.mubr.bf16.mxu0 %v9382_v62 }
  0x74   : > { %952 = vmatpush1.bf16.msra.mxu1 %v6894_v34  ;;  %3283 = vmatpush1.bf16.msra.mxu0 %v6897_v46  ;;  %v2992_v34 = vrot.slane %v7727_v42, 4  ;;  %v6920_v46 = vld [vmem:[%s9367_s1 + $0x1d4] ss:$8 sps:$4 sm:$0xff]   ;;  %v6921_v42 = vld [vmem:[%s9367_s1 + $0x7d0] ss:$8 sps:$4 sm:$0xff]  }
  0x75   : > { %953 = vmatprep.subr.bf16.mxu1 %v6902_v40  ;;  %3284 = vmatprep.subr.bf16.mxu0 %v6905_v52  ;;  %v8138_v40 = vpack.c.bf16 %v8000_v21, %v7953_v20  ;;  %v8149_v52 = vsel %vm1038_vm3, %v2035_v39, %v2036_v61  ;;  %v6926_v21 = vld [vmem:[%s9367_s1 + $0x1e4] ss:$8 sps:$4 sm:$0xff]   ;;  %v848_v61 = vpack.c.bf16 %v7889_v33, %v7878_v56  ;;  %v6947_v56 = vld [vmem:[%s9367_s1 + $0x814] ss:$8 sps:$4 sm:$0xff]  }
  0x76   : > { %v8152_v20 = vsel %vm1038_vm3, %v2991_v16, %v2992_v34  ;;  %v6941_v39 = vld [vmem:[%s9367_s1 + $0x804] ss:$8 sps:$4 sm:$0xff]   ;;  %v6939_v16 = vld [vmem:[%s9367_s1 + $0x800] ss:$8 sps:$4 sm:$0xff]   ;;  %v6944_v34 = vld [vmem:[%s9367_s1 + $0x214] ss:$8 sps:$4 sm:$0xff]  }
  0x77   : > { %769 = vmatmul.mubr.bf16.gmra.mrb[4].mxu1 %v7574_v6  ;;  %3136 = vmatmul.mubr.bf16.gmra.mrb[4].mxu0 %v8085_v10  ;;  %v6917_v6 = vld [vmem:[%s9367_s1 + $0x7c4] ss:$8 sps:$4 sm:$0xff]  }
  0x78   : > { %954 = vmatpush1.bf16.msra.mxu1 %v6900_v27  ;;  %3285 = vmatpush1.bf16.msra.mxu0 %v6903_v45  ;;  %v6929_v27 = vld [vmem:[%s9367_s1 + $0x7e4] ss:$8 sps:$4 sm:$0xff]   ;;  %v6924_v45 = vld [vmem:[%s9367_s1 + $0x1e0] ss:$8 sps:$4 sm:$0xff]  }
  0x79   : > { %955 = vmatprep.subr.bf16.mxu1 %v6908_v47  ;;  %3286 = vmatprep.subr.bf16.mxu0 %v6911_v44  ;;  %v8167_v47 = vpack.c.bf16 %v8152_v20, %v8149_v52  ;;  %v6927_v44 = vld [vmem:[%s9367_s1 + $0x7e0] ss:$8 sps:$4 sm:$0xff]  }
  0x7a   : > { %778 = vmatprep.mubr.bf16.mxu1 %v9382_v62  ;;  %3145 = vmatprep.mubr.bf16.mxu0 %v9382_v62 }
  0x7c   : > { %956 = vmatpush1.bf16.msra.mxu1 %v6906_v32  ;;  %3287 = vmatpush1.bf16.msra.mxu0 %v6909_v11  ;;  %v6932_v32 = vld [vmem:[%s9367_s1 + $0x1f4] ss:$8 sps:$4 sm:$0xff]  }
  0x7d   : > { %957 = vmatprep.subr.bf16.mxu1 %v6914_v13  ;;  %3288 = vmatprep.subr.bf16.mxu0 %v6917_v6  ;;  %v6935_v11 = vld [vmem:[%s9367_s1 + $0x7f4] ss:$8 sps:$4 sm:$0xff]   ;;  %v6930_v13 = vld [vmem:[%s9367_s1 + $0x1f0] ss:$8 sps:$4 sm:$0xff]  }
  0x7e   : > { %v6933_v6 = vld [vmem:[%s9367_s1 + $0x7f0] ss:$8 sps:$4 sm:$0xff]  }
  0x7f   : > { %779 = vmatmul.mubr.bf16.gmra.mrb[8].mxu1 %v7653_v49  ;;  %3146 = vmatmul.mubr.bf16.gmra.mrb[8].mxu0 %v8121_v30 }
  0x80   : > { %958 = vmatpush1.bf16.msra.mxu1 %v6912_v7  ;;  %3289 = vmatpush1.bf16.msra.mxu0 %v6915_v12  ;;  %v6938_v7 = vld [vmem:[%s9367_s1 + $0x204] ss:$8 sps:$4 sm:$0xff]   ;;  %v6936_v12 = vld [vmem:[%s9367_s1 + $0x200] ss:$8 sps:$4 sm:$0xff]  }
  0x81   : > { %959 = vmatprep.subr.bf16.mxu1 %v6920_v46  ;;  %3290 = vmatprep.subr.bf16.mxu0 %v6923_v26  ;;  %v6942_v46 = vld [vmem:[%s9367_s1 + $0x210] ss:$8 sps:$4 sm:$0xff]  }
  0x82   : > { %788 = vmatprep.mubr.bf16.mxu1 %v9382_v62  ;;  %3155 = vmatprep.mubr.bf16.mxu0 %v9382_v62  ;;  %v6945_v26 = vld [vmem:[%s9367_s1 + $0x810] ss:$8 sps:$4 sm:$0xff]  }
  0x84   : > { %960 = vmatpush1.bf16.msra.mxu1 %v6918_v29  ;;  %3291 = vmatpush1.bf16.msra.mxu0 %v6921_v42  ;;  %v6950_v29 = vld [vmem:[%s9367_s1 + $0x224] ss:$8 sps:$4 sm:$0xff]  }
  0x85   : > { %961 = vmatprep.subr.bf16.mxu1 %v6926_v21  ;;  %3292 = vmatprep.subr.bf16.mxu0 %v6929_v27  ;;  %v6953_v42 = vld [vmem:[%s9367_s1 + $0x824] ss:$8 sps:$4 sm:$0xff]   ;;  %v6948_v21 = vld [vmem:[%s9367_s1 + $0x220] ss:$8 sps:$4 sm:$0xff]  }
  0x86   : > { %v6951_v27 = vld [vmem:[%s9367_s1 + $0x820] ss:$8 sps:$4 sm:$0xff]  }
  0x87   : > { %789 = vmatmul.mubr.bf16.gmra.mrb[12].mxu1 %v7737_v55  ;;  %3156 = vmatmul.mubr.bf16.gmra.mrb[12].mxu0 %v8167_v47 }
  0x88   : > { %962 = vmatpush1.bf16.msra.mxu1 %v6924_v45  ;;  %3293 = vmatpush1.bf16.msra.mxu0 %v6927_v44  ;;  %v6956_v45 = vld [vmem:[%s9367_s1 + $0x234] ss:$8 sps:$4 sm:$0xff]  }
  0x89   : > { %963 = vmatprep.subr.bf16.mxu1 %v6932_v32  ;;  %3294 = vmatprep.subr.bf16.mxu0 %v6935_v11  ;;  %v6959_v44 = vld [vmem:[%s9367_s1 + $0x834] ss:$8 sps:$4 sm:$0xff]   ;;  %v6954_v32 = vld [vmem:[%s9367_s1 + $0x230] ss:$8 sps:$4 sm:$0xff]  }
  0x8a   : > { %981 = vmatprep.mubr.bf16.mxu1 %v9382_v62  ;;  %3312 = vmatprep.mubr.bf16.mxu0 %v9382_v62  ;;  %v6957_v11 = vld [vmem:[%s9367_s1 + $0x830] ss:$8 sps:$4 sm:$0xff]  }
  0x8c   : > { %964 = vmatpush1.bf16.msra.mxu1 %v6930_v13  ;;  %3295 = vmatpush1.bf16.msra.mxu0 %v6933_v6  ;;  %v6962_v13 = vld [vmem:[%s9367_s1 + $0x244] ss:$8 sps:$4 sm:$0xff]   ;;  %v7344_v6 = vld [vmem:[%s7469_s9 + $0x70] sm:$0xff] }
  0x8d   : > { %1172 = vmatprep.subr.bf16.mxu1 %v6938_v7  ;;  %3473 = vmatprep.subr.bf16.mxu0 %v6941_v39  ;;  %v8253_v7 = vpack.c.bf16 %v7704_v25, %v7344_v6  ;;  %v6960_v39 = vld [vmem:[%s9367_s1 + $0x240] ss:$8 sps:$4 sm:$0xff]   ;;  %v6971_v25 = vld [vmem:[%s9367_s1 + $0x854] ss:$8 sps:$4 sm:$0xff]   ;;  %v1071_v6 = vpack.c.bf16 %v7909_v1, %v7899_v14 }
  0x8e   : > { %v6995_v14 = vld [vmem:[%s9367_s1 + $0x894] ss:$8 sps:$4 sm:$0xff]  }
  0x8f   : > { %982 = vmatmul.mubr.bf16.vlgmr.msra.gmra.mrb[0].mxu1 %v848_v61  ;;  %3313 = vmatmul.mubr.bf16.vlgmr.msra.gmra.mrb[0].mxu0 %v7599_v17  ;;  %v6963_v61 = vld [vmem:[%s9367_s1 + $0x840] ss:$8 sps:$4 sm:$0xff]  }
  0x90   : > { %1173 = vmatpush1.bf16.msra.mxu1 %v6936_v12  ;;  %3474 = vmatpush1.bf16.msra.mxu0 %v6939_v16  ;;  %v6968_v12 = vld [vmem:[%s9367_s1 + $0x254] ss:$8 sps:$4 sm:$0xff]   ;;  %v6966_v16 = vld [vmem:[%s9367_s1 + $0x250] ss:$8 sps:$4 sm:$0xff]  }
  0x91   : > { %1174 = vmatprep.subr.bf16.mxu1 %v6944_v34  ;;  %3475 = vmatprep.subr.bf16.mxu0 %v6947_v56  ;;  %v6969_v34 = vld [vmem:[%s9367_s1 + $0x850] ss:$8 sps:$4 sm:$0xff]   ;;  %v8276_v56 = vld [vmem:[%s7469_s9 + $0xa0] sm:$0xff] }
  0x92   : > { %991 = vmatprep.mubr.bf16.mxu1 %v9382_v62  ;;  %3322 = vmatprep.mubr.bf16.mxu0 %v9382_v62 }
  0x94   : > { %1175 = vmatpush1.bf16.msra.mxu1 %v6942_v46  ;;  %3476 = vmatpush1.bf16.msra.mxu0 %v6945_v26  ;;  %v6974_v46 = vld [vmem:[%s9367_s1 + $0x264] ss:$8 sps:$4 sm:$0xff]  }
  0x95   : > { %1176 = vmatprep.subr.bf16.mxu1 %v6950_v29  ;;  %3477 = vmatprep.subr.bf16.mxu0 %v6953_v42  ;;  %v6977_v26 = vld [vmem:[%s9367_s1 + $0x864] ss:$8 sps:$4 sm:$0xff]   ;;  %v8287_v29 = vld [vmem:[%s7469_s9 + $0x90] sm:$0xff] }
  0x96   : > { %v3182_v42 = vpack.c.bf16 %v8276_v56, %v8287_v29 }
  0x97   : > { %992 = vmatmul.mubr.bf16.gmra.mrb[4].mxu1 %v7859_v19  ;;  %3323 = vmatmul.mubr.bf16.gmra.mrb[4].mxu0 %v7672_v0  ;;  %v6965_v19 = vld [vmem:[%s9367_s1 + $0x844] ss:$8 sps:$4 sm:$0xff]  }
  0x98   : > { %1177 = vmatpush1.bf16.msra.mxu1 %v6948_v21  ;;  %3478 = vmatpush1.bf16.msra.mxu0 %v6951_v27  ;;  %v6972_v21 = vld [vmem:[%s9367_s1 + $0x260] ss:$8 sps:$4 sm:$0xff]  }
  0x99   : > { %1178 = vmatprep.subr.bf16.mxu1 %v6956_v45  ;;  %3479 = vmatprep.subr.bf16.mxu0 %v6959_v44  ;;  %v6975_v27 = vld [vmem:[%s9367_s1 + $0x860] ss:$8 sps:$4 sm:$0xff]   ;;  %v6980_v45 = vld [vmem:[%s9367_s1 + $0x274] ss:$8 sps:$4 sm:$0xff]  }
  0x9a   : > { %1001 = vmatprep.mubr.bf16.mxu1 %v9382_v62  ;;  %3332 = vmatprep.mubr.bf16.mxu0 %v9382_v62  ;;  %v6983_v44 = vld [vmem:[%s9367_s1 + $0x874] ss:$8 sps:$4 sm:$0xff]  }
  0x9c   : > { %1179 = vmatpush1.bf16.msra.mxu1 %v6954_v32  ;;  %3480 = vmatpush1.bf16.msra.mxu0 %v6957_v11  ;;  %v6978_v32 = vld [vmem:[%s9367_s1 + $0x270] ss:$8 sps:$4 sm:$0xff]  }
  0x9d   : > { %1180 = vmatprep.subr.bf16.mxu1 %v6962_v13  ;;  %3481 = vmatprep.subr.bf16.mxu0 %v6965_v19  ;;  %v6981_v11 = vld [vmem:[%s9367_s1 + $0x870] ss:$8 sps:$4 sm:$0xff]   ;;  %v6986_v13 = vld [vmem:[%s9367_s1 + $0x284] ss:$8 sps:$4 sm:$0xff]  }
  0x9e   : > { %v6989_v19 = vld [vmem:[%s9367_s1 + $0x884] ss:$8 sps:$4 sm:$0xff]  }
  0x9f   : > { %1002 = vmatmul.mubr.bf16.gmra.mrb[8].mxu1 %v7920_v35  ;;  %3333 = vmatmul.mubr.bf16.gmra.mrb[8].mxu0 %v8253_v7 }
  0xa0   : > { %1181 = vmatpush1.bf16.msra.mxu1 %v6960_v39  ;;  %3482 = vmatpush1.bf16.msra.mxu0 %v6963_v61  ;;  %v6984_v39 = vld [vmem:[%s9367_s1 + $0x280] ss:$8 sps:$4 sm:$0xff]  }
  0xa1   : > { %1182 = vmatprep.subr.bf16.mxu1 %v6968_v12  ;;  %3483 = vmatprep.subr.bf16.mxu0 %v6971_v25  ;;  %v6987_v61 = vld [vmem:[%s9367_s1 + $0x880] ss:$8 sps:$4 sm:$0xff]   ;;  %v6992_v12 = vld [vmem:[%s9367_s1 + $0x294] ss:$8 sps:$4 sm:$0xff]   ;;  %v6990_v25 = vld [vmem:[%s9367_s1 + $0x290] ss:$8 sps:$4 sm:$0xff]  }
  0xa2   : > { %1011 = vmatprep.mubr.bf16.mxu1 %v9382_v62  ;;  %3342 = vmatprep.mubr.bf16.mxu0 %v9382_v62 }
  0xa4   : > { %1183 = vmatpush1.bf16.msra.mxu1 %v6966_v16  ;;  %3484 = vmatpush1.bf16.msra.mxu0 %v6969_v34  ;;  %v6993_v16 = vld [vmem:[%s9367_s1 + $0x890] ss:$8 sps:$4 sm:$0xff]   ;;  %v6998_v34 = vld [vmem:[%s9367_s1 + $0x2a4] ss:$8 sps:$4 sm:$0xff]  }
  0xa5   : > { %1184 = vmatprep.subr.bf16.mxu1 %v6974_v46  ;;  %3485 = vmatprep.subr.bf16.mxu0 %v6977_v26  ;;  %v7001_v46 = vld [vmem:[%s9367_s1 + $0x8a4] ss:$8 sps:$4 sm:$0xff]  }
  0xa6   : > { %v7346_v26 = vld [vmem:[%s7469_s9 + $0x80] sm:$0xff] }
  0xa7   : > { %1012 = vmatmul.mubr.bf16.gmra.mrb[12].mxu1 %v7970_v36  ;;  %3343 = vmatmul.mubr.bf16.gmra.mrb[12].mxu0 %v3182_v42  ;;  %v1453_v42 = vrot.slane %v7346_v26, 1  ;;  %v7011_v26 = vld [vmem:[%s9367_s1 + $0x8c0] ss:$8 sps:$4 sm:$0xff]  }
  0xa8   : > { %1185 = vmatpush1.bf16.msra.mxu1 %v6972_v21  ;;  %3486 = vmatpush1.bf16.msra.mxu0 %v6975_v27  ;;  %v6996_v21 = vld [vmem:[%s9367_s1 + $0x2a0] ss:$8 sps:$4 sm:$0xff]  }
  0xa9   : > { %1186 = vmatprep.subr.bf16.mxu1 %v6980_v45  ;;  %3487 = vmatprep.subr.bf16.mxu0 %v6983_v44  ;;  %v6999_v27 = vld [vmem:[%s9367_s1 + $0x8a0] ss:$8 sps:$4 sm:$0xff]  }
  0xaa   : > { %1204 = vmatprep.mubr.bf16.mxu1 %v9382_v62  ;;  %3505 = vmatprep.mubr.bf16.mxu0 %v9382_v62  ;;  %v7347_v45 = vld [vmem:[%s7469_s9 + $0x88] sm:$0xf] }
  0xab   : > { %v1454_v44 = vrot.slane %v7347_v45, 1 }
  0xac   : > { %1187 = vmatpush1.bf16.msra.mxu1 %v6978_v32  ;;  %3488 = vmatpush1.bf16.msra.mxu0 %v6981_v11  ;;  %v7004_v32 = vld [vmem:[%s9367_s1 + $0x2b4] ss:$8 sps:$4 sm:$0xff]  }
  0xad   : > { %1362 = vmatprep.subr.bf16.mxu1 %v6986_v13  ;;  %3664 = vmatprep.subr.bf16.mxu0 %v6989_v19  ;;  %v7007_v11 = vld [vmem:[%s9367_s1 + $0x8b4] ss:$8 sps:$4 sm:$0xff]   ;;  %v7002_v13 = vld [vmem:[%s9367_s1 + $0x2b0] ss:$8 sps:$4 sm:$0xff]  }
  0xae   : > { %v7005_v19 = vld [vmem:[%s9367_s1 + $0x8b0] ss:$8 sps:$4 sm:$0xff]  }
  0xaf   : > { %1205 = vmatmul.mubr.bf16.vlgmr.msra.gmra.mrb[0].mxu1 %v1071_v6  ;;  %3506 = vmatmul.mubr.bf16.vlgmr.msra.gmra.mrb[0].mxu0 %v7641_v43  ;;  %v7010_v6 = vld [vmem:[%s9367_s1 + $0x2c4] ss:$8 sps:$4 sm:$0xff]  }
  0xb0   : > { %1363 = vmatpush1.bf16.msra.mxu1 %v6984_v39  ;;  %3665 = vmatpush1.bf16.msra.mxu0 %v6987_v61  ;;  %v8373_v39 = vsel %vm232_vm0, %v1453_v42, %v1454_v44  ;;  %v8379_v61 = vld [vmem:[%s7469_s9 + $0xa8] sm:$0xf] }
  0xb1   : > { %1364 = vmatprep.subr.bf16.mxu1 %v6992_v12  ;;  %3666 = vmatprep.subr.bf16.mxu0 %v6995_v14  ;;  %v8385_v12 = vpack.c.bf16 %v8373_v39, %v7760_v8  ;;  %v2418_v14 = vrot.slane %v8287_v29, 1  ;;  %v3372_v42 = vrot.slane %v8379_v61, 1  ;;  %v7016_v8 = vld [vmem:[%s9367_s1 + $0x2d4] ss:$8 sps:$4 sm:$0xff]  }
  0xb2   : > { %1214 = vmatprep.mubr.bf16.mxu1 %v9382_v62  ;;  %3515 = vmatprep.mubr.bf16.mxu0 %v9382_v62  ;;  %v7019_v29 = vld [vmem:[%s9367_s1 + $0x8d4] ss:$8 sps:$4 sm:$0xff]  }
  0xb4   : > { %1365 = vmatpush1.bf16.msra.mxu1 %v6990_v25  ;;  %3667 = vmatpush1.bf16.msra.mxu0 %v6993_v16  ;;  %v7348_v25 = vld [vmem:[%s7469_s9 + $0x98] sm:$0xf] }
  0xb5   : > { %1366 = vmatprep.subr.bf16.mxu1 %v6998_v34  ;;  %3668 = vmatprep.subr.bf16.mxu0 %v7001_v46  ;;  %v2419_v16 = vrot.slane %v7348_v25, 1  ;;  %v3371_v34 = vrot.slane %v8276_v56, 1  ;;  %v7008_v46 = vld [vmem:[%s9367_s1 + $0x2c0] ss:$8 sps:$4 sm:$0xff]   ;;  %v7026_v25 = vld [vmem:[%s9367_s1 + $0x2f0] ss:$8 sps:$4 sm:$0xff]  }
  0xb7   : > { %1215 = vmatmul.mubr.bf16.gmra.mrb[4].mxu1 %v8051_v57  ;;  %3516 = vmatmul.mubr.bf16.gmra.mrb[4].mxu0 %v7701_v23  ;;  %v7013_v57 = vld [vmem:[%s9367_s1 + $0x8c4] ss:$8 sps:$4 sm:$0xff]   ;;  %v8412_v45 = vsel %vm232_vm0, %v2418_v14, %v2419_v16  ;;  %v8415_v44 = vsel %vm232_vm0, %v3371_v34, %v3372_v42  ;;  %v7031_v14 = vld [vmem:[%s9367_s1 + $0x8f4] ss:$8 sps:$4 sm:$0xff]   ;;  %v7029_v16 = vld [vmem:[%s9367_s1 + $0x8f0] ss:$8 sps:$4 sm:$0xff]  }
  0xb8   : > { %1367 = vmatpush1.bf16.msra.mxu1 %v6996_v21  ;;  %3669 = vmatpush1.bf16.msra.mxu0 %v6999_v27  ;;  %v7014_v21 = vld [vmem:[%s9367_s1 + $0x2d0] ss:$8 sps:$4 sm:$0xff]   ;;  %v7034_v34 = vld [vmem:[%s9367_s1 + $0x304] ss:$8 sps:$4 sm:$0xff]   ;;  %v7035_v42 = vld [vmem:[%s9367_s1 + $0x900] ss:$8 sps:$4 sm:$0xff]  }
  0xb9   : > { %1368 = vmatprep.subr.bf16.mxu1 %v7004_v32  ;;  %3670 = vmatprep.subr.bf16.mxu0 %v7007_v11  ;;  %v7017_v27 = vld [vmem:[%s9367_s1 + $0x8d0] ss:$8 sps:$4 sm:$0xff]   ;;  %v7022_v32 = vld [vmem:[%s9367_s1 + $0x2e4] ss:$8 sps:$4 sm:$0xff]  }
  0xba   : > { %1224 = vmatprep.mubr.bf16.mxu1 %v9382_v62  ;;  %3525 = vmatprep.mubr.bf16.mxu0 %v9382_v62  ;;  %v7025_v11 = vld [vmem:[%s9367_s1 + $0x8e4] ss:$8 sps:$4 sm:$0xff]  }
  0xbc   : > { %1369 = vmatpush1.bf16.msra.mxu1 %v7002_v13  ;;  %3671 = vmatpush1.bf16.msra.mxu0 %v7005_v19  ;;  %v3375_v13 = vpack.c.bf16 %v8415_v44, %v8412_v45  ;;  %v7020_v19 = vld [vmem:[%s9367_s1 + $0x2e0] ss:$8 sps:$4 sm:$0xff]  }
  0xbd   : > { %1370 = vmatprep.subr.bf16.mxu1 %v7010_v6  ;;  %3672 = vmatprep.subr.bf16.mxu0 %v7013_v57  ;;  %v7023_v6 = vld [vmem:[%s9367_s1 + $0x8e0] ss:$8 sps:$4 sm:$0xff]   ;;  %v7028_v57 = vld [vmem:[%s9367_s1 + $0x2f4] ss:$8 sps:$4 sm:$0xff]  }
  0xbf   : > { %1225 = vmatmul.mubr.bf16.gmra.mrb[8].mxu1 %v8085_v10  ;;  %3526 = vmatmul.mubr.bf16.gmra.mrb[8].mxu0 %v8385_v12 }
  0xc0   : > { %1371 = vmatpush1.bf16.msra.mxu1 %v7008_v46  ;;  %3673 = vmatpush1.bf16.msra.mxu0 %v7011_v26  ;;  %v7037_v46 = vld [vmem:[%s9367_s1 + $0x904] ss:$8 sps:$4 sm:$0xff]   ;;  %v7032_v26 = vld [vmem:[%s9367_s1 + $0x300] ss:$8 sps:$4 sm:$0xff]  }
  0xc1   : > { %1372 = vmatprep.subr.bf16.mxu1 %v7016_v8  ;;  %3674 = vmatprep.subr.bf16.mxu0 %v7019_v29  ;;  %v7040_v8 = vld [vmem:[%s9367_s1 + $0x314] ss:$8 sps:$4 sm:$0xff]  }
  0xc2   : > { %1234 = vmatprep.mubr.bf16.mxu1 %v9382_v62  ;;  %3535 = vmatprep.mubr.bf16.mxu0 %v9382_v62  ;;  %v7043_v29 = vld [vmem:[%s9367_s1 + $0x914] ss:$8 sps:$4 sm:$0xff]  }
  0xc4   : > { %1373 = vmatpush1.bf16.msra.mxu1 %v7014_v21  ;;  %3675 = vmatpush1.bf16.msra.mxu0 %v7017_v27  ;;  %v9384_v21 = vpack.c.bf16 %v7509_v38, %v7496_v31  ;;  %v7038_v27 = vld [vmem:[%s9367_s1 + $0x310] ss:$8 sps:$4 sm:$0xff]   ;;  %v7049_v31 = vld [vmem:[%s9367_s1 + $0x924] ss:$8 sps:$4 sm:$0xff]   ;;  %v7044_v38 = vld [vmem:[%s9367_s1 + $0x320] ss:$8 sps:$4 sm:$0xff]  }
  0xc5   : > { %1374 = vmatprep.subr.bf16.mxu1 %v7022_v32  ;;  %3676 = vmatprep.subr.bf16.mxu0 %v7025_v11  ;;  %v7041_v32 = vld [vmem:[%s9367_s1 + $0x910] ss:$8 sps:$4 sm:$0xff]   ;;  %v7046_v11 = vld [vmem:[%s9367_s1 + $0x324] ss:$8 sps:$4 sm:$0xff]  }
  0xc7   : > { %1235 = vmatmul.mubr.bf16.gmra.mrb[12].mxu1 %v8121_v30  ;;  %3536 = vmatmul.mubr.bf16.gmra.mrb[12].mxu0 %v3375_v13  ;;  %v7047_v13 = vld [vmem:[%s9367_s1 + $0x920] ss:$8 sps:$4 sm:$0xff]  }
  0xc8   : > { %1375 = vmatpush1.bf16.msra.mxu1 %v7020_v19  ;;  %3677 = vmatpush1.bf16.msra.mxu0 %v7023_v6  ;;  %v7052_v19 = vld [vmem:[%s9367_s1 + $0x334] ss:$8 sps:$4 sm:$0xff]  }
  0xc9   : > { %1376 = vmatprep.subr.bf16.mxu1 %v7028_v57  ;;  %3678 = vmatprep.subr.bf16.mxu0 %v7031_v14  ;;  %v7055_v6 = vld [vmem:[%s9367_s1 + $0x934] ss:$8 sps:$4 sm:$0xff]   ;;  %v7050_v57 = vld [vmem:[%s9367_s1 + $0x330] ss:$8 sps:$4 sm:$0xff]  }
  0xca   : > { %1394 = vmatprep.mubr.bf16.mxu1 %v9382_v62  ;;  %3696 = vmatprep.mubr.bf16.mxu0 %v9382_v62  ;;  %v7053_v14 = vld [vmem:[%s9367_s1 + $0x930] ss:$8 sps:$4 sm:$0xff]  }
  0xcc   : > { %1377 = vmatpush1.bf16.msra.mxu1 %v7026_v25  ;;  %3679 = vmatpush1.bf16.msra.mxu0 %v7029_v16  ;;  %v7058_v25 = vld [vmem:[%s9367_s1 + $0x344] ss:$8 sps:$4 sm:$0xff]   ;;  %v3562_v16 = vrot.slane %v8276_v56, 2 }
  0xcd   : > { %1558 = vmatprep.subr.bf16.mxu1 %v7034_v34  ;;  %3855 = vmatprep.subr.bf16.mxu0 %v7037_v46  ;;  %v7056_v34 = vld [vmem:[%s9367_s1 + $0x340] ss:$8 sps:$4 sm:$0xff]  }
  0xce   : > { %v7059_v46 = vld [vmem:[%s9367_s1 + $0x940] ss:$8 sps:$4 sm:$0xff]  }
  0xcf   : > { %1395 = vmatmul.mubr.bf16.vlgmr.msra.gmra.mrb[0].mxu1 %v9384_v21  ;;  %3697 = vmatmul.mubr.bf16.vlgmr.msra.gmra.mrb[0].mxu0 %v7610_v24  ;;  %v7065_v21 = vld [vmem:[%s9367_s1 + $0x950] ss:$8 sps:$4 sm:$0xff]  }
  0xd0   : > { %1559 = vmatpush1.bf16.msra.mxu1 %v7032_v26  ;;  %3856 = vmatpush1.bf16.msra.mxu0 %v7035_v42  ;;  %v3563_v26 = vrot.slane %v8379_v61, 2  ;;  %v7064_v42 = vld [vmem:[%s9367_s1 + $0x354] ss:$8 sps:$4 sm:$0xff]  }
  0xd1   : > { %1560 = vmatprep.subr.bf16.mxu1 %v7040_v8  ;;  %3857 = vmatprep.subr.bf16.mxu0 %v7043_v29  ;;  %v7067_v8 = vld [vmem:[%s9367_s1 + $0x954] ss:$8 sps:$4 sm:$0xff]   ;;  %v7062_v29 = vld [vmem:[%s9367_s1 + $0x350] ss:$8 sps:$4 sm:$0xff]  }
  0xd2   : > { %1404 = vmatprep.mubr.bf16.mxu1 %v9382_v62  ;;  %3706 = vmatprep.mubr.bf16.mxu0 %v9382_v62 }
  0xd4   : > { %1561 = vmatpush1.bf16.msra.mxu1 %v7038_v27  ;;  %3858 = vmatpush1.bf16.msra.mxu0 %v7041_v32  ;;  %v8535_v27 = vsel %vm592_vm1, %v3562_v16, %v3563_v26  ;;  %v7073_v32 = vld [vmem:[%s9367_s1 + $0x964] ss:$8 sps:$4 sm:$0xff]   ;;  %v7091_v16 = vld [vmem:[%s9367_s1 + $0x994] ss:$8 sps:$4 sm:$0xff]   ;;  %v7089_v26 = vld [vmem:[%s9367_s1 + $0x990] ss:$8 sps:$4 sm:$0xff]  }
  0xd5   : > { %1562 = vmatprep.subr.bf16.mxu1 %v7046_v11  ;;  %3859 = vmatprep.subr.bf16.mxu0 %v7049_v31  ;;  %v3566_v11 = vpack.c.bf16 %v8535_v27, %v7769_v18  ;;  %v7068_v31 = vld [vmem:[%s9367_s1 + $0x360] ss:$8 sps:$4 sm:$0xff]   ;;  %v7079_v18 = vld [vmem:[%s9367_s1 + $0x974] ss:$8 sps:$4 sm:$0xff]  }
  0xd7   : > { %1405 = vmatmul.mubr.bf16.gmra.mrb[4].mxu1 %v7599_v17  ;;  %3707 = vmatmul.mubr.bf16.gmra.mrb[4].mxu0 %v7936_v9  ;;  %v7061_v17 = vld [vmem:[%s9367_s1 + $0x944] ss:$8 sps:$4 sm:$0xff]  }
  0xd8   : > { %1563 = vmatpush1.bf16.msra.mxu1 %v7044_v38  ;;  %3860 = vmatpush1.bf16.msra.mxu0 %v7047_v13  ;;  %v7071_v38 = vld [vmem:[%s9367_s1 + $0x960] ss:$8 sps:$4 sm:$0xff]   ;;  %v7076_v13 = vld [vmem:[%s9367_s1 + $0x374] ss:$8 sps:$4 sm:$0xff]  }
  0xd9   : > { %1564 = vmatprep.subr.bf16.mxu1 %v7052_v19  ;;  %3861 = vmatprep.subr.bf16.mxu0 %v7055_v6  ;;  %v7074_v19 = vld [vmem:[%s9367_s1 + $0x370] ss:$8 sps:$4 sm:$0xff]  }
  0xda   : > { %1414 = vmatprep.mubr.bf16.mxu1 %v9382_v62  ;;  %3716 = vmatprep.mubr.bf16.mxu0 %v9382_v62  ;;  %v7077_v6 = vld [vmem:[%s9367_s1 + $0x970] ss:$8 sps:$4 sm:$0xff]  }
  0xdc   : > { %1565 = vmatpush1.bf16.msra.mxu1 %v7050_v57  ;;  %3862 = vmatpush1.bf16.msra.mxu0 %v7053_v14  ;;  %v7082_v57 = vld [vmem:[%s9367_s1 + $0x384] ss:$8 sps:$4 sm:$0xff]   ;;  %v7080_v14 = vld [vmem:[%s9367_s1 + $0x380] ss:$8 sps:$4 sm:$0xff]  }
  0xdd   : > { %1566 = vmatprep.subr.bf16.mxu1 %v7058_v25  ;;  %3863 = vmatprep.subr.bf16.mxu0 %v7061_v17  ;;  %v7083_v25 = vld [vmem:[%s9367_s1 + $0x980] ss:$8 sps:$4 sm:$0xff]   ;;  %v7088_v17 = vld [vmem:[%s9367_s1 + $0x394] ss:$8 sps:$4 sm:$0xff]  }
  0xdf   : > { %1415 = vmatmul.mubr.bf16.gmra.mrb[8].mxu1 %v7672_v0  ;;  %3717 = vmatmul.mubr.bf16.gmra.mrb[8].mxu0 %v7986_v41  ;;  %v7070_v0 = vld [vmem:[%s9367_s1 + $0x364] ss:$8 sps:$4 sm:$0xff]  }
  0xe0   : > { %1567 = vmatpush1.bf16.msra.mxu1 %v7056_v34  ;;  %3864 = vmatpush1.bf16.msra.mxu0 %v7059_v46  ;;  %v9385_v34 = vpack.c.bf16 %v7571_v5, %v7529_v48  ;;  %v7086_v46 = vld [vmem:[%s9367_s1 + $0x390] ss:$8 sps:$4 sm:$0xff]   ;;  %v7097_v48 = vld [vmem:[%s9367_s1 + $0x9a4] ss:$8 sps:$4 sm:$0xff]   ;;  %v7092_v5 = vld [vmem:[%s9367_s1 + $0x3a0] ss:$8 sps:$4 sm:$0xff]  }
  0xe1   : > { %1568 = vmatprep.subr.bf16.mxu1 %v7064_v42  ;;  %3865 = vmatprep.subr.bf16.mxu0 %v7067_v8  ;;  %v7094_v42 = vld [vmem:[%s9367_s1 + $0x3a4] ss:$8 sps:$4 sm:$0xff]   ;;  %v7095_v8 = vld [vmem:[%s9367_s1 + $0x9a0] ss:$8 sps:$4 sm:$0xff]  }
  0xe2   : > { %1424 = vmatprep.mubr.bf16.mxu1 %v9382_v62  ;;  %3726 = vmatprep.mubr.bf16.mxu0 %v9382_v62 }
  0xe4   : > { %1569 = vmatpush1.bf16.msra.mxu1 %v7062_v29  ;;  %3866 = vmatpush1.bf16.msra.mxu0 %v7065_v21  ;;  %v7100_v29 = vld [vmem:[%s9367_s1 + $0x3b4] ss:$8 sps:$4 sm:$0xff]  }
  0xe5   : > { %1570 = vmatprep.subr.bf16.mxu1 %v7070_v0  ;;  %3867 = vmatprep.subr.bf16.mxu0 %v7073_v32  ;;  %v7103_v21 = vld [vmem:[%s9367_s1 + $0x9b4] ss:$8 sps:$4 sm:$0xff]   ;;  %v7098_v0 = vld [vmem:[%s9367_s1 + $0x3b0] ss:$8 sps:$4 sm:$0xff]  }
  0xe6   : > { %v7101_v32 = vld [vmem:[%s9367_s1 + $0x9b0] ss:$8 sps:$4 sm:$0xff]  }
  0xe7   : > { %1425 = vmatmul.mubr.bf16.gmra.mrb[12].mxu1 %v8253_v7  ;;  %3727 = vmatmul.mubr.bf16.gmra.mrb[12].mxu0 %v3566_v11  ;;  %v7085_v7 = vld [vmem:[%s9367_s1 + $0x984] ss:$8 sps:$4 sm:$0xff]  }
  0xe8   : > { %1571 = vmatpush1.bf16.msra.mxu1 %v7068_v31  ;;  %3868 = vmatpush1.bf16.msra.mxu0 %v7071_v38  ;;  %v7106_v11 = vld [vmem:[%s9367_s1 + $0x3c4] ss:$8 sps:$4 sm:$0xff]   ;;  %v7104_v31 = vld [vmem:[%s9367_s1 + $0x3c0] ss:$8 sps:$4 sm:$0xff]  }
  0xe9   : > { %1572 = vmatprep.subr.bf16.mxu1 %v7076_v13  ;;  %3869 = vmatprep.subr.bf16.mxu0 %v7079_v18  ;;  %v7107_v38 = vld [vmem:[%s9367_s1 + $0x9c0] ss:$8 sps:$4 sm:$0xff]   ;;  %v7112_v13 = vld [vmem:[%s9367_s1 + $0x3d4] ss:$8 sps:$4 sm:$0xff]   ;;  %v3753_v18 = vrot.slane %v8276_v56, 3 }
  0xea   : > { %1590 = vmatprep.mubr.bf16.mxu1 %v9382_v62  ;;  %3887 = vmatprep.mubr.bf16.mxu0 %v9382_v62  ;;  %v7113_v56 = vld [vmem:[%s9367_s1 + $0x9d0] ss:$8 sps:$4 sm:$0xff]  }
  0xec   : > { %1573 = vmatpush1.bf16.msra.mxu1 %v7074_v19  ;;  %3870 = vmatpush1.bf16.msra.mxu0 %v7077_v6  ;;  %v3754_v19 = vrot.slane %v8379_v61, 3  ;;  %v7115_v6 = vld [vmem:[%s9367_s1 + $0x9d4] ss:$8 sps:$4 sm:$0xff]  }
  0xed   : > { %1752 = vmatprep.subr.bf16.mxu1 %v7082_v57  ;;  %4046 = vmatprep.subr.bf16.mxu0 %v7085_v7  ;;  %v7110_v57 = vld [vmem:[%s9367_s1 + $0x3d0] ss:$8 sps:$4 sm:$0xff]   ;;  %v7118_v7 = vld [vmem:[%s9367_s1 + $0x3e4] ss:$8 sps:$4 sm:$0xff]  }
  0xef   : > { %1591 = vmatmul.mubr.bf16.vlgmr.msra.gmra.mrb[0].mxu1 %v9385_v34  ;;  %3888 = vmatmul.mubr.bf16.vlgmr.msra.gmra.mrb[0].mxu0 %v7731_v50  ;;  %v7124_v34 = vld [vmem:[%s9367_s1 + $0x3f4] ss:$8 sps:$4 sm:$0xff]  }
  0xf0   : > { %1753 = vmatpush1.bf16.msra.mxu1 %v7080_v14  ;;  %4047 = vmatpush1.bf16.msra.mxu0 %v7083_v25  ;;  %v8658_v14 = vsel %vm815_vm2, %v3753_v18, %v3754_v19  ;;  %v7116_v25 = vld [vmem:[%s9367_s1 + $0x3e0] ss:$8 sps:$4 sm:$0xff]   ;;  %v7154_v18 = vld [vmem:[%s9367_s1 + $0x444] ss:$8 sps:$4 sm:$0xff]  }
  0xf1   : > { %1754 = vmatprep.subr.bf16.mxu1 %v7088_v17  ;;  %4048 = vmatprep.subr.bf16.mxu0 %v7091_v16  ;;  %v3757_v17 = vpack.c.bf16 %v8658_v14, %v8003_v15  ;;  %v7119_v16 = vld [vmem:[%s9367_s1 + $0x9e0] ss:$8 sps:$4 sm:$0xff]   ;;  %v7122_v15 = vld [vmem:[%s9367_s1 + $0x3f0] ss:$8 sps:$4 sm:$0xff]  }
  0xf2   : > { %1600 = vmatprep.mubr.bf16.mxu1 %v9382_v62  ;;  %3897 = vmatprep.mubr.bf16.mxu0 %v9382_v62  ;;  %v7152_v19 = vld [vmem:[%s9367_s1 + $0x440] ss:$8 sps:$4 sm:$0xff]  }
  0xf4   : > { %1755 = vmatpush1.bf16.msra.mxu1 %v7086_v46  ;;  %4049 = vmatpush1.bf16.msra.mxu0 %v7089_v26  ;;  %v7127_v46 = vld [vmem:[%s9367_s1 + $0x9f4] ss:$8 sps:$4 sm:$0xff]   ;;  %v7125_v26 = vld [vmem:[%s9367_s1 + $0x9f0] ss:$8 sps:$4 sm:$0xff]  }
  0xf5   : > { %1756 = vmatprep.subr.bf16.mxu1 %v7094_v42  ;;  %4050 = vmatprep.subr.bf16.mxu0 %v7097_v48  ;;  %v7130_v42 = vld [vmem:[%s9367_s1 + $0x404] ss:$8 sps:$4 sm:$0xff]   ;;  %v7128_v48 = vld [vmem:[%s9367_s1 + $0x400] ss:$8 sps:$4 sm:$0xff]  }
  0xf7   : > { %1601 = vmatmul.mubr.bf16.gmra.mrb[4].mxu1 %v7641_v43  ;;  %3898 = vmatmul.mubr.bf16.gmra.mrb[4].mxu0 %v8098_v37  ;;  %v7109_v43 = vld [vmem:[%s9367_s1 + $0x9c4] ss:$8 sps:$4 sm:$0xff]  }
  0xf8   : > { %1757 = vmatpush1.bf16.msra.mxu1 %v7092_v5  ;;  %4051 = vmatpush1.bf16.msra.mxu0 %v7095_v8  ;;  %v7131_v5 = vld [vmem:[%s9367_s1 + $0xa00] ss:$8 sps:$4 sm:$0xff]   ;;  %v7136_v8 = vld [vmem:[%s9367_s1 + $0x414] ss:$8 sps:$4 sm:$0xff]  }
  0xf9   : > { %1758 = vmatprep.subr.bf16.mxu1 %v7100_v29  ;;  %4052 = vmatprep.subr.bf16.mxu0 %v7103_v21  ;;  %v7139_v29 = vld [vmem:[%s9367_s1 + $0xa14] ss:$8 sps:$4 sm:$0xff]   ;;  %v9386_v21 = vpack.c.bf16 %v7549_v58, %v7538_v53  ;;  %v7145_v53 = vld [vmem:[%s9367_s1 + $0xa24] ss:$8 sps:$4 sm:$0xff]   ;;  %v7140_v58 = vld [vmem:[%s9367_s1 + $0x420] ss:$8 sps:$4 sm:$0xff]  }
  0xfa   : > { %1610 = vmatprep.mubr.bf16.mxu1 %v9382_v62  ;;  %3907 = vmatprep.mubr.bf16.mxu0 %v9382_v62 }
  0xfc   : > { %1759 = vmatpush1.bf16.msra.mxu1 %v7098_v0  ;;  %4053 = vmatpush1.bf16.msra.mxu0 %v7101_v32  ;;  %v7134_v0 = vld [vmem:[%s9367_s1 + $0x410] ss:$8 sps:$4 sm:$0xff]  }
  0xfd   : > { %1760 = vmatprep.subr.bf16.mxu1 %v7106_v11  ;;  %4054 = vmatprep.subr.bf16.mxu0 %v7109_v43  ;;  %v7137_v32 = vld [vmem:[%s9367_s1 + $0xa10] ss:$8 sps:$4 sm:$0xff]   ;;  %v7142_v11 = vld [vmem:[%s9367_s1 + $0x424] ss:$8 sps:$4 sm:$0xff]   ;;  %v8729_v43 = vpack.c.bf16 %v7839_v2, %v7825_v22 }
  0xfe   : > { %v7146_v2 = vld [vmem:[%s9367_s1 + $0x430] ss:$8 sps:$4 sm:$0xff]  }
  0xff   : > { %1611 = vmatmul.mubr.bf16.gmra.mrb[8].mxu1 %v7701_v23  ;;  %3908 = vmatmul.mubr.bf16.gmra.mrb[8].mxu0 %v8138_v40  ;;  %v7121_v23 = vld [vmem:[%s9367_s1 + $0x9e4] ss:$8 sps:$4 sm:$0xff]   ;;  %v7149_v22 = vld [vmem:[%s9367_s1 + $0xa30] ss:$8 sps:$4 sm:$0xff]  }
 0x100   : > { %1761 = vmatpush1.bf16.msra.mxu1 %v7104_v31  ;;  %4055 = vmatpush1.bf16.msra.mxu0 %v7107_v38  ;;  %v7143_v31 = vld [vmem:[%s9367_s1 + $0xa20] ss:$8 sps:$4 sm:$0xff]   ;;  %v7148_v38 = vld [vmem:[%s9367_s1 + $0x434] ss:$8 sps:$4 sm:$0xff]  }
 0x101   : > { %1762 = vmatprep.subr.bf16.mxu1 %v7112_v13  ;;  %4056 = vmatprep.subr.bf16.mxu0 %v7115_v6  ;;  %v7151_v13 = vld [vmem:[%s9367_s1 + $0xa34] ss:$8 sps:$4 sm:$0xff]   ;;  %v7155_v6 = vld [vmem:[%s9367_s1 + $0xa40] ss:$8 sps:$4 sm:$0xff]  }
 0x102   : > { %1620 = vmatprep.mubr.bf16.mxu1 %v9382_v62  ;;  %3917 = vmatprep.mubr.bf16.mxu0 %v9382_v62 }
 0x104   : > { %1763 = vmatpush1.bf16.msra.mxu1 %v7110_v57  ;;  %4057 = vmatpush1.bf16.msra.mxu0 %v7113_v56  ;;  %v8764_v57 = vpack.c.bf16 %v8149_v52, %v7850_v60  ;;  %v8767_v56 = vld [vmem:[%s7469_s9 + $0xa0] sm:$0xff]  ;;  %v7158_v60 = vld [vmem:[%s9367_s1 + $0x450] ss:$8 sps:$4 sm:$0xff]  }
 0x105   : > { %1764 = vmatprep.subr.bf16.mxu1 %v7118_v7  ;;  %4058 = vmatprep.subr.bf16.mxu0 %v7121_v23  ;;  %v3944_v7 = vrot.slane %v8767_v56, 4  ;;  %v3945_v23 = vrot.slane %v8379_v61, 4  ;;  %v7161_v52 = vld [vmem:[%s9367_s1 + $0xa50] ss:$8 sps:$4 sm:$0xff]  }
 0x107   : > { %1621 = vmatmul.mubr.bf16.gmra.mrb[12].mxu1 %v8385_v12  ;;  %3918 = vmatmul.mubr.bf16.gmra.mrb[12].mxu0 %v3757_v17  ;;  %v7133_v12 = vld [vmem:[%s9367_s1 + $0xa04] ss:$8 sps:$4 sm:$0xff]   ;;  %v7163_v17 = vld [vmem:[%s9367_s1 + $0xa54] ss:$8 sps:$4 sm:$0xff]   ;;  %v8786_v61 = vsel %vm1038_vm3, %v3944_v7, %v3945_v23  ;;  %v7203_v7 = vld [vmem:[%s9367_s1 + $0xac0] ss:$8 sps:$4 sm:$0xff]  }
 0x108   : > { %1765 = vmatpush1.bf16.msra.mxu1 %v7116_v25  ;;  %4059 = vmatpush1.bf16.msra.mxu0 %v7119_v16  ;;  %v7160_v25 = vld [vmem:[%s9367_s1 + $0x454] ss:$8 sps:$4 sm:$0xff]   ;;  %v7169_v16 = vld [vmem:[%s9367_s1 + $0xa64] ss:$8 sps:$4 sm:$0xff]  }
 0x109   : > { %1766 = vmatprep.subr.bf16.mxu1 %v7124_v34  ;;  %4060 = vmatprep.subr.bf16.mxu0 %v7127_v46  ;;  %v3948_v34 = vpack.c.bf16 %v8786_v61, %v8152_v20  ;;  %v7164_v46 = vld [vmem:[%s9367_s1 + $0x460] ss:$8 sps:$4 sm:$0xff]   ;;  %v7175_v20 = vld [vmem:[%s9367_s1 + $0xa74] ss:$8 sps:$4 sm:$0xff]  }
 0x10a   : > { %1784 = vmatprep.mubr.bf16.mxu1 %v9382_v62  ;;  %4078 = vmatprep.mubr.bf16.mxu0 %v9382_v62  ;;  %v7208_v23 = vld [vmem:[%s9367_s1 + $0x4d4] ss:$8 sps:$4 sm:$0xff]  }
 0x10c   : > { %1767 = vmatpush1.bf16.msra.mxu1 %v7122_v15  ;;  %4061 = vmatpush1.bf16.msra.mxu0 %v7125_v26  ;;  %v7167_v15 = vld [vmem:[%s9367_s1 + $0xa60] ss:$8 sps:$4 sm:$0xff]   ;;  %v7172_v26 = vld [vmem:[%s9367_s1 + $0x474] ss:$8 sps:$4 sm:$0xff]  }
 0x10d   : > { %1946 = vmatprep.subr.bf16.mxu1 %v7130_v42  ;;  %4233 = vmatprep.subr.bf16.mxu0 %v7133_v12  ;;  %v7170_v42 = vld [vmem:[%s9367_s1 + $0x470] ss:$8 sps:$4 sm:$0xff]  }
 0x10e   : > { %v7173_v12 = vld [vmem:[%s9367_s1 + $0xa70] ss:$8 sps:$4 sm:$0xff]  }
 0x10f   : > { %1785 = vmatmul.mubr.bf16.vlgmr.msra.gmra.mrb[0].mxu1 %v9386_v21  ;;  %4079 = vmatmul.mubr.bf16.vlgmr.msra.gmra.mrb[0].mxu0 %v7829_v63  ;;  %v7184_v21 = vld [vmem:[%s9367_s1 + $0x494] ss:$8 sps:$4 sm:$0xff]  }
 0x110   : > { %1947 = vmatpush1.bf16.msra.mxu1 %v7128_v48  ;;  %4234 = vmatpush1.bf16.msra.mxu0 %v7131_v5  ;;  %v7178_v48 = vld [vmem:[%s9367_s1 + $0x484] ss:$8 sps:$4 sm:$0xff]   ;;  %v1845_v5 = vpack.c.bf16 %v7836_v59, %v7889_v33  ;;  %v7187_v59 = vld [vmem:[%s9367_s1 + $0xa94] ss:$8 sps:$4 sm:$0xff]   ;;  %v7182_v33 = vld [vmem:[%s9367_s1 + $0x490] ss:$8 sps:$4 sm:$0xff]  }
 0x111   : > { %1948 = vmatprep.subr.bf16.mxu1 %v7136_v8  ;;  %4235 = vmatprep.subr.bf16.mxu0 %v7139_v29  ;;  %v7176_v8 = vld [vmem:[%s9367_s1 + $0x480] ss:$8 sps:$4 sm:$0xff]  }
 0x112   : > { %1794 = vmatprep.mubr.bf16.mxu1 %v9382_v62  ;;  %4088 = vmatprep.mubr.bf16.mxu0 %v9382_v62  ;;  %v7179_v29 = vld [vmem:[%s9367_s1 + $0xa80] ss:$8 sps:$4 sm:$0xff]  }
 0x114   : > { %1949 = vmatpush1.bf16.msra.mxu1 %v7134_v0  ;;  %4236 = vmatpush1.bf16.msra.mxu0 %v7137_v32  ;;  %v7185_v0 = vld [vmem:[%s9367_s1 + $0xa90] ss:$8 sps:$4 sm:$0xff]   ;;  %v7190_v32 = vld [vmem:[%s9367_s1 + $0x4a4] ss:$8 sps:$4 sm:$0xff]  }
 0x115   : > { %1950 = vmatprep.subr.bf16.mxu1 %v7142_v11  ;;  %4237 = vmatprep.subr.bf16.mxu0 %v7145_v53  ;;  %v7193_v11 = vld [vmem:[%s9367_s1 + $0xaa4] ss:$8 sps:$4 sm:$0xff]   ;;  %v7188_v53 = vld [vmem:[%s9367_s1 + $0x4a0] ss:$8 sps:$4 sm:$0xff]  }
 0x117   : > { %1795 = vmatmul.mubr.bf16.gmra.mrb[4].mxu1 %v7610_v24  ;;  %4089 = vmatmul.mubr.bf16.gmra.mrb[4].mxu0 %v8729_v43  ;;  %v7157_v24 = vld [vmem:[%s9367_s1 + $0xa44] ss:$8 sps:$4 sm:$0xff]  }
 0x118   : > { %1951 = vmatpush1.bf16.msra.mxu1 %v7140_v58  ;;  %4238 = vmatpush1.bf16.msra.mxu0 %v7143_v31  ;;  %v7191_v58 = vld [vmem:[%s9367_s1 + $0xaa0] ss:$8 sps:$4 sm:$0xff]   ;;  %v7196_v31 = vld [vmem:[%s9367_s1 + $0x4b4] ss:$8 sps:$4 sm:$0xff]  }
 0x119   : > { %1952 = vmatprep.subr.bf16.mxu1 %v7148_v38  ;;  %4239 = vmatprep.subr.bf16.mxu0 %v7151_v13  ;;  %v7199_v38 = vld [vmem:[%s9367_s1 + $0xab4] ss:$8 sps:$4 sm:$0xff]   ;;  %v7194_v13 = vld [vmem:[%s9367_s1 + $0x4b0] ss:$8 sps:$4 sm:$0xff]  }
 0x11a   : > { %1804 = vmatprep.mubr.bf16.mxu1 %v9382_v62  ;;  %4098 = vmatprep.mubr.bf16.mxu0 %v9382_v62 }
 0x11c   : > { %1953 = vmatpush1.bf16.msra.mxu1 %v7146_v2  ;;  %4240 = vmatpush1.bf16.msra.mxu0 %v7149_v22  ;;  %v7197_v2 = vld [vmem:[%s9367_s1 + $0xab0] ss:$8 sps:$4 sm:$0xff]   ;;  %v7202_v22 = vld [vmem:[%s9367_s1 + $0x4c4] ss:$8 sps:$4 sm:$0xff]  }
 0x11d   : > { %1954 = vmatprep.subr.bf16.mxu1 %v7154_v18  ;;  %4241 = vmatprep.subr.bf16.mxu0 %v7157_v24  ;;  %v7350_v18 = vld [vmem:[%s7469_s9 + $0x80] sm:$0xff]  ;;  %v7351_v24 = vld [vmem:[%s7469_s9 + $0x90] sm:$0xff] }
 0x11f   : > { %1805 = vmatmul.mubr.bf16.gmra.mrb[8].mxu1 %v7936_v9  ;;  %4099 = vmatmul.mubr.bf16.gmra.mrb[8].mxu0 %v8764_v57  ;;  %v7166_v9 = vld [vmem:[%s9367_s1 + $0x464] ss:$8 sps:$4 sm:$0xff]  }
 0x120   : > { %1955 = vmatpush1.bf16.msra.mxu1 %v7152_v19  ;;  %4242 = vmatpush1.bf16.msra.mxu0 %v7155_v6  ;;  %v8884_v19 = vpack.c.bf16 %v7351_v24, %v7350_v18  ;;  %v7200_v6 = vld [vmem:[%s9367_s1 + $0x4c0] ss:$8 sps:$4 sm:$0xff]  }
 0x121   : > { %1956 = vmatprep.subr.bf16.mxu1 %v7160_v25  ;;  %4243 = vmatprep.subr.bf16.mxu0 %v7163_v17  ;;  %v7211_v25 = vld [vmem:[%s9367_s1 + $0xad4] ss:$8 sps:$4 sm:$0xff]   ;;  %v7206_v17 = vld [vmem:[%s9367_s1 + $0x4d0] ss:$8 sps:$4 sm:$0xff]  }
 0x122   : > { %1814 = vmatprep.mubr.bf16.mxu1 %v9382_v62  ;;  %4108 = vmatprep.mubr.bf16.mxu0 %v9382_v62 }
 0x124   : > { %1957 = vmatpush1.bf16.msra.mxu1 %v7158_v60  ;;  %4244 = vmatpush1.bf16.msra.mxu0 %v7161_v52  ;;  %v7209_v60 = vld [vmem:[%s9367_s1 + $0xad0] ss:$8 sps:$4 sm:$0xff]  }
 0x125   : > { %1958 = vmatprep.subr.bf16.mxu1 %v7166_v9  ;;  %4245 = vmatprep.subr.bf16.mxu0 %v7169_v16  ;;  %v8907_v52 = vld [vmem:[%s7469_s9 + $0xb0] sm:$0xff]  ;;  %v7217_v9 = vld [vmem:[%s9367_s1 + $0xae4] ss:$8 sps:$4 sm:$0xff]  }
 0x126   : > { %v4135_v16 = vpack.c.bf16 %v8907_v52, %v8767_v56  ;;  %v7223_v56 = vld [vmem:[%s9367_s1 + $0xaf4] ss:$8 sps:$4 sm:$0xff]   ;;  %v4324_v18 = vrot.slane %v8907_v52, 1 }
 0x127   : > { %1815 = vmatmul.mubr.bf16.gmra.mrb[12].mxu1 %v7986_v41  ;;  %4109 = vmatmul.mubr.bf16.gmra.mrb[12].mxu0 %v3948_v34  ;;  %v7181_v41 = vld [vmem:[%s9367_s1 + $0xa84] ss:$8 sps:$4 sm:$0xff]   ;;  %v7212_v34 = vld [vmem:[%s9367_s1 + $0x4e0] ss:$8 sps:$4 sm:$0xff]  }
 0x128   : > { %1959 = vmatpush1.bf16.msra.mxu1 %v7164_v46  ;;  %4246 = vmatpush1.bf16.msra.mxu0 %v7167_v15  ;;  %v7215_v46 = vld [vmem:[%s9367_s1 + $0xae0] ss:$8 sps:$4 sm:$0xff]   ;;  %v7220_v15 = vld [vmem:[%s9367_s1 + $0x4f4] ss:$8 sps:$4 sm:$0xff]  }
 0x129   : > { %1960 = vmatprep.subr.bf16.mxu1 %v7172_v26  ;;  %4247 = vmatprep.subr.bf16.mxu0 %v7175_v20  ;;  %v7218_v26 = vld [vmem:[%s9367_s1 + $0x4f0] ss:$8 sps:$4 sm:$0xff]  }
 0x12a   : > { %1978 = vmatprep.mubr.bf16.mxu1 %v9382_v62  ;;  %4265 = vmatprep.mubr.bf16.mxu0 %v9382_v62  ;;  %v7221_v20 = vld [vmem:[%s9367_s1 + $0xaf0] ss:$8 sps:$4 sm:$0xff]  }
 0x12c   : > { %1961 = vmatpush1.bf16.msra.mxu1 %v7170_v42  ;;  %4248 = vmatpush1.bf16.msra.mxu0 %v7173_v12  ;;  %v7226_v42 = vld [vmem:[%s9367_s1 + $0x504] ss:$8 sps:$4 sm:$0xff]   ;;  %v2039_v12 = vpack.c.bf16 %v7796_v3, %v7909_v1  ;;  %v7235_v3 = vld [vmem:[%s9367_s1 + $0xb14] ss:$8 sps:$4 sm:$0xff]  }
 0x12d   : > { %2140 = vmatprep.subr.bf16.mxu1 %v7178_v48  ;;  %4426 = vmatprep.subr.bf16.mxu0 %v7181_v41  ;;  %v7224_v48 = vld [vmem:[%s9367_s1 + $0x500] ss:$8 sps:$4 sm:$0xff]  }
 0x12e   : > { %v7227_v41 = vld [vmem:[%s9367_s1 + $0xb00] ss:$8 sps:$4 sm:$0xff]  }
 0x12f   : > { %1979 = vmatmul.mubr.bf16.vlgmr.msra.gmra.mrb[0].mxu1 %v1845_v5  ;;  %4266 = vmatmul.mubr.bf16.vlgmr.msra.gmra.mrb[0].mxu0 %v7963_v28  ;;  %v7232_v5 = vld [vmem:[%s9367_s1 + $0x514] ss:$8 sps:$4 sm:$0xff]   ;;  %v9387_v1 = vld [vmem:[#allocation3_spill] sm:$0xff] }
 0x130   : > { %2141 = vmatpush1.bf16.msra.mxu1 %v7176_v8  ;;  %4427 = vmatpush1.bf16.msra.mxu0 %v7179_v29  ;;  %v7230_v8 = vld [vmem:[%s9367_s1 + $0x510] ss:$8 sps:$4 sm:$0xff]  }
 0x131   : > { %2142 = vmatprep.subr.bf16.mxu1 %v7184_v21  ;;  %4428 = vmatprep.subr.bf16.mxu0 %v7187_v59  ;;  %v7233_v29 = vld [vmem:[%s9367_s1 + $0xb10] ss:$8 sps:$4 sm:$0xff]   ;;  %v7238_v21 = vld [vmem:[%s9367_s1 + $0x524] ss:$8 sps:$4 sm:$0xff]  }
 0x132   : > { %1988 = vmatprep.mubr.bf16.mxu1 %v9382_v62  ;;  %4275 = vmatprep.mubr.bf16.mxu0 %v9382_v62  ;;  %v7241_v59 = vld [vmem:[%s9367_s1 + $0xb24] ss:$8 sps:$4 sm:$0xff]  }
 0x134   : > { %2143 = vmatpush1.bf16.msra.mxu1 %v7182_v33  ;;  %4429 = vmatpush1.bf16.msra.mxu0 %v7185_v0  ;;  %v7236_v33 = vld [vmem:[%s9367_s1 + $0x520] ss:$8 sps:$4 sm:$0xff]  }
 0x135   : > { %2144 = vmatprep.subr.bf16.mxu1 %v7190_v32  ;;  %4430 = vmatprep.subr.bf16.mxu0 %v7193_v11  ;;  %v7239_v0 = vld [vmem:[%s9367_s1 + $0xb20] ss:$8 sps:$4 sm:$0xff]   ;;  %v7244_v32 = vld [vmem:[%s9367_s1 + $0x534] ss:$8 sps:$4 sm:$0xff]  }
 0x136   : > { %v7247_v11 = vld [vmem:[%s9367_s1 + $0xb34] ss:$8 sps:$4 sm:$0xff]  }
 0x137   : > { %1989 = vmatmul.mubr.bf16.gmra.mrb[4].mxu1 %v7731_v50  ;;  %4276 = vmatmul.mubr.bf16.gmra.mrb[4].mxu0 %v8012_v54  ;;  %v7205_v50 = vld [vmem:[%s9367_s1 + $0xac4] ss:$8 sps:$4 sm:$0xff]  }
 0x138   : > { %2145 = vmatpush1.bf16.msra.mxu1 %v7188_v53  ;;  %4431 = vmatpush1.bf16.msra.mxu0 %v7191_v58  ;;  %v9388_v53 = vld [vmem:[#allocation4_spill] sm:$0xff] }
 0x139   : > { %2146 = vmatprep.subr.bf16.mxu1 %v7196_v31  ;;  %4432 = vmatprep.subr.bf16.mxu0 %v7199_v38  ;;  %v7242_v58 = vld [vmem:[%s9367_s1 + $0x530] ss:$8 sps:$4 sm:$0xff]   ;;  %v7250_v38 = vld [vmem:[%s9367_s1 + $0x544] ss:$8 sps:$4 sm:$0xff]  }
 0x13a   : > { %1998 = vmatprep.mubr.bf16.mxu1 %v9382_v62  ;;  %4285 = vmatprep.mubr.bf16.mxu0 %v9382_v62  ;;  %v7245_v31 = vld [vmem:[%s9367_s1 + $0xb30] ss:$8 sps:$4 sm:$0xff]  }
 0x13c   : > { %2147 = vmatpush1.bf16.msra.mxu1 %v7194_v13  ;;  %4433 = vmatpush1.bf16.msra.mxu0 %v7197_v2  ;;  %v9002_v13 = vld [vmem:[%s7469_s9 + $0xb8] sm:$0xf]  ;;  %v9008_v2 = vpack.c.bf16 %v8412_v45, %v8373_v39  ;;  %v7256_v39 = vld [vmem:[%s9367_s1 + $0x554] ss:$8 sps:$4 sm:$0xff]  }
 0x13d   : > { %2148 = vmatprep.subr.bf16.mxu1 %v7202_v22  ;;  %4434 = vmatprep.subr.bf16.mxu0 %v7205_v50  ;;  %v7248_v22 = vld [vmem:[%s9367_s1 + $0x540] ss:$8 sps:$4 sm:$0xff]   ;;  %v4325_v24 = vrot.slane %v9002_v13, 1  ;;  %v7259_v45 = vld [vmem:[%s9367_s1 + $0xb54] ss:$8 sps:$4 sm:$0xff]  }
 0x13e   : > { %v7251_v50 = vld [vmem:[%s9367_s1 + $0xb40] ss:$8 sps:$4 sm:$0xff]  }
 0x13f   : > { %1999 = vmatmul.mubr.bf16.gmra.mrb[8].mxu1 %v8098_v37  ;;  %4286 = vmatmul.mubr.bf16.gmra.mrb[8].mxu0 %v8884_v19  ;;  %v7214_v37 = vld [vmem:[%s9367_s1 + $0x4e4] ss:$8 sps:$4 sm:$0xff]  }
 0x140   : > { %2149 = vmatpush1.bf16.msra.mxu1 %v7200_v6  ;;  %4435 = vmatpush1.bf16.msra.mxu0 %v7203_v7  ;;  %v7254_v6 = vld [vmem:[%s9367_s1 + $0x550] ss:$8 sps:$4 sm:$0xff]  }
 0x141   : > { %2150 = vmatprep.subr.bf16.mxu1 %v7208_v23  ;;  %4436 = vmatprep.subr.bf16.mxu0 %v7211_v25  ;;  %v7257_v7 = vld [vmem:[%s9367_s1 + $0xb50] ss:$8 sps:$4 sm:$0xff]   ;;  %v4326_v23 = vsel %vm232_vm0, %v4324_v18, %v4325_v24  ;;  %v7265_v25 = vld [vmem:[%s9367_s1 + $0xb64] ss:$8 sps:$4 sm:$0xff]   ;;  %v7311_v18 = vld [vmem:[%s9367_s1 + $0xbe0] ss:$8 sps:$4 sm:$0xff]  }
 0x142   : > { %2008 = vmatprep.mubr.bf16.mxu1 %v9382_v62  ;;  %4295 = vmatprep.mubr.bf16.mxu0 %v9382_v62  ;;  %v7316_v24 = vld [vmem:[%s9367_s1 + $0x5f4] ss:$8 sps:$4 sm:$0xff]  }
 0x144   : > { %2151 = vmatpush1.bf16.msra.mxu1 %v7206_v17  ;;  %4437 = vmatpush1.bf16.msra.mxu0 %v7209_v60  ;;  %v4328_v17 = vpack.c.bf16 %v4326_v23, %v8415_v44  ;;  %v7260_v60 = vld [vmem:[%s9367_s1 + $0x560] ss:$8 sps:$4 sm:$0xff]   ;;  %v7271_v44 = vld [vmem:[%s9367_s1 + $0xb74] ss:$8 sps:$4 sm:$0xff]  }
 0x145   : > { %2152 = vmatprep.subr.bf16.mxu1 %v7214_v37  ;;  %4438 = vmatprep.subr.bf16.mxu0 %v7217_v9  ;;  %v7263_v37 = vld [vmem:[%s9367_s1 + $0xb60] ss:$8 sps:$4 sm:$0xff]   ;;  %v7268_v9 = vld [vmem:[%s9367_s1 + $0x574] ss:$8 sps:$4 sm:$0xff]  }
 0x146   : > { %v9390_v23 = vld [vmem:[#allocation2_spill] sm:$0xff] }
 0x147   : > { %2009 = vmatmul.mubr.bf16.gmra.mrb[12].mxu1 %v8138_v40  ;;  %4296 = vmatmul.mubr.bf16.gmra.mrb[12].mxu0 %v4135_v16  ;;  %v7229_v40 = vld [vmem:[%s9367_s1 + $0xb04] ss:$8 sps:$4 sm:$0xff]   ;;  %v7266_v16 = vld [vmem:[%s9367_s1 + $0x570] ss:$8 sps:$4 sm:$0xff]  }
 0x148   : > { %2153 = vmatpush1.bf16.msra.mxu1 %v7212_v34  ;;  %4439 = vmatpush1.bf16.msra.mxu0 %v7215_v46  ;;  %v7269_v34 = vld [vmem:[%s9367_s1 + $0xb70] ss:$8 sps:$4 sm:$0xff]   ;;  %v7274_v46 = vld [vmem:[%s9367_s1 + $0x584] ss:$8 sps:$4 sm:$0xff]  }
 0x149   : > { %2154 = vmatprep.subr.bf16.mxu1 %v7220_v15  ;;  %4440 = vmatprep.subr.bf16.mxu0 %v7223_v56  ;;  %v7272_v15 = vld [vmem:[%s9367_s1 + $0x580] ss:$8 sps:$4 sm:$0xff]  }
 0x14a   : > { %2172 = vmatprep.mubr.bf16.mxu1 %v9382_v62  ;;  %4458 = vmatprep.mubr.bf16.mxu0 %v9382_v62  ;;  %v7275_v56 = vld [vmem:[%s9367_s1 + $0xb80] ss:$8 sps:$4 sm:$0xff]  }
 0x14c   : > { %2155 = vmatpush1.bf16.msra.mxu1 %v7218_v26  ;;  %4441 = vmatpush1.bf16.msra.mxu0 %v7221_v20  ;;  %v7280_v26 = vld [vmem:[%s9367_s1 + $0x594] ss:$8 sps:$4 sm:$0xff]  }
 0x14d   : > { %2327 = vmatprep.subr.bf16.mxu1 %v7226_v42  ;;  %4617 = vmatprep.subr.bf16.mxu0 %v7229_v40  ;;  %v7283_v20 = vld [vmem:[%s9367_s1 + $0xb94] ss:$8 sps:$4 sm:$0xff]   ;;  %v7278_v42 = vld [vmem:[%s9367_s1 + $0x590] ss:$8 sps:$4 sm:$0xff]  }
 0x14e   : > { %v7281_v40 = vld [vmem:[%s9367_s1 + $0xb90] ss:$8 sps:$4 sm:$0xff]  }
 0x14f   : > { %2173 = vmatmul.mubr.bf16.vlgmr.msra.gmra.mrb[0].mxu1 %v2039_v12  ;;  %4459 = vmatmul.mubr.bf16.vlgmr.msra.gmra.mrb[0].mxu0 %v9387_v1  ;;  %v7286_v12 = vld [vmem:[%s9367_s1 + $0x5a4] ss:$8 sps:$4 sm:$0xff]  }
 0x150   : > { %2328 = vmatpush1.bf16.msra.mxu1 %v7224_v48  ;;  %4618 = vmatpush1.bf16.msra.mxu0 %v7227_v41  ;;  %v7287_v48 = vld [vmem:[%s9367_s1 + $0xba0] ss:$8 sps:$4 sm:$0xff]   ;;  %v7292_v41 = vld [vmem:[%s9367_s1 + $0x5b4] ss:$8 sps:$4 sm:$0xff]  }
 0x151   : > { %2329 = vmatprep.subr.bf16.mxu1 %v7232_v5  ;;  %4619 = vmatprep.subr.bf16.mxu0 %v7235_v3  ;;  %v7295_v5 = vld [vmem:[%s9367_s1 + $0xbb4] ss:$8 sps:$4 sm:$0xff]   ;;  %v7290_v3 = vld [vmem:[%s9367_s1 + $0x5b0] ss:$8 sps:$4 sm:$0xff]  }
 0x152   : > { %2182 = vmatprep.mubr.bf16.mxu1 %v9382_v62  ;;  %4468 = vmatprep.mubr.bf16.mxu0 %v9382_v62 }
 0x154   : > { %2330 = vmatpush1.bf16.msra.mxu1 %v7230_v8  ;;  %4620 = vmatpush1.bf16.msra.mxu0 %v7233_v29  ;;  %v7293_v8 = vld [vmem:[%s9367_s1 + $0xbb0] ss:$8 sps:$4 sm:$0xff]   ;;  %v7298_v29 = vld [vmem:[%s9367_s1 + $0x5c4] ss:$8 sps:$4 sm:$0xff]  }
 0x155   : > { %2331 = vmatprep.subr.bf16.mxu1 %v7238_v21  ;;  %4621 = vmatprep.subr.bf16.mxu0 %v7241_v59  ;;  %v7299_v21 = vld [vmem:[%s9367_s1 + $0xbc0] ss:$8 sps:$4 sm:$0xff]   ;;  %v4515_v59 = vrot.slane %v8907_v52, 2 }
 0x157   : > { %2183 = vmatmul.mubr.bf16.gmra.mrb[4].mxu1 %v7829_v63  ;;  %4469 = vmatmul.mubr.bf16.gmra.mrb[4].mxu0 %v9388_v53  ;;  %v7253_v63 = vld [vmem:[%s9367_s1 + $0xb44] ss:$8 sps:$4 sm:$0xff]  }
 0x158   : > { %2332 = vmatpush1.bf16.msra.mxu1 %v7236_v33  ;;  %4622 = vmatpush1.bf16.msra.mxu0 %v7239_v0  ;;  %v4516_v33 = vrot.slane %v9002_v13, 2  ;;  %v7304_v0 = vld [vmem:[%s9367_s1 + $0x5d4] ss:$8 sps:$4 sm:$0xff]  }
 0x159   : > { %2333 = vmatprep.subr.bf16.mxu1 %v7244_v32  ;;  %4623 = vmatprep.subr.bf16.mxu0 %v7247_v11  ;;  %v7307_v32 = vld [vmem:[%s9367_s1 + $0xbd4] ss:$8 sps:$4 sm:$0xff]  }
 0x15a   : > { %2192 = vmatprep.mubr.bf16.mxu1 %v9382_v62  ;;  %4478 = vmatprep.mubr.bf16.mxu0 %v9382_v62  ;;  %v9389_v11 = vld [vmem:[#allocation5_spill] sm:$0xff] }
 0x15c   : > { %2334 = vmatpush1.bf16.msra.mxu1 %v7242_v58  ;;  %4624 = vmatpush1.bf16.msra.mxu0 %v7245_v31  ;;  %v7302_v58 = vld [vmem:[%s9367_s1 + $0x5d0] ss:$8 sps:$4 sm:$0xff]  }
 0x15d   : > { %2335 = vmatprep.subr.bf16.mxu1 %v7250_v38  ;;  %4625 = vmatprep.subr.bf16.mxu0 %v7253_v63  ;;  %v7305_v31 = vld [vmem:[%s9367_s1 + $0xbd0] ss:$8 sps:$4 sm:$0xff]   ;;  %v4517_v38 = vsel %vm592_vm1, %v4515_v59, %v4516_v33  ;;  %v7313_v63 = vld [vmem:[%s9367_s1 + $0xbe4] ss:$8 sps:$4 sm:$0xff]  }
 0x15f   : > { %2193 = vmatmul.mubr.bf16.gmra.mrb[8].mxu1 %v8729_v43  ;;  %4479 = vmatmul.mubr.bf16.gmra.mrb[8].mxu0 %v9008_v2  ;;  %v7262_v43 = vld [vmem:[%s9367_s1 + $0x564] ss:$8 sps:$4 sm:$0xff]  }
 0x160   : > { %2336 = vmatpush1.bf16.msra.mxu1 %v7248_v22  ;;  %4626 = vmatpush1.bf16.msra.mxu0 %v7251_v50  ;;  %v4519_v22 = vpack.c.bf16 %v4517_v38, %v8535_v27  ;;  %v7308_v50 = vld [vmem:[%s9367_s1 + $0x5e0] ss:$8 sps:$4 sm:$0xff]   ;;  %v7319_v27 = vld [vmem:[%s9367_s1 + $0xbf4] ss:$8 sps:$4 sm:$0xff]  }
 0x161   : > { %2337 = vmatprep.subr.bf16.mxu1 %v7256_v39  ;;  %4627 = vmatprep.subr.bf16.mxu0 %v7259_v45  ;;  %v7314_v39 = vld [vmem:[%s9367_s1 + $0x5f0] ss:$8 sps:$4 sm:$0xff]  }
 0x162   : > { %2202 = vmatprep.mubr.bf16.mxu1 %v9382_v62  ;;  %4488 = vmatprep.mubr.bf16.mxu0 %v9382_v62  ;;  %v7317_v45 = vld [vmem:[%s9367_s1 + $0xbf0] ss:$8 sps:$4 sm:$0xff]  }
 0x164   : > { %2338 = vmatpush1.bf16.msra.mxu1 %v7254_v6  ;;  %4628 = vmatpush1.bf16.msra.mxu0 %v7257_v7  ;;  %v7322_v6 = vld [vmem:[%s9367_s1 + $0xc04] ss:$8 sps:$4 sm:$0xff]   ;;  %v7325_v7 = vld [vmem:[%s9367_s1 + $0xc14] ss:$8 sps:$4 sm:$0xff]  }
 0x165   : > { %2339 = vmatprep.subr.bf16.mxu1 %v7262_v43  ;;  %4629 = vmatprep.subr.bf16.mxu0 %v7265_v25  ;;  %v7323_v43 = vld [vmem:[%s9367_s1 + $0xc10] ss:$8 sps:$4 sm:$0xff]   ;;  %v7328_v25 = vld [vmem:[%s9367_s1 + $0xc24] ss:$8 sps:$4 sm:$0xff]  }
 0x167   : > { %2203 = vmatmul.mubr.bf16.gmra.mrb[12].mxu1 %v8764_v57  ;;  %4489 = vmatmul.mubr.bf16.gmra.mrb[12].mxu0 %v4328_v17  ;;  %v7277_v57 = vld [vmem:[%s9367_s1 + $0xb84] ss:$8 sps:$4 sm:$0xff]   ;;  %v7331_v17 = vld [vmem:[%s9367_s1 + $0xc34] ss:$8 sps:$4 sm:$0xff]  }
 0x168   : > { %2340 = vmatpush1.bf16.msra.mxu1 %v7260_v60  ;;  %4630 = vmatpush1.bf16.msra.mxu0 %v7263_v37  ;;  %v7329_v60 = vld [vmem:[%s9367_s1 + $0xc30] ss:$8 sps:$4 sm:$0xff]   ;;  %v7334_v37 = vld [vmem:[%s9367_s1 + $0xc44] ss:$8 sps:$4 sm:$0xff]  }
 0x169   : > { %2341 = vmatprep.subr.bf16.mxu1 %v7268_v9  ;;  %4631 = vmatprep.subr.bf16.mxu0 %v7271_v44  ;;  %v4707_v9 = vrot.slane %v9002_v13, 3  ;;  %v7337_v44 = vld [vmem:[%s9367_s1 + $0xc54] ss:$8 sps:$4 sm:$0xff]  }
 0x16a   : > { %2359 = vmatprep.mubr.bf16.mxu1 %v9382_v62  ;;  %4649 = vmatprep.mubr.bf16.mxu0 %v9382_v62 }
 0x16c   : > { %2342 = vmatpush1.bf16.msra.mxu1 %v7266_v16  ;;  %4632 = vmatpush1.bf16.msra.mxu0 %v7269_v34  ;;  %v7335_v16 = vld [vmem:[%s9367_s1 + $0xc50] ss:$8 sps:$4 sm:$0xff]  }
 0x16d   : > { %2520 = vmatprep.subr.bf16.mxu1 %v7274_v46  ;;  %4808 = vmatprep.subr.bf16.mxu0 %v7277_v57  ;;  %v7340_v46 = vld [vmem:[%s9367_s1 + $0xc64] ss:$8 sps:$4 sm:$0xff]   ;;  %v7343_v57 = vld [vmem:[%s9367_s1 + $0xc74] ss:$8 sps:$4 sm:$0xff]  }
 0x16f   : > { %2360 = vmatmul.mubr.bf16.vlgmr.msra.gmra.mrb[0].mxu1 %v7913_v51  ;;  %4650 = vmatmul.mubr.bf16.vlgmr.msra.gmra.mrb[0].mxu0 %v7653_v49  ;;  %v7289_v49 = vld [vmem:[%s9367_s1 + $0xba4] ss:$8 sps:$4 sm:$0xff]   ;;  %v7284_v51 = vld [vmem:[%s9367_s1 + $0x5a0] ss:$8 sps:$4 sm:$0xff]  }
 0x170   : > { %2521 = vmatpush1.bf16.msra.mxu1 %v7272_v15  ;;  %4809 = vmatpush1.bf16.msra.mxu0 %v7275_v56  ;;  %v4897_v15 = vrot.slane %v8907_v52, 4  ;;  %v4898_v56 = vrot.slane %v9002_v13, 4 }
 0x171   : > { %2522 = vmatprep.subr.bf16.mxu1 %v7280_v26  ;;  %4810 = vmatprep.subr.bf16.mxu0 %v7283_v20 }
 0x172   : > { %2369 = vmatprep.mubr.bf16.mxu1 %v9382_v62  ;;  %4659 = vmatprep.mubr.bf16.mxu0 %v9382_v62 }
 0x174   : > { %2523 = vmatpush1.bf16.msra.mxu1 %v7278_v42  ;;  %4811 = vmatpush1.bf16.msra.mxu0 %v7281_v40 }
 0x175   : > { %2524 = vmatprep.subr.bf16.mxu1 %v7286_v12  ;;  %4812 = vmatprep.subr.bf16.mxu0 %v7289_v49 }
 0x177   : > { %2370 = vmatmul.mubr.bf16.gmra.mrb[4].mxu1 %v7963_v28  ;;  %4660 = vmatmul.mubr.bf16.gmra.mrb[4].mxu0 %v7737_v55  ;;  %v7301_v55 = vld [vmem:[%s9367_s1 + $0xbc4] ss:$8 sps:$4 sm:$0xff]   ;;  %v7296_v28 = vld [vmem:[%s9367_s1 + $0x5c0] ss:$8 sps:$4 sm:$0xff]  }
 0x178   : > { %2525 = vmatpush1.bf16.msra.mxu1 %v7284_v51  ;;  %4813 = vmatpush1.bf16.msra.mxu0 %v7287_v48 }
 0x179   : > { %2526 = vmatprep.subr.bf16.mxu1 %v7292_v41  ;;  %4814 = vmatprep.subr.bf16.mxu0 %v7295_v5 }
 0x17a   : > { %2379 = vmatprep.mubr.bf16.mxu1 %v9382_v62  ;;  %4669 = vmatprep.mubr.bf16.mxu0 %v9382_v62 }
 0x17c   : > { %2527 = vmatpush1.bf16.msra.mxu1 %v7290_v3  ;;  %4815 = vmatpush1.bf16.msra.mxu0 %v7293_v8 }
 0x17d   : > { %2528 = vmatprep.subr.bf16.mxu1 %v7298_v29  ;;  %4816 = vmatprep.subr.bf16.mxu0 %v7301_v55  ;;  %v5090_v55 = vlaneseq }
 0x17f   : > { %2380 = vmatmul.mubr.bf16.gmra.mrb[8].mxu1 %v8012_v54  ;;  %4670 = vmatmul.mubr.bf16.gmra.mrb[8].mxu0 %v9389_v11  ;;  %v7310_v54 = vld [vmem:[%s9367_s1 + $0x5e4] ss:$8 sps:$4 sm:$0xff]  }
 0x180   : > { %2529 = vmatpush1.bf16.msra.mxu1 %v7296_v28  ;;  %4817 = vmatpush1.bf16.msra.mxu0 %v7299_v21  ;;  %v9262_v21 = vshrl.u32 %v5090_v55, 7 }
 0x181   : > { %2530 = vmatprep.subr.bf16.mxu1 %v7304_v0  ;;  %4818 = vmatprep.subr.bf16.mxu0 %v7307_v32 }
 0x182   : > { %2389 = vmatprep.mubr.bf16.mxu1 %v9382_v62  ;;  %4679 = vmatprep.mubr.bf16.mxu0 %v9382_v62 }
 0x184   : > { %2531 = vmatpush1.bf16.msra.mxu1 %v7302_v58  ;;  %4819 = vmatpush1.bf16.msra.mxu0 %v7305_v31 }
 0x185   : > { %2532 = vmatprep.subr.bf16.mxu1 %v7310_v54  ;;  %4820 = vmatprep.subr.bf16.mxu0 %v7313_v63 }
 0x187   : > { %2390 = vmatmul.mubr.bf16.gmra.mrb[12].mxu1 %v8884_v19  ;;  %4680 = vmatmul.mubr.bf16.gmra.mrb[12].mxu0 %v4519_v22  ;;  %v7320_v19 = vld [vmem:[%s9367_s1 + $0xc00] ss:$8 sps:$4 sm:$0xff]  }
 0x188   : > { %2533 = vmatpush1.bf16.msra.mxu1 %v7308_v50  ;;  %4821 = vmatpush1.bf16.msra.mxu0 %v7311_v18  ;;  %v5092_v50 = vsub.s32 0, %v9262_v21 }
 0x189   : > { %2534 = vmatprep.subr.bf16.mxu1 %v7316_v24  ;;  %4822 = vmatprep.subr.bf16.mxu0 %v7319_v27  ;;  %v5088_v24 = vld [vmem:[%s9368_s2] sm:$0x3]  ;;  %v5096_v27 = vsub.s32 1, %v9262_v21 }
 0x18a   : > { %2552 = vmatprep.mubr.bf16.mxu1 %v9382_v62  ;;  %4840 = vmatprep.mubr.bf16.mxu0 %v9382_v62 }
 0x18c   : > { %2535 = vmatpush1.bf16.msra.mxu1 %v7314_v39  ;;  %4823 = vmatpush1.bf16.msra.mxu0 %v7317_v45  ;;  %v7361_v39 = vmov 1983009808  }
 0x18d   : > { %4999 = vmatprep.subr.bf16.mxu0 %v7322_v6  ;;  %6332 = vmatprep.subr.bf16.mxu1 %v7322_v6  ;;  %v5151_v45 = vunpack.c.l.s4 %v7361_v39  ;;  %v9273_v6 = vrot.slane %v5088_v24, %v5092_v50 }
 0x18f   : > { %2553 = vmatmul.mubr.bf16.vlgmr.msra.gmra.mrb[0].mxu1 %v9390_v23  ;;  %4841 = vmatmul.mubr.bf16.vlgmr.msra.gmra.mrb[0].mxu0 %v7920_v35  ;;  %v7326_v35 = vld [vmem:[%s9367_s1 + $0xc20] ss:$8 sps:$4 sm:$0xff]   ;;  %v9275_v23 = vrot.slane %v5088_v24, %v5096_v27 }
 0x190   : > { %5000 = vmatpush1.bf16.msra.mxu0 %v7320_v19  ;;  %6340 = vmatpush1.bf16.msra.mxu1 %v7320_v19 }
 0x191   : > { %5001 = vmatprep.subr.bf16.mxu0 %v7325_v7  ;;  %6333 = vmatprep.subr.bf16.mxu1 %v7325_v7 }
 0x192   : > { %2562 = vmatprep.mubr.bf16.mxu1 %v9382_v62  ;;  %4850 = vmatprep.mubr.bf16.mxu0 %v9382_v62 }
 0x194   : > { %5002 = vmatpush1.bf16.msra.mxu0 %v7323_v43  ;;  %6341 = vmatpush1.bf16.msra.mxu1 %v7323_v43 }
 0x195   : > { %5003 = vmatprep.subr.bf16.mxu0 %v7328_v25  ;;  %6334 = vmatprep.subr.bf16.mxu1 %v7328_v25 }
 0x197   : > { %2563 = vmatmul.mubr.bf16.gmra.mrb[4].mxu1 %v9387_v1  ;;  %4851 = vmatmul.mubr.bf16.gmra.mrb[4].mxu0 %v7970_v36  ;;  %v7332_v36 = vld [vmem:[%s9367_s1 + $0xc40] ss:$8 sps:$4 sm:$0xff]   ;;  %v4706_v1 = vrot.slane %v8907_v52, 3 }
 0x198   : > { %5004 = vmatpush1.bf16.msra.mxu0 %v7326_v35  ;;  %6342 = vmatpush1.bf16.msra.mxu1 %v7326_v35 }
 0x199   : > { %5005 = vmatprep.subr.bf16.mxu0 %v7331_v17  ;;  %6335 = vmatprep.subr.bf16.mxu1 %v7331_v17  ;;  %v4708_v34 = vsel %vm815_vm2, %v4706_v1, %v4707_v9 }
 0x19a   : > { %2572 = vmatprep.mubr.bf16.mxu1 %v9382_v62  ;;  %4860 = vmatprep.mubr.bf16.mxu0 %v9382_v62 }
 0x19c   : > { %5006 = vmatpush1.bf16.msra.mxu0 %v7329_v60  ;;  %6343 = vmatpush1.bf16.msra.mxu1 %v7329_v60  ;;  %v7362_v60 = vmov 572653568  }
 0x19d   : > { %5007 = vmatprep.subr.bf16.mxu0 %v7334_v37  ;;  %6336 = vmatprep.subr.bf16.mxu1 %v7334_v37  ;;  %v5317_v37 = vunpack.c.l.s4 %v7362_v60 }
 0x19f   : > { %2573 = vmatmul.mubr.bf16.gmra.mrb[8].mxu1 %v9388_v53  ;;  %4861 = vmatmul.mubr.bf16.gmra.mrb[8].mxu0 %v8019_v4  ;;  %v4710_v4 = vpack.c.bf16 %v4708_v34, %v8658_v14  ;;  %v7338_v53 = vld [vmem:[%s9367_s1 + $0xc60] ss:$8 sps:$4 sm:$0xff]   ;;  %v7341_v14 = vld [vmem:[%s9367_s1 + $0xc70] ss:$8 sps:$4 sm:$0xff]  }
 0x1a0   : > { %5008 = vmatpush1.bf16.msra.mxu0 %v7332_v36  ;;  %6344 = vmatpush1.bf16.msra.mxu1 %v7332_v36 }
 0x1a1   : > { %5009 = vmatprep.subr.bf16.mxu0 %v7337_v44  ;;  %6337 = vmatprep.subr.bf16.mxu1 %v7337_v44 }
 0x1a2   : > { %2582 = vmatprep.mubr.bf16.mxu1 %v9382_v62  ;;  %4870 = vmatprep.mubr.bf16.mxu0 %v9382_v62 }
 0x1a4   : > { %5010 = vmatpush1.bf16.msra.mxu0 %v7335_v16  ;;  %6345 = vmatpush1.bf16.msra.mxu1 %v7335_v16  ;;  %v5152_v16 = vunpack.c.0.s8 %v5151_v45 }
 0x1a5   : > { %5011 = vmatprep.subr.bf16.mxu0 %v7340_v46  ;;  %6338 = vmatprep.subr.bf16.mxu1 %v7340_v46 }
 0x1a7   : > { %2583 = vmatmul.mubr.bf16.gmra.mrb[12].mxu1 %v9008_v2  ;;  %4871 = vmatmul.mubr.bf16.gmra.mrb[12].mxu0 %v4710_v4  ;;  %v4899_v2 = vsel %vm1038_vm3, %v4897_v15, %v4898_v56 }
 0x1a8   : > { %5012 = vmatpush1.bf16.msra.mxu0 %v7338_v53  ;;  %6346 = vmatpush1.bf16.msra.mxu1 %v7338_v53  ;;  %v4901_v26 = vpack.c.bf16 %v4899_v2, %v8786_v61 }
 0x1a9   : > { %5013 = vmatprep.subr.bf16.mxu0 %v7343_v57  ;;  %6339 = vmatprep.subr.bf16.mxu1 %v7343_v57 }
 0x1aa   : > { %5031 = vmatprep.mubr.bf16.mxu0 %v9382_v62  ;;  %5051 = vmatprep.mubr.bf16.mxu1 %v9382_v62 }
 0x1ac   : > { %5014 = vmatpush1.bf16.msra.mxu0 %v7341_v14  ;;  %6347 = vmatpush1.bf16.msra.mxu1 %v7341_v14 }
 0x1af   : > { %5032 = vmatmul.mubr.bf16.vlgmr.msra.gmra.mrb[0].mxu0 %v8085_v10  ;;  %5052 = vmatmul.mubr.bf16.vlgmr.msra.gmra.mrb[16].mxu1 %v8167_v47 }
 0x1b0   : > { %5041 = vmatprep.mubr.bf16.mxu0 %v9382_v62  ;;  %5061 = vmatprep.mubr.bf16.mxu1 %v9382_v62 }
 0x1b7   : > { %5042 = vmatmul.mubr.bf16.gmra.mrb[4].mxu0 %v8121_v30  ;;  %5062 = vmatmul.mubr.bf16.gmra.mrb[20].mxu1 %v4901_v26 }
 0x262   : > { %v2554_v20 = vpop.f32.mrb[0].mxu1 }
 0x263   : > { %v2556_v42 = vpop.f32.mrb[1].mxu1 }
 0x264   : > { %v2558_v52 = vpop.f32.mrb[2].mxu1 }
 0x265   : > { %v2560_v40 = vpop.f32.mrb[3].mxu1 }
 0x26a   : > { %v9254_v13 = vpop.f32.mrb[4].mxu1 }
 0x26b   : > { %v9256_v10 = vpop.f32.mrb[5].mxu1 }
 0x26c   : > { %v9258_v47 = vpop.f32.mrb[6].mxu1 }
 0x26d   : > { %v9260_v12 = vpop.f32.mrb[7].mxu1 }
 0x272   : > { %v2574_v62 = vpop.f32.mrb[8].mxu1  ;;  %v4862_v49 = vpop.f32.mrb[8].mxu0 }
 0x273   : > { %v6356_v51 = vadd.f32 %v4862_v49, %v2574_v62  ;;  %v2576_v48 = vpop.f32.mrb[9].mxu1  ;;  %v4864_v61 = vpop.f32.mrb[9].mxu0  ;;  %v5318_v62 = vunpack.c.0.s8 %v5317_v37 }
 0x274   : > { %v6358_v41 = vadd.f32 %v4864_v61, %v2576_v48  ;;  %v2578_v30 = vpop.f32.mrb[10].mxu1  ;;  %v4866_v5 = vpop.f32.mrb[10].mxu0 }
 0x275   : > { %v6360_v3 = vadd.f32 %v4866_v5, %v2578_v30  ;;  %v2580_v8 = vpop.f32.mrb[11].mxu1  ;;  %v4868_v29 = vpop.f32.mrb[11].mxu0 }
 0x276   : > { %v6362_v28 = vadd.f32 %v4868_v29, %v2580_v8 }
 0x27a   : > { %v2584_v59 = vpop.f32.mrb[12].mxu1  ;;  %v4872_v33 = vpop.f32.mrb[12].mxu0 }
 0x27b   : > { %v6364_v0 = vadd.f32 %v4872_v33, %v2584_v59  ;;  %v2586_v32 = vpop.f32.mrb[13].mxu1  ;;  %v4874_v11 = vpop.f32.mrb[13].mxu0 }
 0x27c   : > { %v6366_v58 = vadd.f32 %v4874_v11, %v2586_v32  ;;  %v2588_v31 = vpop.f32.mrb[14].mxu1  ;;  %v4876_v38 = vpop.f32.mrb[14].mxu0 }
 0x27d   : > { %v9264_v54 = vadd.f32 %v4876_v38, %v2588_v31  ;;  %v2590_v63 = vpop.f32.mrb[15].mxu1  ;;  %v4878_v22 = vpop.f32.mrb[15].mxu0 }
 0x27e   : > { %v9267_v18 = vadd.f32 %v4878_v22, %v2590_v63 }
 0x282   : > { %v5033_v19 = vpop.f32.mrb[0].mxu0  ;;  %v5053_v7 = vpop.f32.mrb[16].mxu1 }
 0x283   : > { %v6348_v43 = vadd.f32 %v5033_v19, %v2554_v20  ;;  %v6357_v25 = vadd.f32 %v6356_v51, %v5053_v7  ;;  %v5035_v35 = vpop.f32.mrb[1].mxu0  ;;  %v5055_v17 = vpop.f32.mrb[17].mxu1  ;;  %v9285_v51 = vsub.s32 %v5152_v16, %v9262_v21 }
 0x284   : > { %v6349_v36 = vadd.f32 %v5035_v35, %v2556_v42  ;;  %v6359_v1 = vadd.f32 %v6358_v41, %v5055_v17  ;;  %v5037_v9 = vpop.f32.mrb[2].mxu0  ;;  %v5057_v44 = vpop.f32.mrb[18].mxu1  ;;  %v9294_v17 = vsub.s32 %v5318_v62, %v9262_v21 }
 0x285   : > { %v5100_v34 = vadd.f32 %v6348_v43, %v9273_v6  ;;  %v5108_v46 = vadd.f32 %v6357_v25, %v9273_v6  ;;  %v6350_v4 = vadd.f32 %v5037_v9, %v2558_v52  ;;  %v6361_v53 = vadd.f32 %v6360_v3, %v5057_v44  ;;  %v5039_v57 = vpop.f32.mrb[3].mxu0  ;;  %v5059_v14 = vpop.f32.mrb[19].mxu1 }
 0x286   : > { %v5101_v15 = vadd.f32 %v6349_v36, %v9275_v23  ;;  %v5109_v56 = vadd.f32 %v6359_v1, %v9275_v23  ;;  %v6351_v2 = vadd.f32 %v5039_v57, %v2560_v40  ;;  %v6363_v26 = vadd.f32 %v6362_v28, %v5059_v14 }
 0x287   : > { %v5102_v20 = vadd.f32 %v6350_v4, %v9273_v6  ;;  %v5110_v42 = vadd.f32 %v6361_v53, %v9273_v6  ;;  %v5116_v48 = vmax.f32 %v5100_v34, 0.0  ;;  %v5124_v61 = vmax.f32 %v5108_v46, 0.0 }
 0x288   : > { %v5103_v49 = vadd.f32 %v6351_v2, %v9275_v23  ;;  %v5111_v52 = vadd.f32 %v6363_v26, %v9275_v23  ;;  %v5117_v5 = vmax.f32 %v5101_v15, 0.0  ;;  %v5125_v3 = vmax.f32 %v5109_v56, 0.0 }
 0x289   : > { %v5118_v41 = vmax.f32 %v5102_v20, 0.0  ;;  %v5126_v30 = vmax.f32 %v5110_v42, 0.0 }
 0x28a   : > { %v5119_v40 = vmax.f32 %v5103_v49, 0.0  ;;  %v5127_v8 = vmax.f32 %v5111_v52, 0.0  ;;  %v5043_v29 = vpop.f32.mrb[4].mxu0  ;;  %v5063_v55 = vpop.f32.mrb[20].mxu1 }
 0x28b   : > { %v5132_v28 = vmax.f32 %v5116_v48, %v5118_v41  ;;  %v5136_v59 = vmax.f32 %v5124_v61, %v5126_v30  ;;  %v6352_v33 = vadd.f32 %v5043_v29, %v9254_v13  ;;  %v6365_v32 = vadd.f32 %v6364_v0, %v5063_v55  ;;  %v5045_v11 = vpop.f32.mrb[5].mxu0  ;;  %v5065_v31 = vpop.f32.mrb[21].mxu1 }
 0x28c   : > { %v5133_v38 = vmax.f32 %v5117_v5, %v5119_v40  ;;  %v5137_v63 = vmax.f32 %v5125_v3, %v5127_v8  ;;  %v6353_v22 = vadd.f32 %v5045_v11, %v9256_v10  ;;  %v6367_v50 = vadd.f32 %v6366_v58, %v5065_v31  ;;  %v5047_v24 = vpop.f32.mrb[6].mxu0  ;;  %v5067_v27 = vpop.f32.mrb[22].mxu1 }
 0x28d   : > { %v5104_v39 = vadd.f32 %v6352_v33, %v9273_v6  ;;  %v6354_v45 = vadd.f32 %v5047_v24, %v9258_v47  ;;  %v6369_v19 = vadd.f32 %v9264_v54, %v5067_v27  ;;  %v5049_v7 = vpop.f32.mrb[7].mxu0  ;;  %v5069_v43 = vpop.f32.mrb[23].mxu1  ;;  %v5112_v58 = vadd.f32 %v6365_v32, %v9273_v6 }
 0x28e   : > { %v5148_v25 = vcombine.low %v5132_v28, %v5133_v38  ;;  %v5149_v13 = vcombine.high %v5132_v28, %v5133_v38  ;;  %v5184_v0 = vcombine.low %v5136_v59, %v5137_v63  ;;  %v5185_v35 = vcombine.high %v5136_v59, %v5137_v63 }
 0x28f   : > { %v5120_v10 = vmax.f32 %v5104_v39, 0.0  ;;  %v5105_v36 = vadd.f32 %v6353_v22, %v9275_v23  ;;  %v5113_v1 = vadd.f32 %v6367_v50, %v9275_v23  ;;  %v5106_v21 = vadd.f32 %v6354_v45, %v9273_v6 }
 0x290   : > { %v5156_v60 = vrot.slane %v5148_v25, %v9285_v51  ;;  %v5163_v37 = vrot.slane %v5149_v13, %v9285_v51  ;;  %v5192_v47 = vrot.slane %v5184_v0, %v9285_v51  ;;  %v5199_v54 = vrot.slane %v5185_v35, %v9285_v51 }
 0x291   : > { %v5114_v9 = vadd.f32 %v6369_v19, %v9273_v6  ;;  %v5128_v49 = vmax.f32 %v5112_v58, 0.0  ;;  %v5121_v48 = vmax.f32 %v5105_v36, 0.0  ;;  %v5129_v61 = vmax.f32 %v5113_v1, 0.0 }
 0x292   : > { %v5164_v44 = vcombine.high %v5156_v60, %v5156_v60  ;;  %v5165_v16 = vcombine.high %v5163_v37, %v5163_v37  ;;  %v6313_v34 = vrot.slane %v5156_v60, 9  ;;  %v6315_v46 = vrot.slane %v5163_v37, 9 }
 0x293   : > { %v5200_v4 = vcombine.high %v5192_v47, %v5192_v47  ;;  %v5201_v53 = vcombine.high %v5199_v54, %v5199_v54  ;;  %v6321_v57 = vrot.slane %v5192_v47, 9  ;;  %v6323_v14 = vrot.slane %v5199_v54, 9 }
 0x294   : > { %v6314_v15 = vrot.slane %v5164_v44, 9  ;;  %v6316_v56 = vrot.slane %v5165_v16, 9  ;;  %v5284_v2 = vmax.f32 %v5156_v60, %v6313_v34  ;;  %v5286_v26 = vmax.f32 %v5163_v37, %v6315_v46 }
 0x295   : > { %v6322_v20 = vrot.slane %v5200_v4, 9  ;;  %v6324_v42 = vrot.slane %v5201_v53, 9  ;;  %v5292_v62 = vmax.f32 %v5192_v47, %v6321_v57  ;;  %v5294_v52 = vmax.f32 %v5199_v54, %v6323_v14 }
 0x296   : > { %v5285_v6 = vmax.f32 %v5164_v44, %v6314_v15  ;;  %v5287_v41 = vmax.f32 %v5165_v16, %v6316_v56  ;;  %v5322_v30 = vrot.slane %v5284_v2, %v9294_v17  ;;  %v5336_v5 = vrot.slane %v5286_v26, %v9294_v17 }
 0x297   : > { %v5293_v3 = vmax.f32 %v5200_v4, %v6322_v20  ;;  %v5295_v8 = vmax.f32 %v5201_v53, %v6324_v42  ;;  %v5122_v29 = vmax.f32 %v5106_v21, 0.0  ;;  %v5130_v55 = vmax.f32 %v5114_v9, 0.0 }
 0x298   : > { %v5329_v40 = vrot.slane %v5285_v6, %v9294_v17  ;;  %v5378_v28 = vrot.slane %v5292_v62, %v9294_v17  ;;  %v6355_v33 = vadd.f32 %v5049_v7, %v9260_v12  ;;  %v6371_v32 = vadd.f32 %v9267_v18, %v5069_v43 }
 0x299   : > { %v5385_v59 = vrot.slane %v5293_v3, %v9294_v17  ;;  %v5392_v31 = vrot.slane %v5294_v52, %v9294_v17  ;;  %v5134_v38 = vmax.f32 %v5120_v10, %v5122_v29  ;;  %v5138_v63 = vmax.f32 %v5128_v49, %v5130_v55 }
 0x29a   : > { %v5429_v11 = vsel %vm5428_vm4, %v5329_v40, %v5322_v30  ;;  %v5107_v24 = vadd.f32 %v6355_v33, %v9275_v23  ;;  %v5115_v27 = vadd.f32 %v6371_v32, %v9275_v23  ;;  %v5343_v39 = vrot.slane %v5287_v41, %v9294_v17 }
 0x29b   : > { %v5431_v22 = vsel %vm5430_vm5, %v5329_v40, %v5429_v11  ;;  %v5446_v50 = vsel %vm5428_vm4, %v5385_v59, %v5378_v28  ;;  %v5399_v18 = vrot.slane %v5295_v8, %v9294_v17 }
 0x29c   : > { %v5433_v12 = vsel %vm5432_vm6, %v5336_v5, %v5431_v22  ;;  %v5447_v45 = vsel %vm5430_vm5, %v5385_v59, %v5446_v50  ;;  %v5123_v23 = vmax.f32 %v5107_v24, 0.0  ;;  %v5131_v43 = vmax.f32 %v5115_v27, 0.0 }
 0x29d   : > { %v5435_v19 = vsel %vm5434_vm7, %v5336_v5, %v5433_v12  ;;  %v5448_v7 = vsel %vm5432_vm6, %v5392_v31, %v5447_v45 }
 0x29e   : > { %v5437_v25 = vsel %vm5436_vm8, %v5343_v39, %v5435_v19  ;;  %v5449_v13 = vsel %vm5434_vm7, %v5392_v31, %v5448_v7  ;;  %v5135_v10 = vmax.f32 %v5121_v48, %v5123_v23  ;;  %v5139_v58 = vmax.f32 %v5129_v61, %v5131_v43 }
 0x29f   : > { %v5439_v0 = vsel %vm5438_vm9, %v5343_v39, %v5437_v25  ;;  %v5450_v35 = vsel %vm5436_vm8, %v5399_v18, %v5449_v13 }
 0x2a0   : > { %5462 = vst [vmem:[%s9326_s23] sm:$0xff] %v5439_v0  ;;  %v5451_v60 = vsel %vm5438_vm9, %v5399_v18, %v5450_v35  ;;  %v5166_v37 = vcombine.low %v5134_v38, %v5135_v10  ;;  %v5167_v47 = vcombine.high %v5134_v38, %v5135_v10  ;;  %v5202_v54 = vcombine.low %v5138_v63, %v5139_v58 }
 0x2a1   : > { %5464 = vst [vmem:[%s9326_s23 + $0x10] sm:$0xff] %v5451_v60  ;;  %v5203_v36 = vcombine.high %v5138_v63, %v5139_v58 }
 0x2a2   : > { %v5174_v1 = vrot.slane %v5166_v37, %v9285_v51  ;;  %v5181_v21 = vrot.slane %v5167_v47, %v9285_v51  ;;  %v5210_v9 = vrot.slane %v5202_v54, %v9285_v51 }
 0x2a3   : > { %v5217_v44 = vrot.slane %v5203_v36, %v9285_v51 }
 0x2a4   : > { %v5182_v16 = vcombine.high %v5174_v1, %v5174_v1  ;;  %v5183_v34 = vcombine.high %v5181_v21, %v5181_v21  ;;  %v6317_v46 = vrot.slane %v5174_v1, 9  ;;  %v6319_v4 = vrot.slane %v5181_v21, 9 }
 0x2a5   : > { %v5218_v53 = vcombine.high %v5210_v9, %v5210_v9  ;;  %v5219_v57 = vcombine.high %v5217_v44, %v5217_v44  ;;  %v6325_v14 = vrot.slane %v5210_v9, 9  ;;  %v6327_v15 = vrot.slane %v5217_v44, 9 }
 0x2a6   : > { %v6318_v56 = vrot.slane %v5182_v16, 9  ;;  %v6320_v2 = vrot.slane %v5183_v34, 9  ;;  %v5288_v26 = vmax.f32 %v5174_v1, %v6317_v46  ;;  %v5290_v6 = vmax.f32 %v5181_v21, %v6319_v4 }
 0x2a7   : > { %v6326_v20 = vrot.slane %v5218_v53, 9  ;;  %v6328_v42 = vrot.slane %v5219_v57, 9  ;;  %v5296_v62 = vmax.f32 %v5210_v9, %v6325_v14  ;;  %v5298_v48 = vmax.f32 %v5217_v44, %v6327_v15 }
 0x2a8   : > { %v5289_v49 = vmax.f32 %v5182_v16, %v6318_v56  ;;  %v5291_v61 = vmax.f32 %v5183_v34, %v6320_v2  ;;  %v5350_v51 = vrot.slane %v5288_v26, %v9294_v17  ;;  %v5364_v40 = vrot.slane %v5290_v6, %v9294_v17 }
 0x2a9   : > { %v5297_v52 = vmax.f32 %v5218_v53, %v6326_v20  ;;  %v5299_v30 = vmax.f32 %v5219_v57, %v6328_v42  ;;  %v5406_v5 = vrot.slane %v5296_v62, %v9294_v17  ;;  %v5420_v55 = vrot.slane %v5298_v48, %v9294_v17 }
 0x2aa   : > { %v5357_v41 = vrot.slane %v5289_v49, %v9294_v17  ;;  %v5371_v59 = vrot.slane %v5291_v61, %v9294_v17 }
 0x2ab   : > { %v5413_v3 = vrot.slane %v5297_v52, %v9294_v17  ;;  %v5427_v31 = vrot.slane %v5299_v30, %v9294_v17 }
 0x2ac   : > { %v5440_v8 = vsel %vm5428_vm4, %v5357_v41, %v5350_v51 }
 0x2ad   : > { %v5441_v29 = vsel %vm5430_vm5, %v5357_v41, %v5440_v8  ;;  %v5452_v28 = vsel %vm5428_vm4, %v5413_v3, %v5406_v5 }
 0x2ae   : > { %v5442_v33 = vsel %vm5432_vm6, %v5364_v40, %v5441_v29  ;;  %v5453_v32 = vsel %vm5430_vm5, %v5413_v3, %v5452_v28 }
 0x2af   : > { %v5443_v11 = vsel %vm5434_vm7, %v5364_v40, %v5442_v33  ;;  %v5454_v38 = vsel %vm5432_vm6, %v5420_v55, %v5453_v32 }
 0x2b0   : > { %v5444_v63 = vsel %vm5436_vm8, %v5371_v59, %v5443_v11  ;;  %v5455_v22 = vsel %vm5434_vm7, %v5420_v55, %v5454_v38 }
 0x2b1   : > { %v5445_v50 = vsel %vm5438_vm9, %v5371_v59, %v5444_v63  ;;  %v5456_v24 = vsel %vm5436_vm8, %v5427_v31, %v5455_v22 }
 0x2b2   : > { %5463 = vst [vmem:[%s9326_s23 + $0x8] sm:$0xff] %v5445_v50  ;;  %v5457_v27 = vsel %vm5438_vm9, %v5427_v31, %v5456_v24 }
 0x2b3   : > { %5465 = vst [vmem:[%s9326_s23 + $0x18] sm:$0xff] %v5457_v27 }
 0x2b4 PF: > { %s13_s12 = sadd.s32 1, %s7358_s12  }
 0x2b5   : > { %p10_p4 = scmp.ge.s32.totalorder %s13_s12, 4  }
 0x2b7   :  { %12 = sbr.rel (!%p10_p4) target bundleno = 1 (0x1), region = 86 }

</bundles_post_ra>
